<compile_context>
chip_gen: v5e
topology: v5e:2x2
jax: 0.10.0
libtpu: 0.0.40
codegen_flags: <defaults>
</compile_context>

<pallas_src>
import functools

import jax
import jax.numpy as jnp
from jax.experimental import pallas as pl
from jax.experimental.pallas import tpu as pltpu

INPUT_SIZE = 1080
INPUT_PAD = 1152           # 1080 -> 1152: dense 128-lane K tiles
HIDDEN_SIZE = 240
HIDDEN_PAD = 256           # 240 -> 256: dense lanes / clean MXU tiles
OUT_FEATURES = 24
OUT_PAD = 128              # 24 -> 128: lane-dense output stores
SUBLANE = 8


def make_rnn_kernel(seq_len, batch_pad):
    """Builds the kernel closed over static seq_len / padded batch."""

    def rnn_kernel(x_ref, wih_ref, whh_ref, b_ref, wout_ref, bout_ref,
                   y_ref, xw_ref, hs_ref):
        # ---- Hoisted input projection: one bulk lane-dense matmul with the
        #      bias folded in once, staged into VMEM scratch (f32). ----
        xw_ref[...] = (jnp.dot(x_ref[...], wih_ref[...],
                               preferred_element_type=jnp.float32)
                       + b_ref[...])                     # (S*Bp, HIDDEN_PAD)

        whh = whh_ref[...]                               # (HIDDEN_PAD, HIDDEN_PAD)

        # ---- Serial recurrence: per step only an (8,256)@(256,256) matmul
        #      + add + relu, all on whole (8,128) f32 tiles.  seq_len is
        #      small & static -> fully unrolled, all slices static. ----
        h = jnp.zeros((batch_pad, HIDDEN_PAD), jnp.float32)
        for t in range(seq_len):
            lo = t * batch_pad
            hi = lo + batch_pad
            pre = xw_ref[lo:hi, :] + jnp.dot(
                h.astype(whh.dtype), whh, preferred_element_type=jnp.float32)
            h = jnp.maximum(pre, 0.0)                    # relu (f32)
            hs_ref[lo:hi, :] = h                         # full-tile store

        # ---- Hoisted output projection + single lane-dense (128-wide)
        #      bulk store.  Bulk cast of hs happens once, off the serial
        #      critical path. ----
        y_ref[...] = (jnp.dot(hs_ref[...].astype(wout_ref.dtype),
                              wout_ref[...],
                              preferred_element_type=jnp.float32)
                      + bout_ref[...])

    return rnn_kernel


def prepare_params(params, compute_dtype=jnp.float32):
    """One-time weight prep: pad + transpose + cast (hoisted out of forward)."""
    ph = HIDDEN_PAD - HIDDEN_SIZE
    pi = INPUT_PAD - INPUT_SIZE
    po = OUT_PAD - OUT_FEATURES
    wih_t = jnp.pad(params["w_ih"].T, ((0, pi), (0, ph)))        # (1152, 256)
    whh_t = jnp.pad(params["w_hh"].T, ((0, ph), (0, ph)))        # (256, 256)
    b = jnp.pad(params["b_ih"] + params["b_hh"], (0, ph)).reshape(1, HIDDEN_PAD)
    wout_t = jnp.pad(params["w_out"].T, ((0, ph), (0, po)))      # (256, 128)
    bout = jnp.pad(params["b_out"], (0, po)).reshape(1, OUT_PAD)  # (1, 128)
    return {
        "wih_t": wih_t.astype(compute_dtype),
        "whh_t": whh_t.astype(compute_dtype),
        "b": b.astype(jnp.float32),        # elementwise path stays f32 (v5e-safe)
        "wout_t": wout_t.astype(compute_dtype),
        "bout": bout.astype(jnp.float32),
    }


@jax.jit
def rnn_model_forward(x, prep):
    """x: (seq_len, batch, INPUT_SIZE) f32. Returns (seq_len, batch, 24) f32."""
    seq_len, batch, _ = x.shape
    compute_dtype = prep["wih_t"].dtype
    batch_pad = ((batch + SUBLANE - 1) // SUBLANE) * SUBLANE

    # Pad batch -> multiple of 8 sublanes and features 1080 -> 1152 lanes
    # (zero rows/cols are inert; padded batch rows are sliced off below).
    x_p = jnp.pad(x, ((0, 0), (0, batch_pad - batch), (0, INPUT_PAD - INPUT_SIZE)))
    x_flat = x_p.reshape(seq_len * batch_pad, INPUT_PAD).astype(compute_dtype)

    rows = seq_len * batch_pad
    vmem = lambda: pl.BlockSpec(memory_space=pltpu.MemorySpace.VMEM)

    y_flat = pl.pallas_call(
        make_rnn_kernel(seq_len, batch_pad),
        out_shape=jax.ShapeDtypeStruct((rows, OUT_PAD), jnp.float32),
        in_specs=[vmem() for _ in range(6)],
        out_specs=vmem(),
        scratch_shapes=[
            pltpu.VMEM((rows, HIDDEN_PAD), jnp.float32),   # staged x @ W_ih + b
            pltpu.VMEM((rows, HIDDEN_PAD), jnp.float32),   # hidden states
        ],
        compiler_params=pltpu.CompilerParams(vmem_limit_bytes=32 * 1024 * 1024),
    )(x_flat, prep["wih_t"], prep["whh_t"], prep["b"],
      prep["wout_t"], prep["bout"])

    y = y_flat.reshape(seq_len, batch_pad, OUT_PAD)
    return y[:, :batch, :OUT_FEATURES]


def reference_forward(x, params):
    """Pure-JAX reference matching PyTorch nn.RNN(relu) + nn.Linear semantics."""
    seq_len, batch, _ = x.shape
    h = jnp.zeros((batch, HIDDEN_SIZE), jnp.float32)
    b = params["b_ih"] + params["b_hh"]
    ys = []
    for t in range(seq_len):
        h = jax.nn.relu(x[t] @ params["w_ih"].T + h @ params["w_hh"].T + b)
        ys.append(h @ params["w_out"].T + params["b_out"])
    return jnp.stack(ys, axis=0)


def init_params(key):
    ks = jax.random.split(key, 6)
    k_rnn = 1.0 / jnp.sqrt(HIDDEN_SIZE)
    k_lin = 1.0 / jnp.sqrt(HIDDEN_SIZE)
    u = lambda k, shape, s: jax.random.uniform(k, shape, jnp.float32, -s, s)
    return {
        "w_ih": u(ks[0], (HIDDEN_SIZE, INPUT_SIZE), k_rnn),
        "w_hh": u(ks[1], (HIDDEN_SIZE, HIDDEN_SIZE), k_rnn),
        "b_ih": u(ks[2], (HIDDEN_SIZE,), k_rnn),
        "b_hh": u(ks[3], (HIDDEN_SIZE,), k_rnn),
        "w_out": u(ks[4], (OUT_FEATURES, HIDDEN_SIZE), k_lin),
        "b_out": u(ks[5], (OUT_FEATURES,), k_lin),
    }


if __name__ == "__main__":
    key = jax.random.PRNGKey(0)
    kp, kx = jax.random.split(key)
    params = init_params(kp)

    seq_len, batch = 8, 2
    x = jax.random.normal(kx, (seq_len, batch, INPUT_SIZE), jnp.float32)

    ref = reference_forward(x, params)

    # f32-operand path: strict semantic check.
    prep_f32 = prepare_params(params, jnp.float32)
    out_f32 = jax.block_until_ready(rnn_model_forward(x, prep_f32))
    assert out_f32.shape == (seq_len, batch, OUT_FEATURES)
    assert jnp.allclose(out_f32, ref, atol=1e-3, rtol=1e-3), "f32 mismatch vs reference"

    # bf16 MXU-operand path (v6e/v7x perf option): relaxed bf16 tolerance.
    prep_bf16 = prepare_params(params, jnp.bfloat16)
    out_bf16 = jax.block_until_ready(rnn_model_forward(x, prep_bf16))
    assert out_bf16.shape == (seq_len, batch, OUT_FEATURES)
    assert jnp.allclose(out_bf16, ref, atol=1e-1, rtol=1e-1), "bf16 mismatch vs reference"

    print("KERNEL_OK")
</pallas_src>

<mosaic_0001>
module attributes {stable_mosaic.version = 11 : i64} {
  func.func @rnn_kernel(%arg0: memref<64x1152xf32, #tpu.memory_space<vmem>>, %arg1: memref<1152x256xf32, #tpu.memory_space<vmem>>, %arg2: memref<256x256xf32, #tpu.memory_space<vmem>>, %arg3: memref<1x256xf32, #tpu.memory_space<vmem>>, %arg4: memref<256x128xf32, #tpu.memory_space<vmem>>, %arg5: memref<1x128xf32, #tpu.memory_space<vmem>>, %arg6: memref<64x128xf32, #tpu.memory_space<vmem>>, %arg7: memref<64x256xf32, #tpu.memory_space<vmem>>, %arg8: memref<64x256xf32, #tpu.memory_space<vmem>>) attributes {dimension_semantics = [], scalar_prefetch = 0 : i64, scratch_operands = 2 : i64, tpu.core_type = #tpu.core_type<tc>} {
    %c0 = arith.constant 0 : index
    %c0_0 = arith.constant 0 : index
    %0 = vector.load %arg0[%c0, %c0_0] : memref<64x1152xf32, #tpu.memory_space<vmem>>, vector<64x1152xf32>
    %c0_1 = arith.constant 0 : index
    %c0_2 = arith.constant 0 : index
    %1 = vector.load %arg1[%c0_1, %c0_2] : memref<1152x256xf32, #tpu.memory_space<vmem>>, vector<1152x256xf32>
    %cst = arith.constant dense<0.000000e+00> : vector<64x256xf32>
    %2 = tpu.matmul %0, %1, %cst {dimension_numbers = #tpu.dot_dimension_numbers<[1], [0], [0], [1], [0, 0, 1, 1], [], []>} : vector<64x1152xf32>, vector<1152x256xf32>, vector<64x256xf32> -> vector<64x256xf32>
    %c0_3 = arith.constant 0 : index
    %c0_4 = arith.constant 0 : index
    %3 = vector.load %arg3[%c0_3, %c0_4] : memref<1x256xf32, #tpu.memory_space<vmem>>, vector<1x256xf32>
    %4 = vector.broadcast %3 : vector<1x256xf32> to vector<64x256xf32>
    %5 = arith.addf %2, %4 : vector<64x256xf32>
    %c0_5 = arith.constant 0 : index
    %c0_6 = arith.constant 0 : index
    %6 = vector.load %arg7[%c0_5, %c0_6] : memref<64x256xf32, #tpu.memory_space<vmem>>, vector<64x256xf32>
    tpu.vector_store %arg7[%c0_5, %c0_6], %5 {strides = array<i32>} : memref<64x256xf32, #tpu.memory_space<vmem>>, vector<64x256xf32>,
    %c0_7 = arith.constant 0 : index
    %c0_8 = arith.constant 0 : index
    %7 = vector.load %arg2[%c0_7, %c0_8] : memref<256x256xf32, #tpu.memory_space<vmem>>, vector<256x256xf32>
    %cst_9 = arith.constant 0.000000e+00 : f32
    %8 = vector.broadcast %cst_9 : f32 to vector<8x256xf32>
    %c0_10 = arith.constant 0 : index
    %c0_11 = arith.constant 0 : index
    %9 = vector.load %arg7[%c0_10, %c0_11] : memref<64x256xf32, #tpu.memory_space<vmem>>, vector<8x256xf32>
    %cst_12 = arith.constant dense<0.000000e+00> : vector<8x256xf32>
    %10 = tpu.matmul %8, %7, %cst_12 {dimension_numbers = #tpu.dot_dimension_numbers<[1], [0], [0], [1], [0, 0, 1, 1], [], []>} : vector<8x256xf32>, vector<256x256xf32>, vector<8x256xf32> -> vector<8x256xf32>
    %11 = arith.addf %9, %10 : vector<8x256xf32>
    %cst_13 = arith.constant 0.000000e+00 : f32
    %12 = vector.broadcast %cst_13 : f32 to vector<8x256xf32>
    %13 = arith.maximumf %11, %12 : vector<8x256xf32>
    %c0_14 = arith.constant 0 : index
    %c0_15 = arith.constant 0 : index
    %14 = vector.load %arg8[%c0_14, %c0_15] : memref<64x256xf32, #tpu.memory_space<vmem>>, vector<8x256xf32>
    tpu.vector_store %arg8[%c0_14, %c0_15], %13 {strides = array<i32>} : memref<64x256xf32, #tpu.memory_space<vmem>>, vector<8x256xf32>,
    %c8 = arith.constant 8 : index
    %c0_16 = arith.constant 0 : index
    %15 = vector.load %arg7[%c8, %c0_16] : memref<64x256xf32, #tpu.memory_space<vmem>>, vector<8x256xf32>
    %cst_17 = arith.constant dense<0.000000e+00> : vector<8x256xf32>
    %16 = tpu.matmul %13, %7, %cst_17 {dimension_numbers = #tpu.dot_dimension_numbers<[1], [0], [0], [1], [0, 0, 1, 1], [], []>} : vector<8x256xf32>, vector<256x256xf32>, vector<8x256xf32> -> vector<8x256xf32>
    %17 = arith.addf %15, %16 : vector<8x256xf32>
    %cst_18 = arith.constant 0.000000e+00 : f32
    %18 = vector.broadcast %cst_18 : f32 to vector<8x256xf32>
    %19 = arith.maximumf %17, %18 : vector<8x256xf32>
    %c8_19 = arith.constant 8 : index
    %c0_20 = arith.constant 0 : index
    %20 = vector.load %arg8[%c8_19, %c0_20] : memref<64x256xf32, #tpu.memory_space<vmem>>, vector<8x256xf32>
    tpu.vector_store %arg8[%c8_19, %c0_20], %19 {strides = array<i32>} : memref<64x256xf32, #tpu.memory_space<vmem>>, vector<8x256xf32>,
    %c16 = arith.constant 16 : index
    %c0_21 = arith.constant 0 : index
    %21 = vector.load %arg7[%c16, %c0_21] : memref<64x256xf32, #tpu.memory_space<vmem>>, vector<8x256xf32>
    %cst_22 = arith.constant dense<0.000000e+00> : vector<8x256xf32>
    %22 = tpu.matmul %19, %7, %cst_22 {dimension_numbers = #tpu.dot_dimension_numbers<[1], [0], [0], [1], [0, 0, 1, 1], [], []>} : vector<8x256xf32>, vector<256x256xf32>, vector<8x256xf32> -> vector<8x256xf32>
    %23 = arith.addf %21, %22 : vector<8x256xf32>
    %cst_23 = arith.constant 0.000000e+00 : f32
    %24 = vector.broadcast %cst_23 : f32 to vector<8x256xf32>
    %25 = arith.maximumf %23, %24 : vector<8x256xf32>
    %c16_24 = arith.constant 16 : index
    %c0_25 = arith.constant 0 : index
    %26 = vector.load %arg8[%c16_24, %c0_25] : memref<64x256xf32, #tpu.memory_space<vmem>>, vector<8x256xf32>
    tpu.vector_store %arg8[%c16_24, %c0_25], %25 {strides = array<i32>} : memref<64x256xf32, #tpu.memory_space<vmem>>, vector<8x256xf32>,
    %c24 = arith.constant 24 : index
    %c0_26 = arith.constant 0 : index
    %27 = vector.load %arg7[%c24, %c0_26] : memref<64x256xf32, #tpu.memory_space<vmem>>, vector<8x256xf32>
    %cst_27 = arith.constant dense<0.000000e+00> : vector<8x256xf32>
    %28 = tpu.matmul %25, %7, %cst_27 {dimension_numbers = #tpu.dot_dimension_numbers<[1], [0], [0], [1], [0, 0, 1, 1], [], []>} : vector<8x256xf32>, vector<256x256xf32>, vector<8x256xf32> -> vector<8x256xf32>
    %29 = arith.addf %27, %28 : vector<8x256xf32>
    %cst_28 = arith.constant 0.000000e+00 : f32
    %30 = vector.broadcast %cst_28 : f32 to vector<8x256xf32>
    %31 = arith.maximumf %29, %30 : vector<8x256xf32>
    %c24_29 = arith.constant 24 : index
    %c0_30 = arith.constant 0 : index
    %32 = vector.load %arg8[%c24_29, %c0_30] : memref<64x256xf32, #tpu.memory_space<vmem>>, vector<8x256xf32>
    tpu.vector_store %arg8[%c24_29, %c0_30], %31 {strides = array<i32>} : memref<64x256xf32, #tpu.memory_space<vmem>>, vector<8x256xf32>,
    %c32 = arith.constant 32 : index
    %c0_31 = arith.constant 0 : index
    %33 = vector.load %arg7[%c32, %c0_31] : memref<64x256xf32, #tpu.memory_space<vmem>>, vector<8x256xf32>
    %cst_32 = arith.constant dense<0.000000e+00> : vector<8x256xf32>
    %34 = tpu.matmul %31, %7, %cst_32 {dimension_numbers = #tpu.dot_dimension_numbers<[1], [0], [0], [1], [0, 0, 1, 1], [], []>} : vector<8x256xf32>, vector<256x256xf32>, vector<8x256xf32> -> vector<8x256xf32>
    %35 = arith.addf %33, %34 : vector<8x256xf32>
    %cst_33 = arith.constant 0.000000e+00 : f32
    %36 = vector.broadcast %cst_33 : f32 to vector<8x256xf32>
    %37 = arith.maximumf %35, %36 : vector<8x256xf32>
    %c32_34 = arith.constant 32 : index
    %c0_35 = arith.constant 0 : index
    %38 = vector.load %arg8[%c32_34, %c0_35] : memref<64x256xf32, #tpu.memory_space<vmem>>, vector<8x256xf32>
    tpu.vector_store %arg8[%c32_34, %c0_35], %37 {strides = array<i32>} : memref<64x256xf32, #tpu.memory_space<vmem>>, vector<8x256xf32>,
    %c40 = arith.constant 40 : index
    %c0_36 = arith.constant 0 : index
    %39 = vector.load %arg7[%c40, %c0_36] : memref<64x256xf32, #tpu.memory_space<vmem>>, vector<8x256xf32>
    %cst_37 = arith.constant dense<0.000000e+00> : vector<8x256xf32>
    %40 = tpu.matmul %37, %7, %cst_37 {dimension_numbers = #tpu.dot_dimension_numbers<[1], [0], [0], [1], [0, 0, 1, 1], [], []>} : vector<8x256xf32>, vector<256x256xf32>, vector<8x256xf32> -> vector<8x256xf32>
    %41 = arith.addf %39, %40 : vector<8x256xf32>
    %cst_38 = arith.constant 0.000000e+00 : f32
    %42 = vector.broadcast %cst_38 : f32 to vector<8x256xf32>
    %43 = arith.maximumf %41, %42 : vector<8x256xf32>
    %c40_39 = arith.constant 40 : index
    %c0_40 = arith.constant 0 : index
    %44 = vector.load %arg8[%c40_39, %c0_40] : memref<64x256xf32, #tpu.memory_space<vmem>>, vector<8x256xf32>
    tpu.vector_store %arg8[%c40_39, %c0_40], %43 {strides = array<i32>} : memref<64x256xf32, #tpu.memory_space<vmem>>, vector<8x256xf32>,
    %c48 = arith.constant 48 : index
    %c0_41 = arith.constant 0 : index
    %45 = vector.load %arg7[%c48, %c0_41] : memref<64x256xf32, #tpu.memory_space<vmem>>, vector<8x256xf32>
    %cst_42 = arith.constant dense<0.000000e+00> : vector<8x256xf32>
    %46 = tpu.matmul %43, %7, %cst_42 {dimension_numbers = #tpu.dot_dimension_numbers<[1], [0], [0], [1], [0, 0, 1, 1], [], []>} : vector<8x256xf32>, vector<256x256xf32>, vector<8x256xf32> -> vector<8x256xf32>
    %47 = arith.addf %45, %46 : vector<8x256xf32>
    %cst_43 = arith.constant 0.000000e+00 : f32
    %48 = vector.broadcast %cst_43 : f32 to vector<8x256xf32>
    %49 = arith.maximumf %47, %48 : vector<8x256xf32>
    %c48_44 = arith.constant 48 : index
    %c0_45 = arith.constant 0 : index
    %50 = vector.load %arg8[%c48_44, %c0_45] : memref<64x256xf32, #tpu.memory_space<vmem>>, vector<8x256xf32>
    tpu.vector_store %arg8[%c48_44, %c0_45], %49 {strides = array<i32>} : memref<64x256xf32, #tpu.memory_space<vmem>>, vector<8x256xf32>,
    %c56 = arith.constant 56 : index
    %c0_46 = arith.constant 0 : index
    %51 = vector.load %arg7[%c56, %c0_46] : memref<64x256xf32, #tpu.memory_space<vmem>>, vector<8x256xf32>
    %cst_47 = arith.constant dense<0.000000e+00> : vector<8x256xf32>
    %52 = tpu.matmul %49, %7, %cst_47 {dimension_numbers = #tpu.dot_dimension_numbers<[1], [0], [0], [1], [0, 0, 1, 1], [], []>} : vector<8x256xf32>, vector<256x256xf32>, vector<8x256xf32> -> vector<8x256xf32>
    %53 = arith.addf %51, %52 : vector<8x256xf32>
    %cst_48 = arith.constant 0.000000e+00 : f32
    %54 = vector.broadcast %cst_48 : f32 to vector<8x256xf32>
    %55 = arith.maximumf %53, %54 : vector<8x256xf32>
    %c56_49 = arith.constant 56 : index
    %c0_50 = arith.constant 0 : index
    %56 = vector.load %arg8[%c56_49, %c0_50] : memref<64x256xf32, #tpu.memory_space<vmem>>, vector<8x256xf32>
    tpu.vector_store %arg8[%c56_49, %c0_50], %55 {strides = array<i32>} : memref<64x256xf32, #tpu.memory_space<vmem>>, vector<8x256xf32>,
    %c0_51 = arith.constant 0 : index
    %c0_52 = arith.constant 0 : index
    %57 = vector.load %arg8[%c0_51, %c0_52] : memref<64x256xf32, #tpu.memory_space<vmem>>, vector<64x256xf32>
    %c0_53 = arith.constant 0 : index
    %c0_54 = arith.constant 0 : index
    %58 = vector.load %arg4[%c0_53, %c0_54] : memref<256x128xf32, #tpu.memory_space<vmem>>, vector<256x128xf32>
    %cst_55 = arith.constant dense<0.000000e+00> : vector<64x128xf32>
    %59 = tpu.matmul %57, %58, %cst_55 {dimension_numbers = #tpu.dot_dimension_numbers<[1], [0], [0], [1], [0, 0, 1, 1], [], []>} : vector<64x256xf32>, vector<256x128xf32>, vector<64x128xf32> -> vector<64x128xf32>
    %c0_56 = arith.constant 0 : index
    %c0_57 = arith.constant 0 : index
    %60 = vector.load %arg5[%c0_56, %c0_57] : memref<1x128xf32, #tpu.memory_space<vmem>>, vector<1x128xf32>
    %61 = vector.broadcast %60 : vector<1x128xf32> to vector<64x128xf32>
    %62 = arith.addf %59, %61 : vector<64x128xf32>
    %c0_58 = arith.constant 0 : index
    %c0_59 = arith.constant 0 : index
    %63 = vector.load %arg6[%c0_58, %c0_59] : memref<64x128xf32, #tpu.memory_space<vmem>>, vector<64x128xf32>
    tpu.vector_store %arg6[%c0_58, %c0_59], %62 {strides = array<i32>} : memref<64x128xf32, #tpu.memory_space<vmem>>, vector<64x128xf32>,
    return
  }
}

</mosaic_0001>

<bundles_post_ra>
// kernel: rnn_model_forward.1
= control target key start
LH: loop header
LB: loop body
LE: loop exit
PB: predicated region body
PF: predicated region fallthrough
CT: control target
= control target key end

     0   :  { %11 = vsyncpa [#allocation5], 0  ;;  %s4110_s0 = inlined_call_operand.vmem [shape: f32[64,1152], index: 0, kind: input, shape index: {}]   ;;  %s4111_s1 = inlined_call_operand.hbm [shape: f32[1152,256], index: 1, kind: input, shape index: {}]   ;;  %s4112_s2 = inlined_call_operand.hbm [shape: f32[256,256], index: 2, kind: input, shape index: {}]   ;;  %s4113_s3 = inlined_call_operand.hbm [shape: f32[1,256], index: 3, kind: input, shape index: {}]   ;;  %s4114_s4 = inlined_call_operand.hbm [shape: f32[256,128], index: 4, kind: input, shape index: {}]   ;;  %s4115_s5 = inlined_call_operand.hbm [shape: f32[1,128], index: 5, kind: input, shape index: {}]   ;;  %s4116_s6 = inlined_call_operand.vmem [shape: f32[64,128], index: 6, kind: output, shape index: {}]  }
   0x1   :  { %12 = vsyncpa [#allocation7], 0 }
   0x2   :  { %13 = vsyncpa [#allocation10], 0  ;;  %s33_s23 = sshll.u32 %s4112_s2, 4  ;;  %s2391_s24 = smov [#allocation6]   ;;  %s34_s23 = int_to_ptr.hbm [resolvable:$true] %s33_s23 }
   0x3   :  { %s35_s25 = sshll.u32 %s2391_s24, 4  ;;  %s57_s28 = sshll.u32 %s4114_s4, 4  ;;  %s36_s25 = int_to_ptr.vmem [resolvable:$true] %s35_s25  ;;  %s58_s28 = int_to_ptr.hbm [resolvable:$true] %s57_s28 }
   0x4   :  { %s2392_s29 = smov 256   ;;  %s2393_s30 = smov 16  }
   0x5   :  { %41 = dma.hbm_to_vmem [thread:$0]  %s34_s23, 8192, %s36_s25, [#allocation7], %s2392_s29, %s2392_s29, %s2393_s30  }
   0x6   :  { %s2394_s7 = smov [#allocation9]   ;;  %s2395_s9 = smov 128  }
   0x7   :  { %s59_s8 = sshll.u32 %s2394_s7, 4  ;;  %s2396_s10 = smov 8   ;;  %s60_s8 = int_to_ptr.vmem [resolvable:$true] %s59_s8 }
   0x8   :  { %65 = dma.hbm_to_vmem [thread:$0]  %s58_s28, 4096, %s60_s8, [#allocation10], %s2395_s9, %s2395_s9, %s2396_s10  }
   0x9   :  { %s20_s12 = sshll.u32 %s4111_s1, 4  ;;  %s2397_s13 = smov [#allocation4]   ;;  %s21_s12 = int_to_ptr.hbm [resolvable:$true] %s20_s12 }
   0xa   :  { %s22_s14 = sshll.u32 %s2397_s13, 4  ;;  %s47_s16 = sshll.u32 %s4113_s3, 4  ;;  %s23_s14 = int_to_ptr.vmem [resolvable:$true] %s22_s14  ;;  %s48_s16 = int_to_ptr.hbm [resolvable:$true] %s47_s16 }
   0xb   :  { %28 = dma.hbm_to_vmem [thread:$0]  %s21_s12, 36864, %s23_s14, [#allocation5], %s2392_s29, %s2392_s29, %s2393_s30  }
   0xc   :  { %s2398_s17 = smov [#allocation8]   ;;  %s71_s21 = sshll.u32 %s4115_s5, 4  ;;  %s72_s21 = int_to_ptr.hbm [resolvable:$true] %s71_s21 }
   0xd   :  { %s49_s18 = sshll.u32 %s2398_s17, 4  ;;  %s2399_s1 = smov [#allocation11]   ;;  %s50_s18 = int_to_ptr.vmem [resolvable:$true] %s49_s18 }
   0xe   :  { %52 = dma.hbm_to_vmem [thread:$0]  %s48_s16, 32, %s50_s18, [#allocation7]  }
   0xf   :  { %s73_s22 = sshll.u32 %s2399_s1, 4  ;;  %s74_s22 = int_to_ptr.vmem [resolvable:$true] %s73_s22 }
  0x10   :  { %76 = dma.hbm_to_vmem [thread:$0]  %s72_s21, 16, %s74_s22, [#allocation10]  }
  0x11   :  { %2385 = dma.done.wait [#allocation5], 36864  }
  0x12   :  { %2386 = vsyncadd [#allocation5], 4294930432 }
  0x13   :  { %2387 = dma.done.wait [#allocation7], 8224  }
  0x14   :  { %2388 = vsyncadd [#allocation7], 4294959072 }
  0x15   :  { %2389 = dma.done.wait [#allocation10], 4112  }
  0x16   :  { %2390 = vsyncadd [#allocation10], 4294963184  ;;  %v199_v0 = vld [vmem:[#allocation4 + $0xf0] sm:$0xff]  ;;  %v197_v2 = vld [vmem:[#allocation4 + $0xe0] sm:$0xff] }
  0x17   :  { %v231_v1 = vld [vmem:[#allocation4 + $0x1f0] sm:$0xff]  ;;  %2134 = vmatpush.msra.mxu2 %v199_v0  ;;  %v229_v3 = vld [vmem:[#allocation4 + $0x1e0] sm:$0xff]  ;;  %463 = vmatpush.msra.mxu0 %v199_v0  ;;  %v134_v33 = vld [vmem:[%s4110_s0 + $0x128] sm:$0xff] }
  0x18   :  { %2150 = vmatpush.msra.mxu3 %v231_v1  ;;  %v195_v4 = vld [vmem:[#allocation4 + $0xd0] sm:$0xff]  ;;  %504 = vmatpush.msra.mxu1 %v231_v1  ;;  %v193_v6 = vld [vmem:[#allocation4 + $0xc0] sm:$0xff]  ;;  %v98_v39 = vld [vmem:[%s4110_s0 + $0x8] sm:$0xff] }
  0x19   :  { %v227_v5 = vld [vmem:[#allocation4 + $0x1d0] sm:$0xff]  ;;  %2135 = vmatpush.msra.mxu2 %v197_v2  ;;  %v225_v7 = vld [vmem:[#allocation4 + $0x1c0] sm:$0xff]  ;;  %464 = vmatpush.msra.mxu0 %v197_v2  ;;  %v142_v46 = vld [vmem:[%s4110_s0 + $0x168] sm:$0xff] }
  0x1a   :  { %2151 = vmatpush.msra.mxu3 %v229_v3  ;;  %505 = vmatpush.msra.mxu1 %v229_v3  ;;  %v191_v8 = vld [vmem:[#allocation4 + $0xb0] sm:$0xff]  ;;  %v189_v10 = vld [vmem:[#allocation4 + $0xa0] sm:$0xff]  ;;  %v152_v63 = vld [vmem:[%s4110_s0 + $0x1b8] sm:$0xff] }
  0x1b   :  { %2136 = vmatpush.msra.mxu2 %v195_v4  ;;  %v223_v9 = vld [vmem:[#allocation4 + $0x1b0] sm:$0xff]  ;;  %465 = vmatpush.msra.mxu0 %v195_v4  ;;  %v221_v11 = vld [vmem:[#allocation4 + $0x1a0] sm:$0xff]  ;;  %v2481_v2 = vld [vmem:[%s4110_s0 + $0x48] sm:$0xff] }
  0x1c   :  { %2152 = vmatpush.msra.mxu3 %v227_v5  ;;  %506 = vmatpush.msra.mxu1 %v227_v5  ;;  %v187_v12 = vld [vmem:[#allocation4 + $0x90] sm:$0xff]  ;;  %v185_v14 = vld [vmem:[#allocation4 + $0x80] sm:$0xff] }
  0x1d   :  { %2137 = vmatpush.msra.mxu2 %v193_v6  ;;  %466 = vmatpush.msra.mxu0 %v193_v6  ;;  %v219_v13 = vld [vmem:[#allocation4 + $0x190] sm:$0xff]  ;;  %v217_v15 = vld [vmem:[#allocation4 + $0x180] sm:$0xff] }
  0x1e   :  { %2153 = vmatpush.msra.mxu3 %v225_v7  ;;  %507 = vmatpush.msra.mxu1 %v225_v7  ;;  %v183_v16 = vld [vmem:[#allocation4 + $0x70] sm:$0xff]  ;;  %v181_v18 = vld [vmem:[#allocation4 + $0x60] sm:$0xff] }
  0x1f   :  { %2138 = vmatpush.msra.mxu2 %v191_v8  ;;  %467 = vmatpush.msra.mxu0 %v191_v8  ;;  %v215_v17 = vld [vmem:[#allocation4 + $0x170] sm:$0xff]  ;;  %v213_v19 = vld [vmem:[#allocation4 + $0x160] sm:$0xff] }
  0x20   :  { %2154 = vmatpush.msra.mxu3 %v223_v9  ;;  %508 = vmatpush.msra.mxu1 %v223_v9  ;;  %v179_v20 = vld [vmem:[#allocation4 + $0x50] sm:$0xff]  ;;  %v177_v22 = vld [vmem:[#allocation4 + $0x40] sm:$0xff] }
  0x21   :  { %2139 = vmatpush.msra.mxu2 %v189_v10  ;;  %468 = vmatpush.msra.mxu0 %v189_v10  ;;  %v211_v21 = vld [vmem:[#allocation4 + $0x150] sm:$0xff]  ;;  %v209_v23 = vld [vmem:[#allocation4 + $0x140] sm:$0xff] }
  0x22   :  { %2155 = vmatpush.msra.mxu3 %v221_v11  ;;  %509 = vmatpush.msra.mxu1 %v221_v11  ;;  %v175_v24 = vld [vmem:[#allocation4 + $0x30] sm:$0xff]  ;;  %v173_v26 = vld [vmem:[#allocation4 + $0x20] sm:$0xff] }
  0x23   :  { %2140 = vmatpush.msra.mxu2 %v187_v12  ;;  %469 = vmatpush.msra.mxu0 %v187_v12  ;;  %v207_v25 = vld [vmem:[#allocation4 + $0x130] sm:$0xff]  ;;  %v205_v27 = vld [vmem:[#allocation4 + $0x120] sm:$0xff] }
  0x24   :  { %2156 = vmatpush.msra.mxu3 %v219_v13  ;;  %510 = vmatpush.msra.mxu1 %v219_v13  ;;  %v171_v28 = vld [vmem:[#allocation4 + $0x10] sm:$0xff]  ;;  %v169_v30 = vld [vmem:[#allocation4] sm:$0xff] }
  0x25   :  { %2141 = vmatpush.msra.mxu2 %v185_v14  ;;  %470 = vmatpush.msra.mxu0 %v185_v14  ;;  %v203_v29 = vld [vmem:[#allocation4 + $0x110] sm:$0xff]  ;;  %v201_v31 = vld [vmem:[#allocation4 + $0x100] sm:$0xff] }
  0x26   :  { %2157 = vmatpush.msra.mxu3 %v217_v15  ;;  %511 = vmatpush.msra.mxu1 %v217_v15  ;;  %v133_v32 = vld [vmem:[%s4110_s0 + $0x120] sm:$0xff]  ;;  %v263_v34 = vld [vmem:[#allocation4 + $0x2f0] sm:$0xff]  ;;  %v160_v15 = vld [vmem:[%s4110_s0 + $0x1f8] sm:$0xff] }
  0x27   :  { %2142 = vmatpush.msra.mxu2 %v183_v16  ;;  %471 = vmatpush.msra.mxu0 %v183_v16  ;;  %v295_v35 = vld [vmem:[#allocation4 + $0x3f0] sm:$0xff]  ;;  %v261_v36 = vld [vmem:[#allocation4 + $0x2e0] sm:$0xff] }
  0x28   :  { %2158 = vmatpush.msra.mxu3 %v215_v17  ;;  %512 = vmatpush.msra.mxu1 %v215_v17  ;;  %v293_v37 = vld [vmem:[#allocation4 + $0x3e0] sm:$0xff]  ;;  %v259_v40 = vld [vmem:[#allocation4 + $0x2d0] sm:$0xff] }
  0x29   :  { %2143 = vmatpush.msra.mxu2 %v181_v18  ;;  %472 = vmatpush.msra.mxu0 %v181_v18  ;;  %v2460_v38 = vld [vmem:[%s4110_s0] sm:$0xff]  ;;  %v291_v41 = vld [vmem:[#allocation4 + $0x3d0] sm:$0xff] }
  0x2a   :  { %2159 = vmatpush.msra.mxu3 %v213_v19  ;;  %513 = vmatpush.msra.mxu1 %v213_v19  ;;  %v327_v42 = vld [vmem:[#allocation4 + $0x4f0] sm:$0xff]  ;;  %v257_v44 = vld [vmem:[#allocation4 + $0x2c0] sm:$0xff] }
  0x2b   :  { %2144 = vmatpush.msra.mxu2 %v179_v20  ;;  %473 = vmatpush.msra.mxu0 %v179_v20  ;;  %v359_v43 = vld [vmem:[#allocation4 + $0x5f0] sm:$0xff]  ;;  %v289_v45 = vld [vmem:[#allocation4 + $0x3c0] sm:$0xff] }
  0x2c   :  { %2160 = vmatpush.msra.mxu3 %v211_v21  ;;  %514 = vmatpush.msra.mxu1 %v211_v21  ;;  %v143_v47 = vld [vmem:[%s4110_s0 + $0x170] sm:$0xff]  ;;  %v325_v50 = vld [vmem:[#allocation4 + $0x4e0] sm:$0xff] }
  0x2d   :  { %2145 = vmatpush.msra.mxu2 %v177_v22  ;;  %474 = vmatpush.msra.mxu0 %v177_v22  ;;  %v255_v48 = vld [vmem:[#allocation4 + $0x2b0] sm:$0xff]  ;;  %v357_v51 = vld [vmem:[#allocation4 + $0x5e0] sm:$0xff] }
  0x2e   :  { %2161 = vmatpush.msra.mxu3 %v209_v23  ;;  %515 = vmatpush.msra.mxu1 %v209_v23  ;;  %v287_v49 = vld [vmem:[#allocation4 + $0x3b0] sm:$0xff]  ;;  %v253_v52 = vld [vmem:[#allocation4 + $0x2a0] sm:$0xff] }
  0x2f   :  { %2146 = vmatpush.msra.mxu2 %v175_v24  ;;  %475 = vmatpush.msra.mxu0 %v175_v24  ;;  %v285_v53 = vld [vmem:[#allocation4 + $0x3a0] sm:$0xff]  ;;  %v323_v54 = vld [vmem:[#allocation4 + $0x4d0] sm:$0xff] }
  0x30   :  { %2162 = vmatpush.msra.mxu3 %v207_v25  ;;  %516 = vmatpush.msra.mxu1 %v207_v25  ;;  %v355_v55 = vld [vmem:[#allocation4 + $0x5d0] sm:$0xff]  ;;  %v321_v58 = vld [vmem:[#allocation4 + $0x4c0] sm:$0xff] }
  0x31   :  { %2147 = vmatpush.msra.mxu2 %v173_v26  ;;  %476 = vmatpush.msra.mxu0 %v173_v26  ;;  %v251_v56 = vld [vmem:[#allocation4 + $0x290] sm:$0xff]  ;;  %v353_v59 = vld [vmem:[#allocation4 + $0x5c0] sm:$0xff]  ;;  %v116_v26 = vld [vmem:[%s4110_s0 + $0x98] sm:$0xff] }
  0x32   :  { %2163 = vmatpush.msra.mxu3 %v205_v27  ;;  %517 = vmatpush.msra.mxu1 %v205_v27  ;;  %v283_v57 = vld [vmem:[#allocation4 + $0x390] sm:$0xff]  ;;  %v249_v60 = vld [vmem:[#allocation4 + $0x280] sm:$0xff] }
  0x33   :  { %2148 = vmatpush.msra.mxu2 %v171_v28  ;;  %477 = vmatpush.msra.mxu0 %v171_v28  ;;  %v281_v61 = vld [vmem:[#allocation4 + $0x380] sm:$0xff]  ;;  %v151_v62 = vld [vmem:[%s4110_s0 + $0x1b0] sm:$0xff] }
  0x34   :  { %2164 = vmatpush.msra.mxu3 %v203_v29  ;;  %518 = vmatpush.msra.mxu1 %v203_v29  ;;  %v247_v0 = vld [vmem:[#allocation4 + $0x270] sm:$0xff]  ;;  %v245_v4 = vld [vmem:[#allocation4 + $0x260] sm:$0xff] }
  0x35   :  { %2149 = vmatpush.msra.mxu2 %v169_v30  ;;  %478 = vmatpush.msra.mxu0 %v169_v30  ;;  %v279_v1 = vld [vmem:[#allocation4 + $0x370] sm:$0xff]  ;;  %v277_v5 = vld [vmem:[#allocation4 + $0x360] sm:$0xff] }
  0x36   :  { %2165 = vmatpush.msra.mxu3 %v201_v31  ;;  %491 = vmatmul.f32.vlgmr.msra.gmra.mxu2 %v133_v32  ;;  %v107_v3 = vld [vmem:[%s4110_s0 + $0x50] sm:$0xff]  ;;  %v317_v10 = vld [vmem:[#allocation4 + $0x4a0] sm:$0xff] }
  0x37   :  { %532 = vmatmul.f32.vlgmr.msra.gmra.mxu3 %v134_v33  ;;  %545 = vmatpush.msrb.mxu2 %v263_v34  ;;  %v319_v6 = vld [vmem:[#allocation4 + $0x4b0] sm:$0xff]  ;;  %v349_v11 = vld [vmem:[#allocation4 + $0x5a0] sm:$0xff] }
  0x38   :  { %586 = vmatpush.msrb.mxu3 %v295_v35  ;;  %519 = vmatpush.msra.mxu1 %v201_v31  ;;  %v351_v7 = vld [vmem:[#allocation4 + $0x5b0] sm:$0xff]  ;;  %v241_v12 = vld [vmem:[#allocation4 + $0x240] sm:$0xff] }
  0x39   :  { %546 = vmatpush.msrb.mxu2 %v261_v36  ;;  %479 = vmatmul.f32.vlgmr.msra.gmra.mxu0 %v2460_v38  ;;  %v243_v8 = vld [vmem:[#allocation4 + $0x250] sm:$0xff]  ;;  %v273_v13 = vld [vmem:[#allocation4 + $0x340] sm:$0xff]  ;;  %v2510_v36 = vld [vmem:[%s4110_s0 + $0x18] sm:$0xff] }
  0x3a   :  { %587 = vmatpush.msrb.mxu3 %v293_v37  ;;  %520 = vmatmul.f32.vlgmr.msra.gmra.mxu1 %v98_v39  ;;  %v275_v9 = vld [vmem:[#allocation4 + $0x350] sm:$0xff]  ;;  %v161_v16 = vld [vmem:[%s4110_s0 + $0x200] sm:$0xff] }
  0x3b   :  { %547 = vmatpush.msrb.mxu2 %v259_v40  ;;  %627 = vmatpush.msrb.mxu0 %v327_v42  ;;  %v315_v14 = vld [vmem:[#allocation4 + $0x490] sm:$0xff]  ;;  %v313_v19 = vld [vmem:[#allocation4 + $0x480] sm:$0xff]  ;;  %v2516_v42 = vld [vmem:[%s4110_s0 + $0xd8] sm:$0xff] }
  0x3c   :  { %588 = vmatpush.msrb.mxu3 %v291_v41  ;;  %668 = vmatpush.msrb.mxu1 %v359_v43  ;;  %v239_v17 = vld [vmem:[#allocation4 + $0x230] sm:$0xff]  ;;  %v237_v22 = vld [vmem:[#allocation4 + $0x220] sm:$0xff] }
  0x3d   :  { %548 = vmatpush.msrb.mxu2 %v257_v44  ;;  %628 = vmatpush.msrb.mxu0 %v325_v50  ;;  %v271_v18 = vld [vmem:[#allocation4 + $0x330] sm:$0xff]  ;;  %v269_v23 = vld [vmem:[#allocation4 + $0x320] sm:$0xff] }
  0x3e   :  { %589 = vmatpush.msrb.mxu3 %v289_v45  ;;  %494 = vmatmul.f32.gmra.mxu2 %v142_v46  ;;  %v347_v20 = vld [vmem:[#allocation4 + $0x590] sm:$0xff]  ;;  %v345_v25 = vld [vmem:[#allocation4 + $0x580] sm:$0xff] }
  0x3f   :  { %535 = vmatmul.f32.gmra.mxu3 %v143_v47  ;;  %549 = vmatpush.msrb.mxu2 %v255_v48  ;;  %v2496_v21 = vld [vmem:[%s4110_s0 + $0x90] sm:$0xff]  ;;  %v309_v29 = vld [vmem:[#allocation4 + $0x460] sm:$0xff] }
  0x40   :  { %590 = vmatpush.msrb.mxu3 %v287_v49  ;;  %669 = vmatpush.msrb.mxu1 %v357_v51  ;;  %v311_v24 = vld [vmem:[#allocation4 + $0x470] sm:$0xff]  ;;  %v233_v31 = vld [vmem:[#allocation4 + $0x200] sm:$0xff] }
  0x41   :  { %550 = vmatpush.msrb.mxu2 %v253_v52  ;;  %629 = vmatpush.msrb.mxu0 %v323_v54  ;;  %v235_v27 = vld [vmem:[#allocation4 + $0x210] sm:$0xff]  ;;  %v265_v32 = vld [vmem:[#allocation4 + $0x300] sm:$0xff]  ;;  %v2526_v52 = vld [vmem:[%s4110_s0 + $0x58] sm:$0xff] }
  0x42   :  { %591 = vmatpush.msrb.mxu3 %v285_v53  ;;  %670 = vmatpush.msrb.mxu1 %v355_v55  ;;  %v267_v28 = vld [vmem:[#allocation4 + $0x310] sm:$0xff]  ;;  %v341_v34 = vld [vmem:[#allocation4 + $0x560] sm:$0xff] }
  0x43   :  { %551 = vmatpush.msrb.mxu2 %v251_v56  ;;  %630 = vmatpush.msrb.mxu0 %v321_v58  ;;  %v343_v30 = vld [vmem:[#allocation4 + $0x570] sm:$0xff]  ;;  %v305_v40 = vld [vmem:[#allocation4 + $0x440] sm:$0xff] }
  0x44   :  { %592 = vmatpush.msrb.mxu3 %v283_v57  ;;  %671 = vmatpush.msrb.mxu1 %v353_v59  ;;  %v307_v33 = vld [vmem:[#allocation4 + $0x450] sm:$0xff]  ;;  %v125_v44 = vld [vmem:[%s4110_s0 + $0xe0] sm:$0xff] }
  0x45   :  { %552 = vmatpush.msrb.mxu2 %v249_v60  ;;  %482 = vmatmul.f32.gmra.mxu0 %v2481_v2  ;;  %v2505_v35 = vld [vmem:[%s4110_s0 + $0x10] sm:$0xff]  ;;  %v337_v45 = vld [vmem:[#allocation4 + $0x540] sm:$0xff] }
  0x46   :  { %593 = vmatpush.msrb.mxu3 %v281_v61  ;;  %497 = vmatmul.f32.gmra.mxu2 %v151_v62  ;;  %v391_v37 = vld [vmem:[#allocation4 + $0x6f0] sm:$0xff]  ;;  %v389_v46 = vld [vmem:[#allocation4 + $0x6e0] sm:$0xff]  ;;  %v102_v62 = vld [vmem:[%s4110_s0 + $0x28] sm:$0xff] }
  0x47   :  { %538 = vmatmul.f32.gmra.mxu3 %v152_v63  ;;  %553 = vmatpush.msrb.mxu2 %v247_v0  ;;  %v423_v39 = vld [vmem:[#allocation4 + $0x7f0] sm:$0xff]  ;;  %v421_v47 = vld [vmem:[#allocation4 + $0x7e0] sm:$0xff] }
  0x48   :  { %594 = vmatpush.msrb.mxu3 %v279_v1  ;;  %523 = vmatmul.f32.gmra.mxu1 %v107_v3  ;;  %v339_v41 = vld [vmem:[#allocation4 + $0x550] sm:$0xff]  ;;  %v301_v48 = vld [vmem:[#allocation4 + $0x420] sm:$0xff] }
  0x49   :  { %554 = vmatpush.msrb.mxu2 %v245_v4  ;;  %631 = vmatpush.msrb.mxu0 %v319_v6  ;;  %v303_v43 = vld [vmem:[#allocation4 + $0x430] sm:$0xff]  ;;  %v333_v53 = vld [vmem:[#allocation4 + $0x520] sm:$0xff]  ;;  %v2552_v4 = vld [vmem:[%s4110_s0 + $0xa8] sm:$0xff] }
  0x4a   :  { %595 = vmatpush.msrb.mxu3 %v277_v5  ;;  %672 = vmatpush.msrb.mxu1 %v351_v7  ;;  %v335_v49 = vld [vmem:[#allocation4 + $0x530] sm:$0xff]  ;;  %v2531_v54 = vld [vmem:[%s4110_s0 + $0x60] sm:$0xff] }
  0x4b   :  { %555 = vmatpush.msrb.mxu2 %v243_v8  ;;  %632 = vmatpush.msrb.mxu0 %v317_v10  ;;  %v387_v50 = vld [vmem:[#allocation4 + $0x6d0] sm:$0xff]  ;;  %v297_v56 = vld [vmem:[#allocation4 + $0x400] sm:$0xff]  ;;  %v200_v8 = vld [vmem:[#allocation4 + $0xf8] sm:$0xff] }
  0x4c   :  { %596 = vmatpush.msrb.mxu3 %v275_v9  ;;  %673 = vmatpush.msrb.mxu1 %v349_v11  ;;  %v299_v51 = vld [vmem:[#allocation4 + $0x410] sm:$0xff]  ;;  %v2537_v58 = vld [vmem:[%s4110_s0 + $0x20] sm:$0xff]  ;;  %v2558_v10 = vld [vmem:[%s4110_s0 + $0x68] sm:$0xff] }
  0x4d   :  { %556 = vmatpush.msrb.mxu2 %v241_v12  ;;  %633 = vmatpush.msrb.mxu0 %v315_v14  ;;  %v419_v55 = vld [vmem:[#allocation4 + $0x7d0] sm:$0xff]  ;;  %v385_v59 = vld [vmem:[#allocation4 + $0x6c0] sm:$0xff] }
  0x4e   :  { %597 = vmatpush.msrb.mxu3 %v273_v13  ;;  %500 = vmatmul.f32.gmra.mxu2 %v160_v15  ;;  %v331_v57 = vld [vmem:[#allocation4 + $0x510] sm:$0xff]  ;;  %v417_v60 = vld [vmem:[#allocation4 + $0x7c0] sm:$0xff]  ;;  %v198_v13 = vld [vmem:[#allocation4 + $0xe8] sm:$0xff] }
  0x4f   :  { %541 = vmatmul.f32.gmra.mxu3 %v161_v16  ;;  %557 = vmatpush.msrb.mxu2 %v239_v17  ;;  %v329_v61 = vld [vmem:[#allocation4 + $0x500] sm:$0xff]  ;;  %v383_v63 = vld [vmem:[#allocation4 + $0x6b0] sm:$0xff] }
  0x50   :  { %598 = vmatpush.msrb.mxu3 %v271_v18  ;;  %634 = vmatpush.msrb.mxu0 %v313_v19  ;;  %v455_v0 = vld [vmem:[#allocation4 + $0x8f0] sm:$0xff]  ;;  %v2547_v3 = vld [vmem:[%s4110_s0 + $0xa0] sm:$0xff]  ;;  %v196_v19 = vld [vmem:[#allocation4 + $0xd8] sm:$0xff] }
  0x51   :  { %674 = vmatpush.msrb.mxu1 %v347_v20  ;;  %485 = vmatmul.f32.gmra.mxu0 %v2496_v21  ;;  %v415_v1 = vld [vmem:[#allocation4 + $0x7b0] sm:$0xff]  ;;  %v381_v5 = vld [vmem:[#allocation4 + $0x6a0] sm:$0xff]  ;;  %v2568_v20 = vld [vmem:[%s4110_s0 + $0xe8] sm:$0xff] }
  0x52   :  { %558 = vmatpush.msrb.mxu2 %v237_v22  ;;  %599 = vmatpush.msrb.mxu3 %v269_v23  ;;  %v453_v6 = vld [vmem:[#allocation4 + $0x8e0] sm:$0xff]  ;;  %v451_v9 = vld [vmem:[#allocation4 + $0x8d0] sm:$0xff] }
  0x53   :  { %635 = vmatpush.msrb.mxu0 %v311_v24  ;;  %675 = vmatpush.msrb.mxu1 %v345_v25  ;;  %v413_v7 = vld [vmem:[#allocation4 + $0x7a0] sm:$0xff]  ;;  %v379_v11 = vld [vmem:[#allocation4 + $0x690] sm:$0xff] }
  0x54   :  { %526 = vmatmul.f32.gmra.mxu1 %v116_v26  ;;  %559 = vmatpush.msrb.mxu2 %v235_v27  ;;  %v411_v12 = vld [vmem:[#allocation4 + $0x790] sm:$0xff]  ;;  %v377_v14 = vld [vmem:[#allocation4 + $0x680] sm:$0xff] }
  0x55   :  { %600 = vmatpush.msrb.mxu3 %v267_v28  ;;  %636 = vmatpush.msrb.mxu0 %v309_v29  ;;  %v449_v15 = vld [vmem:[#allocation4 + $0x8c0] sm:$0xff]  ;;  %v111_v16 = vld [vmem:[%s4110_s0 + $0x70] sm:$0xff] }
  0x56   :  { %676 = vmatpush.msrb.mxu1 %v343_v30  ;;  %560 = vmatpush.msrb.mxu2 %v233_v31  ;;  %v409_v17 = vld [vmem:[#allocation4 + $0x780] sm:$0xff]  ;;  %v375_v18 = vld [vmem:[#allocation4 + $0x670] sm:$0xff]  ;;  %v194_v30 = vld [vmem:[#allocation4 + $0xc8] sm:$0xff] }
  0x57   :  { %601 = vmatpush.msrb.mxu3 %v265_v32  ;;  %637 = vmatpush.msrb.mxu0 %v307_v33  ;;  %v407_v22 = vld [vmem:[#allocation4 + $0x770] sm:$0xff]  ;;  %v373_v24 = vld [vmem:[#allocation4 + $0x660] sm:$0xff]  ;;  %v120_v33 = vld [vmem:[%s4110_s0 + $0xb8] sm:$0xff] }
  0x58   :  { %677 = vmatpush.msrb.mxu1 %v341_v34  ;;  %561 = vmatmul.f32.vlgmr.msrb.gmra.mxu2 %v2505_v35  ;;  %v2573_v23 = vld [vmem:[%s4110_s0 + $0xf0] sm:$0xff]  ;;  %v405_v25 = vld [vmem:[#allocation4 + $0x760] sm:$0xff] }
  0x59   :  { %602 = vmatmul.f32.vlgmr.msrb.gmra.mxu3 %v2510_v36  ;;  %709 = vmatpush.msra.mxu2 %v391_v37  ;;  %v447_v26 = vld [vmem:[#allocation4 + $0x8b0] sm:$0xff]  ;;  %v369_v31 = vld [vmem:[#allocation4 + $0x640] sm:$0xff] }
  0x5a   :  { %750 = vmatpush.msra.mxu3 %v423_v39  ;;  %638 = vmatpush.msrb.mxu0 %v305_v40  ;;  %v2579_v27 = vld [vmem:[%s4110_s0 + $0xb0] sm:$0xff]  ;;  %v445_v32 = vld [vmem:[#allocation4 + $0x8a0] sm:$0xff]  ;;  %v192_v39 = vld [vmem:[#allocation4 + $0xb8] sm:$0xff] }
  0x5b   :  { %678 = vmatpush.msrb.mxu1 %v339_v41  ;;  %488 = vmatmul.f32.gmra.mxu0 %v2516_v42  ;;  %v371_v28 = vld [vmem:[#allocation4 + $0x650] sm:$0xff]  ;;  %v401_v34 = vld [vmem:[#allocation4 + $0x740] sm:$0xff] }
  0x5c   :  { %639 = vmatpush.msrb.mxu0 %v303_v43  ;;  %529 = vmatmul.f32.gmra.mxu1 %v125_v44  ;;  %v403_v29 = vld [vmem:[#allocation4 + $0x750] sm:$0xff]  ;;  %v2594_v43 = vld [vmem:[%s4110_s0 + $0x138] sm:$0xff]  ;;  %v365_v44 = vld [vmem:[#allocation4 + $0x620] sm:$0xff] }
  0x5d   :  { %679 = vmatpush.msrb.mxu1 %v337_v45  ;;  %710 = vmatpush.msra.mxu2 %v389_v46  ;;  %v367_v37 = vld [vmem:[#allocation4 + $0x630] sm:$0xff]  ;;  %v397_v45 = vld [vmem:[#allocation4 + $0x720] sm:$0xff] }
  0x5e   :  { %751 = vmatpush.msra.mxu3 %v421_v47  ;;  %640 = vmatpush.msrb.mxu0 %v301_v48  ;;  %v2589_v40 = vld [vmem:[%s4110_s0 + $0x130] sm:$0xff]  ;;  %v2600_v47 = vld [vmem:[%s4110_s0 + $0xf8] sm:$0xff]  ;;  %v190_v48 = vld [vmem:[#allocation4 + $0xa8] sm:$0xff] }
  0x5f   :  { %680 = vmatpush.msrb.mxu1 %v335_v49  ;;  %711 = vmatpush.msra.mxu2 %v387_v50  ;;  %v399_v41 = vld [vmem:[#allocation4 + $0x730] sm:$0xff] }
  0x60   :  { %641 = vmatpush.msrb.mxu0 %v299_v51  ;;  %564 = vmatmul.f32.gmra.mxu2 %v2526_v52  ;;  %v443_v46 = vld [vmem:[#allocation4 + $0x890] sm:$0xff]  ;;  %v441_v51 = vld [vmem:[#allocation4 + $0x880] sm:$0xff] }
  0x61   :  { %681 = vmatpush.msrb.mxu1 %v333_v53  ;;  %605 = vmatmul.f32.gmra.mxu3 %v2531_v54  ;;  %v363_v49 = vld [vmem:[#allocation4 + $0x610] sm:$0xff]  ;;  %v188_v53 = vld [vmem:[#allocation4 + $0x98] sm:$0xff] }
  0x62   :  { %752 = vmatpush.msra.mxu3 %v419_v55  ;;  %642 = vmatpush.msrb.mxu0 %v297_v56  ;;  %v395_v50 = vld [vmem:[#allocation4 + $0x710] sm:$0xff]  ;;  %v129_v55 = vld [vmem:[%s4110_s0 + $0x100] sm:$0xff] }
  0x63   :  { %682 = vmatpush.msrb.mxu1 %v331_v57  ;;  %643 = vmatmul.f32.vlgmr.msrb.gmra.mxu0 %v2537_v58  ;;  %v361_v56 = vld [vmem:[#allocation4 + $0x600] sm:$0xff]  ;;  %v439_v57 = vld [vmem:[#allocation4 + $0x870] sm:$0xff] }
  0x64   :  { %712 = vmatpush.msra.mxu2 %v385_v59  ;;  %753 = vmatpush.msra.mxu3 %v417_v60  ;;  %v186_v59 = vld [vmem:[#allocation4 + $0x88] sm:$0xff]  ;;  %v2610_v60 = vld [vmem:[%s4110_s0 + $0x178] sm:$0xff] }
  0x65   :  { %683 = vmatpush.msrb.mxu1 %v329_v61  ;;  %791 = vmatpush.msra.mxu0 %v455_v0  ;;  %v393_v61 = vld [vmem:[#allocation4 + $0x700] sm:$0xff]  ;;  %v184_v0 = vld [vmem:[#allocation4 + $0x78] sm:$0xff] }
  0x66   :  { %684 = vmatmul.f32.vlgmr.msrb.gmra.mxu1 %v102_v62  ;;  %713 = vmatpush.msra.mxu2 %v383_v63  ;;  %v2615_v62 = vld [vmem:[%s4110_s0 + $0x180] sm:$0xff] }
  0x67   :  { %754 = vmatpush.msra.mxu3 %v415_v1  ;;  %792 = vmatpush.msra.mxu0 %v453_v6  ;;  %v437_v63 = vld [vmem:[#allocation4 + $0x860] sm:$0xff]  ;;  %v232_v1 = vld [vmem:[#allocation4 + $0x1f8] sm:$0xff] }
  0x68   :  { %567 = vmatmul.f32.gmra.mxu2 %v2547_v3  ;;  %832 = vmatpush.msra.mxu1 %v200_v8  ;;  %v264_v6 = vld [vmem:[#allocation4 + $0x2f8] sm:$0xff]  ;;  %v182_v8 = vld [vmem:[#allocation4 + $0x68] sm:$0xff] }
  0x69   :  { %608 = vmatmul.f32.gmra.mxu3 %v2552_v4  ;;  %714 = vmatpush.msra.mxu2 %v381_v5  ;;  %v2621_v5 = vld [vmem:[%s4110_s0 + $0x140] sm:$0xff] }
  0x6a   :  { %755 = vmatpush.msra.mxu3 %v413_v7  ;;  %793 = vmatpush.msra.mxu0 %v451_v9  ;;  %v435_v7 = vld [vmem:[#allocation4 + $0x850] sm:$0xff]  ;;  %v230_v9 = vld [vmem:[#allocation4 + $0x1e8] sm:$0xff] }
  0x6b   :  { %646 = vmatmul.f32.gmra.mxu0 %v2558_v10  ;;  %715 = vmatpush.msra.mxu2 %v379_v11  ;;  %v262_v11 = vld [vmem:[#allocation4 + $0x2e8] sm:$0xff] }
  0x6c   :  { %756 = vmatpush.msra.mxu3 %v411_v12  ;;  %833 = vmatpush.msra.mxu1 %v198_v13  ;;  %v138_v12 = vld [vmem:[%s4110_s0 + $0x148] sm:$0xff]  ;;  %v433_v13 = vld [vmem:[#allocation4 + $0x840] sm:$0xff] }
  0x6d   :  { %716 = vmatpush.msra.mxu2 %v377_v14  ;;  %794 = vmatpush.msra.mxu0 %v449_v15  ;;  %v180_v14 = vld [vmem:[#allocation4 + $0x58] sm:$0xff] }
  0x6e   :  { %687 = vmatmul.f32.gmra.mxu1 %v111_v16  ;;  %757 = vmatpush.msra.mxu3 %v409_v17  ;;  %v228_v15 = vld [vmem:[#allocation4 + $0x1d8] sm:$0xff]  ;;  %v2631_v16 = vld [vmem:[%s4110_s0 + $0x1c0] sm:$0xff]  ;;  %v431_v17 = vld [vmem:[#allocation4 + $0x830] sm:$0xff] }
  0x6f   :  { %717 = vmatpush.msra.mxu2 %v375_v18  ;;  %834 = vmatpush.msra.mxu1 %v196_v19  ;;  %v2636_v18 = vld [vmem:[%s4110_s0 + $0x1c8] sm:$0xff] }
  0x70   :  { %570 = vmatmul.f32.gmra.mxu2 %v2568_v20  ;;  %758 = vmatpush.msra.mxu3 %v407_v22  ;;  %v178_v19 = vld [vmem:[#allocation4 + $0x48] sm:$0xff]  ;;  %v429_v22 = vld [vmem:[#allocation4 + $0x820] sm:$0xff] }
  0x71   :  { %611 = vmatmul.f32.gmra.mxu3 %v2573_v23  ;;  %718 = vmatpush.msra.mxu2 %v373_v24  ;;  %v260_v24 = vld [vmem:[#allocation4 + $0x2d8] sm:$0xff] }
  0x72   :  { %759 = vmatpush.msra.mxu3 %v405_v25  ;;  %795 = vmatpush.msra.mxu0 %v447_v26  ;;  %v2642_v25 = vld [vmem:[%s4110_s0 + $0x188] sm:$0xff]  ;;  %v176_v26 = vld [vmem:[#allocation4 + $0x38] sm:$0xff] }
  0x73   :  { %649 = vmatmul.f32.gmra.mxu0 %v2579_v27  ;;  %719 = vmatpush.msra.mxu2 %v371_v28  ;;  %v427_v28 = vld [vmem:[#allocation4 + $0x810] sm:$0xff] }
  0x74   :  { %760 = vmatpush.msra.mxu3 %v403_v29  ;;  %835 = vmatpush.msra.mxu1 %v194_v30  ;;  %v226_v29 = vld [vmem:[#allocation4 + $0x1c8] sm:$0xff] }
  0x75   :  { %720 = vmatpush.msra.mxu2 %v369_v31  ;;  %796 = vmatpush.msra.mxu0 %v445_v32  ;;  %v174_v30 = vld [vmem:[#allocation4 + $0x28] sm:$0xff]  ;;  %v147_v32 = vld [vmem:[%s4110_s0 + $0x190] sm:$0xff] }
  0x76   :  { %690 = vmatmul.f32.gmra.mxu1 %v120_v33  ;;  %761 = vmatpush.msra.mxu3 %v401_v34  ;;  %v258_v31 = vld [vmem:[#allocation4 + $0x2c8] sm:$0xff]  ;;  %v425_v33 = vld [vmem:[#allocation4 + $0x800] sm:$0xff]  ;;  %v172_v34 = vld [vmem:[#allocation4 + $0x18] sm:$0xff] }
  0x77   :  { %721 = vmatpush.msra.mxu2 %v367_v37  ;;  %836 = vmatpush.msra.mxu1 %v192_v39  ;;  %v224_v37 = vld [vmem:[#allocation4 + $0x1b8] sm:$0xff]  ;;  %v2652_v39 = vld [vmem:[%s4110_s0 + $0x208] sm:$0xff] }
  0x78   :  { %573 = vmatmul.f32.gmra.mxu2 %v2589_v40  ;;  %762 = vmatpush.msra.mxu3 %v399_v41  ;;  %v256_v41 = vld [vmem:[#allocation4 + $0x2b8] sm:$0xff] }
  0x79   :  { %614 = vmatmul.f32.gmra.mxu3 %v2594_v43  ;;  %722 = vmatpush.msra.mxu2 %v365_v44  ;;  %v2657_v44 = vld [vmem:[%s4110_s0 + $0x210] sm:$0xff] }
  0x7a   :  { %763 = vmatpush.msra.mxu3 %v397_v45  ;;  %797 = vmatpush.msra.mxu0 %v443_v46  ;;  %v170_v45 = vld [vmem:[#allocation4 + $0x8] sm:$0xff] }
  0x7b   :  { %652 = vmatmul.f32.gmra.mxu0 %v2600_v47  ;;  %837 = vmatpush.msra.mxu1 %v190_v48  ;;  %v222_v46 = vld [vmem:[#allocation4 + $0x1a8] sm:$0xff] }
  0x7c   :  { %723 = vmatpush.msra.mxu2 %v363_v49  ;;  %764 = vmatpush.msra.mxu3 %v395_v50  ;;  %v254_v48 = vld [vmem:[#allocation4 + $0x2a8] sm:$0xff]  ;;  %v2663_v49 = vld [vmem:[%s4110_s0 + $0x1d0] sm:$0xff]  ;;  %v220_v50 = vld [vmem:[#allocation4 + $0x198] sm:$0xff] }
  0x7d   :  { %798 = vmatpush.msra.mxu0 %v441_v51  ;;  %838 = vmatpush.msra.mxu1 %v188_v53  ;;  %v252_v51 = vld [vmem:[#allocation4 + $0x298] sm:$0xff] }
  0x7e   :  { %693 = vmatmul.f32.gmra.mxu1 %v129_v55  ;;  %724 = vmatpush.msra.mxu2 %v361_v56  ;;  %v156_v53 = vld [vmem:[%s4110_s0 + $0x1d8] sm:$0xff]  ;;  %v2673_v55 = vld [vmem:[%s4110_s0 + $0x30] sm:$0xff] }
  0x7f   :  { %799 = vmatpush.msra.mxu0 %v439_v57  ;;  %839 = vmatpush.msra.mxu1 %v186_v59  ;;  %v2678_v56 = vld [vmem:[%s4110_s0 + $0x38] sm:$0xff]  ;;  %v218_v57 = vld [vmem:[#allocation4 + $0x188] sm:$0xff] }
  0x80   :  { %576 = vmatmul.f32.gmra.mxu2 %v2610_v60  ;;  %765 = vmatpush.msra.mxu3 %v393_v61  ;;  %v250_v59 = vld [vmem:[#allocation4 + $0x288] sm:$0xff]  ;;  %v2684_v61 = vld [vmem:[%s4110_s0 + $0x218] sm:$0xff] }
  0x81   :  { %617 = vmatmul.f32.gmra.mxu3 %v2615_v62  ;;  %800 = vmatpush.msra.mxu0 %v437_v63  ;;  %v216_v63 = vld [vmem:[#allocation4 + $0x178] sm:$0xff] }
  0x82   :  { %840 = vmatpush.msra.mxu1 %v184_v0  ;;  %873 = vmatpush.msrb.mxu2 %v232_v1  ;;  %v248_v0 = vld [vmem:[#allocation4 + $0x278] sm:$0xff]  ;;  %v165_v1 = vld [vmem:[%s4110_s0 + $0x220] sm:$0xff] }
  0x83   :  { %655 = vmatmul.f32.gmra.mxu0 %v2621_v5  ;;  %914 = vmatpush.msrb.mxu3 %v264_v6  ;;  %v2694_v6 = vld [vmem:[%s4110_s0 + $0x78] sm:$0xff] }
  0x84   :  { %801 = vmatpush.msra.mxu0 %v435_v7  ;;  %841 = vmatpush.msra.mxu1 %v182_v8  ;;  %v2699_v7 = vld [vmem:[%s4110_s0 + $0x80] sm:$0xff]  ;;  %v214_v8 = vld [vmem:[#allocation4 + $0x168] sm:$0xff] }
  0x85   :  { %874 = vmatpush.msrb.mxu2 %v230_v9  ;;  %915 = vmatpush.msrb.mxu3 %v262_v11  ;;  %v246_v9 = vld [vmem:[#allocation4 + $0x268] sm:$0xff]  ;;  %v2705_v11 = vld [vmem:[%s4110_s0 + $0x40] sm:$0xff] }
  0x86   :  { %696 = vmatmul.f32.gmra.mxu1 %v138_v12  ;;  %802 = vmatpush.msra.mxu0 %v433_v13  ;;  %v212_v12 = vld [vmem:[#allocation4 + $0x158] sm:$0xff] }
  0x87   :  { %842 = vmatpush.msra.mxu1 %v180_v14  ;;  %875 = vmatpush.msrb.mxu2 %v228_v15  ;;  %v244_v13 = vld [vmem:[#allocation4 + $0x258] sm:$0xff]  ;;  %v2712_v15 = vld [vmem:[%s4110_s0 + $0xc0] sm:$0xff] }
  0x88   :  { %579 = vmatmul.f32.gmra.mxu2 %v2631_v16  ;;  %803 = vmatpush.msra.mxu0 %v431_v17  ;;  %v296_v14 = vld [vmem:[#allocation4 + $0x3f8] sm:$0xff]  ;;  %v122_v17 = vld [vmem:[%s4110_s0 + $0xc8] sm:$0xff] }
  0x89   :  { %620 = vmatmul.f32.gmra.mxu3 %v2636_v18  ;;  %843 = vmatpush.msra.mxu1 %v178_v19  ;;  %v210_v19 = vld [vmem:[#allocation4 + $0x148] sm:$0xff] }
  0x8a   :  { %804 = vmatpush.msra.mxu0 %v429_v22  ;;  %916 = vmatpush.msrb.mxu3 %v260_v24  ;;  %v242_v22 = vld [vmem:[#allocation4 + $0x248] sm:$0xff] }
  0x8b   :  { %658 = vmatmul.f32.gmra.mxu0 %v2642_v25  ;;  %844 = vmatpush.msra.mxu1 %v176_v26  ;;  %v294_v24 = vld [vmem:[#allocation4 + $0x3e8] sm:$0xff]  ;;  %v328_v26 = vld [vmem:[#allocation4 + $0x4f8] sm:$0xff] }
  0x8c   :  { %805 = vmatpush.msra.mxu0 %v427_v28  ;;  %876 = vmatpush.msrb.mxu2 %v226_v29  ;;  %v292_v28 = vld [vmem:[#allocation4 + $0x3d8] sm:$0xff]  ;;  %v2722_v29 = vld [vmem:[%s4110_s0 + $0x88] sm:$0xff] }
  0x8d   :  { %845 = vmatpush.msra.mxu1 %v174_v30  ;;  %917 = vmatpush.msrb.mxu3 %v258_v31  ;;  %v326_v30 = vld [vmem:[#allocation4 + $0x4e8] sm:$0xff]  ;;  %v208_v31 = vld [vmem:[#allocation4 + $0x138] sm:$0xff] }
  0x8e   :  { %699 = vmatmul.f32.gmra.mxu1 %v147_v32  ;;  %806 = vmatpush.msra.mxu0 %v425_v33  ;;  %v290_v32 = vld [vmem:[#allocation4 + $0x3c8] sm:$0xff]  ;;  %v324_v33 = vld [vmem:[#allocation4 + $0x4d8] sm:$0xff] }
  0x8f   :  { %846 = vmatpush.msra.mxu1 %v172_v34  ;;  %877 = vmatpush.msrb.mxu2 %v224_v37  ;;  %v288_v34 = vld [vmem:[#allocation4 + $0x3b8] sm:$0xff]  ;;  %v322_v37 = vld [vmem:[#allocation4 + $0x4c8] sm:$0xff] }
  0x90   :  { %582 = vmatmul.f32.gmra.mxu2 %v2652_v39  ;;  %918 = vmatpush.msrb.mxu3 %v256_v41  ;;  %v2728_v41 = vld [vmem:[%s4110_s0 + $0x108] sm:$0xff] }
  0x91   :  { %623 = vmatmul.f32.gmra.mxu3 %v2657_v44  ;;  %847 = vmatpush.msra.mxu1 %v170_v45  ;;  %v131_v45 = vld [vmem:[%s4110_s0 + $0x110] sm:$0xff] }
  0x92   :  { %878 = vmatpush.msrb.mxu2 %v222_v46  ;;  %919 = vmatpush.msrb.mxu3 %v254_v48  ;;  %v206_v46 = vld [vmem:[#allocation4 + $0x128] sm:$0xff] }
  0x93   :  { %661 = vmatmul.f32.gmra.mxu0 %v2663_v49  ;;  %996 = vmatpush.msrb.mxu1 %v328_v26  ;;  %v238_v48 = vld [vmem:[#allocation4 + $0x228] sm:$0xff]  ;;  %v2756_v26 = vld [vmem:[%s4110_s0 + $0x118] sm:$0xff] }
  0x94   :  { %879 = vmatpush.msrb.mxu2 %v220_v50  ;;  %920 = vmatpush.msrb.mxu3 %v252_v51  ;;  %v286_v50 = vld [vmem:[#allocation4 + $0x3a8] sm:$0xff]  ;;  %v320_v51 = vld [vmem:[#allocation4 + $0x4b8] sm:$0xff] }
  0x95   :  { %955 = vmatpush.msrb.mxu0 %v296_v14  ;;  %997 = vmatpush.msrb.mxu1 %v326_v30 }
  0x96   :  { %702 = vmatmul.f32.gmra.mxu1 %v156_v53  ;;  %880 = vmatpush.msrb.mxu2 %v218_v57  ;;  %v2738_v53 = vld [vmem:[%s4110_s0 + $0xd0] sm:$0xff]  ;;  %v284_v57 = vld [vmem:[#allocation4 + $0x398] sm:$0xff] }
  0x97   :  { %921 = vmatpush.msrb.mxu3 %v250_v59  ;;  %956 = vmatpush.msrb.mxu0 %v294_v24  ;;  %v318_v59 = vld [vmem:[#allocation4 + $0x4a8] sm:$0xff] }
  0x98   :  { %725 = vmatmul.f32.vlgmr.msra.gmra.mxu2 %v2673_v55  ;;  %998 = vmatpush.msrb.mxu1 %v324_v33  ;;  %v278_v24 = vld [vmem:[#allocation4 + $0x368] sm:$0xff] }
  0x99   :  { %766 = vmatmul.f32.vlgmr.msra.gmra.mxu3 %v2678_v56  ;;  %881 = vmatpush.msrb.mxu2 %v216_v63  ;;  %v236_v63 = vld [vmem:[#allocation4 + $0x218] sm:$0xff]  ;;  %v310_v33 = vld [vmem:[#allocation4 + $0x468] sm:$0xff] }
  0x9a   :  { %922 = vmatpush.msrb.mxu3 %v248_v0  ;;  %957 = vmatpush.msrb.mxu0 %v292_v28  ;;  %v457_v0 = vld [vmem:[#allocation8] sm:$0x3] }
  0x9b   :  { %664 = vmatmul.f32.gmra.mxu0 %v2684_v61  ;;  %882 = vmatpush.msrb.mxu2 %v214_v8  ;;  %v316_v8 = vld [vmem:[#allocation4 + $0x498] sm:$0xff]  ;;  %v2750_v14 = vperm.slane %v457_v0, 0  ;;  %v390_v0 = vld [vmem:[#allocation4 + $0x6e8] sm:$0xff] }
  0x9c   :  { %923 = vmatpush.msrb.mxu3 %v246_v9  ;;  %958 = vmatpush.msrb.mxu0 %v290_v32  ;;  %v2744_v9 = vld [vmem:[%s4110_s0 + $0x150] sm:$0xff] }
  0x9d   :  { %883 = vmatpush.msrb.mxu2 %v212_v12  ;;  %999 = vmatpush.msrb.mxu1 %v322_v37  ;;  %v280_v12 = vld [vmem:[#allocation4 + $0x378] sm:$0xff] }
  0x9e   :  { %705 = vmatmul.f32.gmra.mxu1 %v165_v1  ;;  %924 = vmatpush.msrb.mxu3 %v244_v13  ;;  %v282_v1 = vld [vmem:[#allocation4 + $0x388] sm:$0xff]  ;;  %v140_v13 = vld [vmem:[%s4110_s0 + $0x158] sm:$0xff] }
  0x9f   :  { %884 = vmatpush.msrb.mxu2 %v210_v19  ;;  %959 = vmatpush.msrb.mxu0 %v288_v34  ;;  %v202_v19 = vld [vmem:[#allocation4 + $0x108] sm:$0xff]  ;;  %v392_v34 = vld [vmem:[#allocation4 + $0x6f8] sm:$0xff] }
  0xa0   :  { %728 = vmatmul.f32.gmra.mxu2 %v2694_v6  ;;  %925 = vmatpush.msrb.mxu3 %v242_v22  ;;  %v234_v22 = vld [vmem:[#allocation4 + $0x208] sm:$0xff] }
  0xa1   :  { %769 = vmatmul.f32.gmra.mxu3 %v2699_v7  ;;  %885 = vmatpush.msrb.mxu2 %v208_v31  ;;  %v276_v31 = vld [vmem:[#allocation4 + $0x358] sm:$0xff] }
  0xa2   :  { %960 = vmatpush.msrb.mxu0 %v286_v50  ;;  %1000 = vmatpush.msrb.mxu1 %v320_v51  ;;  %v2767_v50 = vld [vmem:[%s4110_s0 + $0x198] sm:$0xff] }
  0xa3   :  { %807 = vmatmul.f32.vlgmr.msra.gmra.mxu0 %v2705_v11  ;;  %886 = vmatpush.msrb.mxu2 %v206_v46 }
  0xa4   :  { %961 = vmatpush.msrb.mxu0 %v284_v57  ;;  %1001 = vmatpush.msrb.mxu1 %v318_v59  ;;  %v272_v57 = vld [vmem:[#allocation4 + $0x338] sm:$0xff]  ;;  %v2775_v59 = vld [vmem:[%s4110_s0 + $0x1a0] sm:$0xff] }
  0xa6   :  { %848 = vmatmul.f32.vlgmr.msra.gmra.mxu1 %v2460_v38  ;;  %v240_v38 = vld [vmem:[#allocation4 + $0x238] sm:$0xff]  ;;  %962 = vmatpush.msrb.mxu0 %v282_v1  ;;  %v270_v1 = vld [vmem:[#allocation4 + $0x328] sm:$0xff] }
  0xa7   :  { %926 = vmatpush.msrb.mxu3 %v240_v38  ;;  %1002 = vmatpush.msrb.mxu1 %v316_v8  ;;  %v360_v38 = vld [vmem:[#allocation4 + $0x5f8] sm:$0xff]  ;;  %v2781_v8 = vld [vmem:[%s4110_s0 + $0x160] sm:$0xff] }
  0xa8   :  { %731 = vmatmul.f32.gmra.mxu2 %v2712_v15  ;;  %963 = vmatpush.msrb.mxu0 %v280_v12 }
  0xa9   :  { %772 = vmatmul.f32.gmra.mxu3 %v122_v17  ;;  %v314_v17 = vld [vmem:[#allocation4 + $0x488] sm:$0xff] }
  0xaa   :  { %927 = vmatpush.msrb.mxu3 %v238_v48  ;;  %1003 = vmatpush.msrb.mxu1 %v314_v17  ;;  %v308_v48 = vld [vmem:[#allocation4 + $0x458] sm:$0xff] }
  0xab   :  { %810 = vmatmul.f32.gmra.mxu0 %v2722_v29  ;;  %v268_v17 = vld [vmem:[#allocation4 + $0x318] sm:$0xff] }
  0xac   :  { %928 = vmatpush.msrb.mxu3 %v236_v63  ;;  %964 = vmatpush.msrb.mxu0 %v278_v24  ;;  %v358_v63 = vld [vmem:[#allocation4 + $0x5e8] sm:$0xff] }
  0xad   :  { %v302_v24 = vld [vmem:[#allocation4 + $0x428] sm:$0xff] }
  0xae   :  { %851 = vmatmul.f32.gmra.mxu1 %v2481_v2  ;;  %v204_v2 = vld [vmem:[#allocation4 + $0x118] sm:$0xff]  ;;  %929 = vmatpush.msrb.mxu3 %v234_v22 }
  0xaf   :  { %887 = vmatpush.msrb.mxu2 %v204_v2  ;;  %965 = vmatpush.msrb.mxu0 %v276_v31  ;;  %v306_v2 = vld [vmem:[#allocation4 + $0x448] sm:$0xff]  ;;  %v300_v31 = vld [vmem:[#allocation4 + $0x418] sm:$0xff] }
  0xb0   :  { %734 = vmatmul.f32.gmra.mxu2 %v2728_v41  ;;  %1078 = vmatpush.msra.mxu3 %v392_v34  ;;  %v2177_v34 = vld [vmem:[%s4110_s0 + $0x120] sm:$0xff] }
  0xb1   :  { %775 = vmatmul.f32.gmra.mxu3 %v131_v45  ;;  %888 = vmatpush.msrb.mxu2 %v202_v19  ;;  %v274_v45 = vld [vmem:[#allocation4 + $0x348] sm:$0xff]  ;;  %v356_v19 = vld [vmem:[#allocation4 + $0x5d8] sm:$0xff] }
  0xb2   :  { %966 = vmatpush.msrb.mxu0 %v274_v45  ;;  %1079 = vmatpush.msra.mxu3 %v390_v0  ;;  %v298_v45 = vld [vmem:[#allocation4 + $0x408] sm:$0xff] }
  0xb3   :  { %813 = vmatmul.f32.gmra.mxu0 %v2738_v53  ;;  %1037 = vmatpush.msra.mxu2 %v360_v38 }
  0xb4   :  { %967 = vmatpush.msrb.mxu0 %v272_v57  ;;  %v386_v57 = vld [vmem:[#allocation4 + $0x6c8] sm:$0xff] }
  0xb5   :  { %1038 = vmatpush.msra.mxu2 %v358_v63  ;;  %v2809_v63 = vld [vmem:[%s4110_s0 + $0x1a8] sm:$0xff] }
  0xb6   :  { %854 = vmatmul.f32.gmra.mxu1 %v2496_v21  ;;  %v312_v21 = vld [vmem:[#allocation4 + $0x478] sm:$0xff]  ;;  %v2760_v37 = vpop.f32.mrf.mxu0  ;;  %968 = vmatpush.msrb.mxu0 %v270_v1 }
  0xb7   :  { %1004 = vmatpush.msrb.mxu1 %v312_v21  ;;  %v2769_v51 = vpop.f32.mrf.mxu1  ;;  %v388_v21 = vld [vmem:[#allocation4 + $0x6d8] sm:$0xff]  ;;  %1039 = vmatpush.msra.mxu2 %v356_v19  ;;  %v2819_v19 = vld [vmem:[%s4110_s0 + $0x228] sm:$0xff] }
  0xb8   :  { %737 = vmatmul.f32.gmra.mxu2 %v2744_v9  ;;  %969 = vmatpush.msrb.mxu0 %v268_v17 }
  0xb9   :  { %778 = vmatmul.f32.gmra.mxu3 %v140_v13  ;;  %v492_v28 = vpop.f32.mrf.mxu2  ;;  %1005 = vmatpush.msrb.mxu1 %v310_v33  ;;  %v2798_v33 = vld [vmem:[%s4110_s0 + $0x1e8] sm:$0xff] }
  0xba   :  { %v533_v30 = vpop.f32.mrf.mxu3  ;;  %v493_v32 = vadd.f32 %v492_v28, %v2750_v14  ;;  %v266_v28 = vld [vmem:[#allocation4 + $0x308] sm:$0xff]  ;;  %1080 = vmatpush.msra.mxu3 %v388_v21  ;;  %v2827_v21 = vld [vmem:[%s4110_s0 + $0x230] sm:$0xff] }
  0xbb   :  { %816 = vmatmul.f32.gmra.mxu0 %v2756_v26  ;;  %1006 = vmatpush.msrb.mxu1 %v308_v48  ;;  %v354_v48 = vld [vmem:[#allocation4 + $0x5c8] sm:$0xff]  ;;  %4220 = vst [vmem:[#allocation15_spill] sm:$0xff] %v2827_v21 }
  0xbc   :  { %v2762_v46 = vadd.f32 %v533_v30, %v493_v32  ;;  %v2793_v32 = vld [vmem:[%s4110_s0 + $0x1e0] sm:$0xff]  ;;  %970 = vmatpush.msrb.mxu0 %v266_v28  ;;  %1040 = vmatpush.msra.mxu2 %v354_v48  ;;  %v350_v28 = vld [vmem:[#allocation4 + $0x5a8] sm:$0xff] }
  0xbd   :  { %1007 = vmatpush.msrb.mxu1 %v306_v2  ;;  %1081 = vmatpush.msra.mxu3 %v386_v57  ;;  %v348_v57 = vld [vmem:[#allocation4 + $0x598] sm:$0xff] }
  0xbe   :  { %857 = vmatmul.f32.gmra.mxu1 %v2516_v42  ;;  %v304_v42 = vld [vmem:[#allocation4 + $0x438] sm:$0xff] }
  0xbf   :  { %1008 = vmatpush.msrb.mxu1 %v304_v42  ;;  %v352_v42 = vld [vmem:[#allocation4 + $0x5b8] sm:$0xff] }
  0xc0   :  { %740 = vmatmul.f32.gmra.mxu2 %v2767_v50 }
  0xc1   :  { %781 = vmatmul.f32.gmra.mxu3 %v2775_v59  ;;  %v495_v12 = vpop.f32.mrf.mxu2  ;;  %1009 = vmatpush.msrb.mxu1 %v302_v24 }
  0xc2   :  { %v536_v13 = vpop.f32.mrf.mxu3  ;;  %v496_v22 = vadd.f32 %v495_v12, %v2750_v14  ;;  %v2788_v38 = vpop.f32.mrf.mxu0  ;;  %v384_v12 = vld [vmem:[#allocation4 + $0x6b8] sm:$0xff]  ;;  %1041 = vmatpush.msra.mxu2 %v352_v42 }
  0xc3   :  { %819 = vmatmul.f32.gmra.mxu0 %v2781_v8  ;;  %1010 = vmatpush.msrb.mxu1 %v300_v31  ;;  %v382_v31 = vld [vmem:[#allocation4 + $0x6a8] sm:$0xff] }
  0xc4   :  { %v2786_v30 = vadd.f32 %v536_v13, %v496_v22  ;;  %1082 = vmatpush.msra.mxu3 %v384_v12  ;;  %v2178_v22 = vld [vmem:[%s4110_s0 + $0x168] sm:$0xff]  ;;  %1042 = vmatpush.msra.mxu2 %v350_v28  ;;  %v481_v12 = vadd.f32 %v2760_v37, %v2750_v14  ;;  %v2856_v37 = vld [vmem:[%s4110_s0 + $0x238] sm:$0xff] }
  0xc5   :  { %v2803_v2 = vpop.f32.mrf.mxu1  ;;  %1011 = vmatpush.msrb.mxu1 %v298_v45  ;;  %v346_v28 = vld [vmem:[#allocation4 + $0x588] sm:$0xff]  ;;  %4222 = vst [vmem:[#allocation17_spill] sm:$0xff] %v2856_v37 }
  0xc6   :  { %860 = vmatmul.f32.gmra.mxu1 %v2177_v34  ;;  %1083 = vmatpush.msra.mxu3 %v382_v31  ;;  %v2833_v34 = vld [vmem:[%s4110_s0 + $0x1f0] sm:$0xff]  ;;  %v378_v31 = vld [vmem:[#allocation4 + $0x688] sm:$0xff] }
  0xc7   :  { %4221 = vst [vmem:[#allocation16_spill] sm:$0xff] %v2833_v34  ;;  %1043 = vmatpush.msra.mxu2 %v348_v57 }
  0xc8   :  { %743 = vmatmul.f32.gmra.mxu2 %v2793_v32 }
  0xc9   :  { %784 = vmatmul.f32.gmra.mxu3 %v2798_v33  ;;  %v498_v0 = vpop.f32.mrf.mxu2  ;;  %1044 = vmatpush.msra.mxu2 %v346_v28 }
  0xca   :  { %v539_v1 = vpop.f32.mrf.mxu3  ;;  %v499_v13 = vadd.f32 %v498_v0, %v2750_v14  ;;  %v380_v0 = vld [vmem:[#allocation4 + $0x698] sm:$0xff] }
  0xcb   :  { %822 = vmatmul.f32.gmra.mxu0 %v2809_v63  ;;  %1084 = vmatpush.msra.mxu3 %v380_v0  ;;  %v2180_v0 = vld [vmem:[%s4110_s0 + $0x8] sm:$0xff] }
  0xcc   :  { %v2814_v17 = vadd.f32 %v539_v1, %v499_v13 }
  0xcd   :  { %1085 = vmatpush.msra.mxu3 %v378_v31 }
  0xce   :  { %863 = vmatmul.f32.gmra.mxu1 %v2178_v22  ;;  %v486_v24 = vpop.f32.mrf.mxu0  ;;  %v2179_v22 = vld [vmem:[%s4110_s0 + $0x1b0] sm:$0xff] }
  0xd0   :  { %746 = vmatmul.f32.gmra.mxu2 %v2819_v19 }
  0xd1   :  { %787 = vmatmul.f32.gmra.mxu3 %v2827_v21  ;;  %v2836_v45 = vpop.f32.mrf.mxu1  ;;  %v501_v48 = vpop.f32.mrf.mxu2  ;;  %v342_v21 = vld [vmem:[#allocation4 + $0x568] sm:$0xff] }
  0xd2   :  { %v502_v1 = vadd.f32 %v501_v48, %v2750_v14  ;;  %v542_v42 = vpop.f32.mrf.mxu3  ;;  %v522_v48 = vadd.f32 %v2769_v51, %v481_v12  ;;  %v484_v12 = vadd.f32 %v2788_v38, %v2750_v14  ;;  %v2182_v38 = vld [vmem:[%s4110_s0 + $0x50] sm:$0xff] }
  0xd3   :  { %825 = vmatmul.f32.gmra.mxu0 %v2833_v34  ;;  %v374_v34 = vld [vmem:[#allocation4 + $0x668] sm:$0xff] }
  0xd4   :  { %v2842_v13 = vadd.f32 %v542_v42, %v502_v1  ;;  %v344_v42 = vld [vmem:[#allocation4 + $0x578] sm:$0xff] }
  0xd5   :  { %1045 = vmatpush.msra.mxu2 %v344_v42  ;;  %v525_v42 = vadd.f32 %v2803_v2, %v484_v12  ;;  %v487_v2 = vadd.f32 %v486_v24, %v2750_v14  ;;  %v2183_v24 = vld [vmem:[%s4110_s0 + $0x98] sm:$0xff] }
  0xd6   :  { %866 = vmatmul.f32.gmra.mxu1 %v2179_v22  ;;  %v376_v22 = vld [vmem:[#allocation4 + $0x678] sm:$0xff] }
  0xd7   :  { %1086 = vmatpush.msra.mxu3 %v376_v22  ;;  %1046 = vmatpush.msra.mxu2 %v342_v21 }
  0xd8   :  { %v2848_v57 = vpop.f32.mrf.mxu0  ;;  %889 = vmatmul.f32.vlgmr.msrb.gmra.mxu2 %v2180_v0 }
  0xd9   :  { %930 = vmatmul.f32.vlgmr.msrb.gmra.mxu3 %v2505_v35  ;;  %v2859_v1 = vpop.f32.mrf.mxu1  ;;  %v2181_v35 = vld [vmem:[%s4110_s0 + $0x1f8] sm:$0xff] }
  0xda   :  { %1087 = vmatpush.msra.mxu3 %v374_v34 }
  0xdb   :  { %828 = vmatmul.f32.gmra.mxu0 %v2856_v37  ;;  %v562_v51 = vpop.f32.mrf.mxu2  ;;  %v422_v37 = vld [vmem:[#allocation4 + $0x7e8] sm:$0xff] }
  0xdc   :  { %v563_v28 = vadd.f32 %v562_v51, %v522_v48  ;;  %v603_v31 = vpop.f32.mrf.mxu3  ;;  %v340_v48 = vld [vmem:[#allocation4 + $0x558] sm:$0xff] }
  0xdd   :  { %v372_v51 = vld [vmem:[#allocation4 + $0x658] sm:$0xff]  ;;  %1047 = vmatpush.msra.mxu2 %v340_v48 }
  0xde   :  { %v2864_v0 = vadd.f32 %v603_v31, %v563_v28  ;;  %869 = vmatmul.f32.gmra.mxu1 %v2181_v35  ;;  %1088 = vmatpush.msra.mxu3 %v372_v51  ;;  %v424_v31 = vld [vmem:[#allocation4 + $0x7f8] sm:$0xff]  ;;  %v528_v51 = vadd.f32 %v2836_v45, %v487_v2 }
  0xdf   :  { %1119 = vmatpush.msra.mxu0 %v424_v31  ;;  %v456_v48 = vld [vmem:[#allocation4 + $0x8f8] sm:$0xff] }
  0xe0   :  { %v2870_v22 = vpop.f32.mrf.mxu0  ;;  %892 = vmatmul.f32.gmra.mxu2 %v2182_v38  ;;  %v370_v38 = vld [vmem:[#allocation4 + $0x648] sm:$0xff]  ;;  %1160 = vmatpush.msra.mxu1 %v456_v48  ;;  %v452_v31 = vld [vmem:[#allocation4 + $0x8d8] sm:$0xff] }
  0xe1   :  { %933 = vmatmul.f32.gmra.mxu3 %v2526_v52  ;;  %v338_v52 = vld [vmem:[#allocation4 + $0x548] sm:$0xff]  ;;  %1120 = vmatpush.msra.mxu0 %v422_v37  ;;  %v490_v37 = vadd.f32 %v2848_v57, %v2750_v14 }
  0xe2   :  { %1048 = vmatpush.msra.mxu2 %v338_v52  ;;  %1089 = vmatpush.msra.mxu3 %v370_v38  ;;  %v450_v48 = vld [vmem:[#allocation4 + $0x8c8] sm:$0xff] }
  0xe3   :  { %v2876_v28 = vpop.f32.mrf.mxu1  ;;  %971 = vmatmul.f32.vlgmr.msrb.gmra.mxu0 %v2510_v36  ;;  %v565_v21 = vpop.f32.mrf.mxu2  ;;  %v531_v14 = vadd.f32 %v2859_v1, %v490_v37  ;;  %v410_v37 = vld [vmem:[#allocation4 + $0x788] sm:$0xff] }
  0xe4   :  { %v566_v34 = vadd.f32 %v565_v21, %v525_v42  ;;  %v606_v12 = vpop.f32.mrf.mxu3  ;;  %v420_v42 = vld [vmem:[#allocation4 + $0x7d8] sm:$0xff]  ;;  %v454_v21 = vld [vmem:[#allocation4 + $0x8e8] sm:$0xff] }
  0xe5   :  { %1121 = vmatpush.msra.mxu0 %v420_v42  ;;  %1161 = vmatpush.msra.mxu1 %v454_v21  ;;  %v334_v42 = vld [vmem:[#allocation4 + $0x528] sm:$0xff]  ;;  %v448_v21 = vld [vmem:[#allocation4 + $0x8b8] sm:$0xff] }
  0xe6   :  { %v2880_v35 = vadd.f32 %v606_v12, %v566_v34  ;;  %1012 = vmatmul.f32.vlgmr.msrb.gmra.mxu1 %v2537_v58  ;;  %v336_v58 = vld [vmem:[#allocation4 + $0x538] sm:$0xff]  ;;  %v418_v12 = vld [vmem:[#allocation4 + $0x7c8] sm:$0xff] }
  0xe7   :  { %v368_v34 = vld [vmem:[#allocation4 + $0x638] sm:$0xff]  ;;  %1049 = vmatpush.msra.mxu2 %v336_v58  ;;  %1122 = vmatpush.msra.mxu0 %v418_v12  ;;  %v366_v58 = vld [vmem:[#allocation4 + $0x628] sm:$0xff] }
  0xe8   :  { %v2884_v36 = vpop.f32.mrf.mxu0  ;;  %895 = vmatmul.f32.gmra.mxu2 %v2183_v24  ;;  %1090 = vmatpush.msra.mxu3 %v368_v34  ;;  %v412_v34 = vld [vmem:[#allocation4 + $0x798] sm:$0xff] }
  0xe9   :  { %936 = vmatmul.f32.gmra.mxu3 %v2547_v3  ;;  %v416_v3 = vld [vmem:[#allocation4 + $0x7b8] sm:$0xff]  ;;  %1162 = vmatpush.msra.mxu1 %v452_v31 }
  0xea   :  { %1123 = vmatpush.msra.mxu0 %v416_v3  ;;  %1050 = vmatpush.msra.mxu2 %v334_v42  ;;  %v332_v12 = vld [vmem:[#allocation4 + $0x518] sm:$0xff]  ;;  %v442_v42 = vld [vmem:[#allocation4 + $0x888] sm:$0xff] }
  0xeb   :  { %v2890_v45 = vpop.f32.mrf.mxu1  ;;  %974 = vmatmul.f32.gmra.mxu0 %v2531_v54  ;;  %v568_v2 = vpop.f32.mrf.mxu2  ;;  %v414_v54 = vld [vmem:[#allocation4 + $0x7a8] sm:$0xff]  ;;  %1163 = vmatpush.msra.mxu1 %v450_v48  ;;  %v364_v31 = vld [vmem:[#allocation4 + $0x618] sm:$0xff] }
  0xec   :  { %v569_v52 = vadd.f32 %v568_v2, %v528_v51  ;;  %v609_v38 = vpop.f32.mrf.mxu3  ;;  %v2184_v51 = vld [vmem:[%s4110_s0 + $0xe0] sm:$0xff]  ;;  %1091 = vmatpush.msra.mxu3 %v366_v58  ;;  %1124 = vmatpush.msra.mxu0 %v414_v54  ;;  %v444_v3 = vld [vmem:[#allocation4 + $0x898] sm:$0xff]  ;;  %v330_v58 = vld [vmem:[#allocation4 + $0x508] sm:$0xff] }
  0xed   :  { %1164 = vmatpush.msra.mxu1 %v448_v21  ;;  %1051 = vmatpush.msra.mxu2 %v332_v12  ;;  %v408_v48 = vld [vmem:[#allocation4 + $0x778] sm:$0xff]  ;;  %v362_v54 = vld [vmem:[#allocation4 + $0x608] sm:$0xff]  ;;  %v2919_v12 = vld [vmem:[#allocation6 + $0x1f0] sm:$0xff] }
  0xee   :  { %v2895_v24 = vadd.f32 %v609_v38, %v569_v52  ;;  %1015 = vmatmul.f32.gmra.mxu1 %v2558_v10  ;;  %v446_v10 = vld [vmem:[#allocation4 + $0x8a8] sm:$0xff]  ;;  %1092 = vmatpush.msra.mxu3 %v364_v31 }
  0xef   :  { %1125 = vmatpush.msra.mxu0 %v412_v34  ;;  %1165 = vmatpush.msra.mxu1 %v446_v10  ;;  %v2917_v34 = vld [vmem:[#allocation6 + $0xf0] sm:$0xff]  ;;  %v438_v10 = vld [vmem:[#allocation4 + $0x868] sm:$0xff] }
  0xf0   :  { %4223 = vst [vmem:[#allocation18_spill] sm:$0xff] %v2895_v24  ;;  %v2899_v57 = vpop.f32.mrf.mxu0  ;;  %898 = vmatmul.f32.gmra.mxu2 %v2184_v51  ;;  %v440_v51 = vld [vmem:[#allocation4 + $0x878] sm:$0xff]  ;;  %1093 = vmatpush.msra.mxu3 %v362_v54  ;;  %v3148_v24 = vld [vmem:[#allocation6 + $0xa8] sm:$0xff] }
  0xf1   :  { %4224 = vst [vmem:[#allocation19_spill] sm:$0xff] %v2899_v57  ;;  %939 = vmatmul.f32.gmra.mxu3 %v2568_v20  ;;  %1126 = vmatpush.msra.mxu0 %v410_v37  ;;  %v402_v37 = vld [vmem:[#allocation4 + $0x748] sm:$0xff]  ;;  %v3143_v57 = vld [vmem:[#allocation6 + $0x1b8] sm:$0xff] }
  0xf2   :  { %1166 = vmatpush.msra.mxu1 %v444_v3  ;;  %1052 = vmatpush.msra.mxu2 %v330_v58  ;;  %v400_v3 = vld [vmem:[#allocation4 + $0x738] sm:$0xff]  ;;  %v398_v58 = vld [vmem:[#allocation4 + $0x728] sm:$0xff] }
  0xf3   :  { %v2905_v2 = vpop.f32.mrf.mxu1  ;;  %977 = vmatmul.f32.gmra.mxu0 %v2552_v4  ;;  %v571_v1 = vpop.f32.mrf.mxu2  ;;  %v406_v4 = vld [vmem:[#allocation4 + $0x768] sm:$0xff]  ;;  %1303 = vmatpush.msrb.mxu3 %v2919_v12 }
  0xf4   :  { %4225 = vst [vmem:[#allocation20_spill] sm:$0xff] %v2905_v2  ;;  %v572_v52 = vadd.f32 %v571_v1, %v531_v14  ;;  %v612_v38 = vpop.f32.mrf.mxu3  ;;  %v2185_v14 = vld [vmem:[%s4110_s0 + $0x128] sm:$0xff]  ;;  %1127 = vmatpush.msra.mxu0 %v408_v48  ;;  %1167 = vmatpush.msra.mxu1 %v442_v42  ;;  %v2930_v42 = vld [vmem:[#allocation6 + $0xe0] sm:$0xff] }
  0xf5   :  { %1283 = vmatpush.msrb.mxu2 %v2917_v34 }
  0xf6   :  { %v2908_v20 = vadd.f32 %v612_v38, %v572_v52  ;;  %1018 = vmatmul.f32.gmra.mxu1 %v2579_v27  ;;  %v404_v27 = vld [vmem:[#allocation4 + $0x758] sm:$0xff]  ;;  %1128 = vmatpush.msra.mxu0 %v406_v4  ;;  %v2186_v4 = vld [vmem:[%s4110_s0 + $0x170] sm:$0xff] }
  0xf7   :  { %1168 = vmatpush.msra.mxu1 %v440_v51  ;;  %1284 = vmatpush.msrb.mxu2 %v2930_v42  ;;  %v2941_v51 = vld [vmem:[#allocation6 + $0xd0] sm:$0xff] }
  0xf8   :  { %4226 = vst [vmem:[#allocation21_spill] sm:$0xff] %v2908_v20  ;;  %v2911_v21 = vpop.f32.mrf.mxu0  ;;  %901 = vmatmul.f32.gmra.mxu2 %v2185_v14  ;;  %1129 = vmatpush.msra.mxu0 %v404_v27  ;;  %v432_v14 = vld [vmem:[#allocation4 + $0x838] sm:$0xff]  ;;  %v430_v27 = vld [vmem:[#allocation4 + $0x828] sm:$0xff] }
  0xf9   :  { %4227 = vst [vmem:[#allocation22_spill] sm:$0xff] %v2911_v21  ;;  %942 = vmatmul.f32.gmra.mxu3 %v2589_v40  ;;  %v436_v40 = vld [vmem:[#allocation4 + $0x858] sm:$0xff]  ;;  %1169 = vmatpush.msra.mxu1 %v438_v10  ;;  %v2944_v10 = vld [vmem:[#allocation6 + $0x1d0] sm:$0xff] }
  0xfa   :  { %1130 = vmatpush.msra.mxu0 %v402_v37  ;;  %1285 = vmatpush.msrb.mxu2 %v2941_v51  ;;  %v2191_v20 = vld [vmem:[%s4110_s0 + $0xb8] sm:$0xff] }
  0xfb   :  { %v2921_v31 = vpop.f32.mrf.mxu1  ;;  %980 = vmatmul.f32.gmra.mxu0 %v2573_v23  ;;  %v574_v1 = vpop.f32.mrf.mxu2  ;;  %v434_v23 = vld [vmem:[#allocation4 + $0x848] sm:$0xff]  ;;  %1170 = vmatpush.msra.mxu1 %v436_v40  ;;  %v428_v40 = vld [vmem:[#allocation4 + $0x818] sm:$0xff] }
  0xfc   :  { %4228 = vst [vmem:[#allocation23_spill] sm:$0xff] %v2921_v31  ;;  %v575_v52 = vadd.f32 %v574_v1, %v2762_v46  ;;  %v615_v38 = vpop.f32.mrf.mxu3  ;;  %v2933_v46 = vld [vmem:[#allocation6 + $0x1e0] sm:$0xff]  ;;  %1131 = vmatpush.msra.mxu0 %v400_v3 }
  0xfd   :  { %1171 = vmatpush.msra.mxu1 %v434_v23  ;;  %1304 = vmatpush.msrb.mxu3 %v2933_v46  ;;  %v426_v23 = vld [vmem:[#allocation4 + $0x808] sm:$0xff] }
  0xfe   :  { %v2927_v48 = vadd.f32 %v615_v38, %v575_v52  ;;  %1021 = vmatmul.f32.gmra.mxu1 %v2600_v47  ;;  %v396_v47 = vld [vmem:[#allocation4 + $0x718] sm:$0xff]  ;;  %1132 = vmatpush.msra.mxu0 %v398_v58  ;;  %v394_v52 = vld [vmem:[#allocation4 + $0x708] sm:$0xff]  ;;  %v2957_v58 = vld [vmem:[#allocation6 + $0x1c0] sm:$0xff] }
  0xff   :  { %1172 = vmatpush.msra.mxu1 %v432_v14  ;;  %1305 = vmatpush.msrb.mxu3 %v2944_v10  ;;  %v2969_v14 = vld [vmem:[#allocation6 + $0x1b0] sm:$0xff] }
 0x100   :  { %4229 = vst [vmem:[#allocation24_spill] sm:$0xff] %v2927_v48  ;;  %v2935_v54 = vpop.f32.mrf.mxu0  ;;  %904 = vmatmul.f32.gmra.mxu2 %v2186_v4  ;;  %1133 = vmatpush.msra.mxu0 %v396_v47  ;;  %v2187_v4 = vld [vmem:[%s4110_s0 + $0x1b8] sm:$0xff] }
 0x101   :  { %4230 = vst [vmem:[#allocation25_spill] sm:$0xff] %v2935_v54  ;;  %945 = vmatmul.f32.gmra.mxu3 %v2610_v60  ;;  %1173 = vmatpush.msra.mxu1 %v430_v27  ;;  %v3096_v54 = vld [vmem:[#allocation6 + $0x1f8] sm:$0xff] }
 0x102   :  { %1134 = vmatpush.msra.mxu0 %v394_v52  ;;  %1306 = vmatpush.msrb.mxu3 %v2957_v58 }
 0x103   :  { %v2946_v1 = vpop.f32.mrf.mxu1  ;;  %983 = vmatmul.f32.gmra.mxu0 %v2594_v43  ;;  %v577_v37 = vpop.f32.mrf.mxu2  ;;  %v2955_v43 = vld [vmem:[#allocation6 + $0xc0] sm:$0xff]  ;;  %1174 = vmatpush.msra.mxu1 %v428_v40 }
 0x104   :  { %4231 = vst [vmem:[#allocation26_spill] sm:$0xff] %v2946_v1  ;;  %v578_v38 = vadd.f32 %v577_v37, %v2786_v30  ;;  %v618_v60 = vpop.f32.mrf.mxu3  ;;  %1286 = vmatpush.msrb.mxu2 %v2955_v43  ;;  %1307 = vmatpush.msrb.mxu3 %v2969_v14 }
 0x105   :  { %1175 = vmatpush.msra.mxu1 %v426_v23  ;;  %1371 = vmatpush.msrb.mxu0 %v2917_v34  ;;  %v2188_v23 = vld [vmem:[%s4110_s0 + $0x200] sm:$0xff] }
 0x106   :  { %v2952_v3 = vadd.f32 %v618_v60, %v578_v38  ;;  %1024 = vmatmul.f32.gmra.mxu1 %v2621_v5  ;;  %v2967_v5 = vld [vmem:[#allocation6 + $0xb0] sm:$0xff]  ;;  %v2981_v38 = vld [vmem:[#allocation6 + $0x1a0] sm:$0xff] }
 0x107   :  { %1287 = vmatpush.msrb.mxu2 %v2967_v5  ;;  %1391 = vmatpush.msrb.mxu1 %v2919_v12  ;;  %4235 = vst [vmem:[#allocation30_spill] sm:$0xff] %v2981_v38 }
 0x108   :  { %4232 = vst [vmem:[#allocation27_spill] sm:$0xff] %v2952_v3  ;;  %v2960_v30 = vpop.f32.mrf.mxu0  ;;  %907 = vmatmul.f32.gmra.mxu2 %v2187_v4  ;;  %1308 = vmatpush.msrb.mxu3 %v2981_v38  ;;  %v3004_v4 = vld [vmem:[#allocation6 + $0x180] sm:$0xff] }
 0x109   :  { %4233 = vst [vmem:[#allocation28_spill] sm:$0xff] %v2960_v30  ;;  %948 = vmatmul.f32.gmra.mxu3 %v2631_v16  ;;  %v2979_v16 = vld [vmem:[#allocation6 + $0xa0] sm:$0xff]  ;;  %1392 = vmatpush.msrb.mxu1 %v2933_v46 }
 0x10a   :  { %1288 = vmatpush.msrb.mxu2 %v2979_v16  ;;  %1372 = vmatpush.msrb.mxu0 %v2930_v42  ;;  %4239 = vst [vmem:[#allocation34_spill] sm:$0xff] %v3004_v4 }
 0x10b   :  { %v2973_v47 = vpop.f32.mrf.mxu1  ;;  %986 = vmatmul.f32.gmra.mxu0 %v2615_v62  ;;  %v580_v27 = vpop.f32.mrf.mxu2  ;;  %v2988_v62 = vld [vmem:[#allocation6 + $0x90] sm:$0xff]  ;;  %1393 = vmatpush.msrb.mxu1 %v2944_v10 }
 0x10c   :  { %4234 = vst [vmem:[#allocation29_spill] sm:$0xff] %v2973_v47  ;;  %v581_v37 = vadd.f32 %v580_v27, %v2814_v17  ;;  %v621_v52 = vpop.f32.mrf.mxu3  ;;  %v2991_v17 = vld [vmem:[#allocation6 + $0x190] sm:$0xff]  ;;  %1289 = vmatpush.msrb.mxu2 %v2988_v62  ;;  %1373 = vmatpush.msrb.mxu0 %v2941_v51 }
 0x10d   :  { %4237 = vst [vmem:[#allocation32_spill] sm:$0xff] %v2991_v17  ;;  %1309 = vmatpush.msrb.mxu3 %v2991_v17  ;;  %1394 = vmatpush.msrb.mxu1 %v2957_v58 }
 0x10e   :  { %v2984_v60 = vadd.f32 %v621_v52, %v581_v37  ;;  %1027 = vmatmul.f32.gmra.mxu1 %v2642_v25  ;;  %v3002_v25 = vld [vmem:[#allocation6 + $0x80] sm:$0xff]  ;;  %v3012_v52 = vld [vmem:[#allocation6 + $0x70] sm:$0xff]  ;;  %1374 = vmatpush.msrb.mxu0 %v2955_v43 }
 0x10f   :  { %1290 = vmatpush.msrb.mxu2 %v3002_v25  ;;  %4241 = vst [vmem:[#allocation36_spill] sm:$0xff] %v3012_v52  ;;  %1310 = vmatpush.msrb.mxu3 %v3004_v4 }
 0x110   :  { %4236 = vst [vmem:[#allocation31_spill] sm:$0xff] %v2984_v60  ;;  %v2994_v40 = vpop.f32.mrf.mxu0  ;;  %910 = vmatmul.f32.gmra.mxu2 %v2188_v23  ;;  %v3020_v60 = vld [vmem:[#allocation6 + $0x60] sm:$0xff]  ;;  %1375 = vmatpush.msrb.mxu0 %v2967_v5 }
 0x111   :  { %4238 = vst [vmem:[#allocation33_spill] sm:$0xff] %v2994_v40  ;;  %951 = vmatmul.f32.gmra.mxu3 %v2652_v39  ;;  %v3014_v39 = vld [vmem:[#allocation6 + $0x170] sm:$0xff]  ;;  %1291 = vmatpush.msrb.mxu2 %v3012_v52 }
 0x112   :  { %4242 = vst [vmem:[#allocation37_spill] sm:$0xff] %v3014_v39  ;;  %1311 = vmatpush.msrb.mxu3 %v3014_v39  ;;  %1395 = vmatpush.msrb.mxu1 %v2969_v14 }
 0x113   :  { %v3008_v27 = vpop.f32.mrf.mxu1  ;;  %989 = vmatmul.f32.gmra.mxu0 %v2636_v18  ;;  %v583_v37 = vpop.f32.mrf.mxu2  ;;  %4243 = vst [vmem:[#allocation38_spill] sm:$0xff] %v3020_v60  ;;  %v645_v18 = vadd.f32 %v2870_v22, %v2864_v0  ;;  %1292 = vmatpush.msrb.mxu2 %v3020_v60  ;;  %v2189_v0 = vld [vmem:[%s4110_s0 + $0x28] sm:$0xff]  ;;  %v3047_v22 = vld [vmem:[#allocation6 + $0x140] sm:$0xff] }
 0x114   :  { %4240 = vst [vmem:[#allocation35_spill] sm:$0xff] %v3008_v27  ;;  %v584_v23 = vadd.f32 %v583_v37, %v2842_v13  ;;  %v624_v40 = vpop.f32.mrf.mxu3  ;;  %v3022_v27 = vld [vmem:[#allocation6 + $0x160] sm:$0xff]  ;;  %v3031_v13 = vld [vmem:[#allocation6 + $0x50] sm:$0xff]  ;;  %1376 = vmatpush.msrb.mxu0 %v2979_v16  ;;  %1396 = vmatpush.msrb.mxu1 %v2981_v38 }
 0x115   :  { %4244 = vst [vmem:[#allocation39_spill] sm:$0xff] %v3022_v27  ;;  %v3034_v37 = vld [vmem:[#allocation6 + $0x150] sm:$0xff]  ;;  %1312 = vmatpush.msrb.mxu3 %v3022_v27  ;;  %1293 = vmatpush.msrb.mxu2 %v3031_v13 }
 0x116   :  { %v3027_v47 = vadd.f32 %v624_v40, %v584_v23  ;;  %1030 = vmatmul.f32.gmra.mxu1 %v2663_v49  ;;  %4246 = vst [vmem:[#allocation41_spill] sm:$0xff] %v3031_v13  ;;  %v3045_v49 = vld [vmem:[#allocation6 + $0x40] sm:$0xff]  ;;  %v686_v40 = vadd.f32 %v2876_v28, %v645_v18  ;;  %1377 = vmatpush.msrb.mxu0 %v2988_v62 }
 0x117   :  { %4247 = vst [vmem:[#allocation42_spill] sm:$0xff] %v3034_v37  ;;  %1313 = vmatpush.msrb.mxu3 %v3034_v37  ;;  %1294 = vmatpush.msrb.mxu2 %v3045_v49  ;;  %v3063_v28 = vld [vmem:[#allocation6 + $0x20] sm:$0xff] }
 0x118   :  { %4245 = vst [vmem:[#allocation40_spill] sm:$0xff] %v3027_v47  ;;  %v3037_v30 = vpop.f32.mrf.mxu0  ;;  %1053 = vmatmul.f32.vlgmr.msra.gmra.mxu2 %v2189_v0  ;;  %v3065_v18 = vld [vmem:[#allocation6 + $0x120] sm:$0xff]  ;;  %1397 = vmatpush.msrb.mxu1 %v2991_v17 }
 0x119   :  { %4248 = vst [vmem:[#allocation43_spill] sm:$0xff] %v3037_v30  ;;  %1094 = vmatmul.f32.vlgmr.msra.gmra.mxu3 %v2673_v55  ;;  %v3056_v55 = vld [vmem:[#allocation6 + $0x30] sm:$0xff]  ;;  %1378 = vmatpush.msrb.mxu0 %v3002_v25 }
 0x11a   :  { %4249 = vst [vmem:[#allocation44_spill] sm:$0xff] %v3045_v49  ;;  %v3058_v30 = vld [vmem:[#allocation6 + $0x130] sm:$0xff]  ;;  %1314 = vmatpush.msrb.mxu3 %v3047_v22  ;;  %1295 = vmatpush.msrb.mxu2 %v3056_v55 }
 0x11b   :  { %4250 = vst [vmem:[#allocation45_spill] sm:$0xff] %v3047_v22  ;;  %v3052_v23 = vpop.f32.mrf.mxu1  ;;  %992 = vmatmul.f32.gmra.mxu0 %v2657_v44  ;;  %v726_v0 = vpop.f32.mrf.mxu2  ;;  %v648_v44 = vadd.f32 %v2884_v36, %v2880_v35  ;;  %v2190_v35 = vld [vmem:[%s4110_s0 + $0x70] sm:$0xff]  ;;  %v3090_v36 = vld [vmem:[#allocation6 + $0x100] sm:$0xff]  ;;  %1398 = vmatpush.msrb.mxu1 %v3004_v4 }
 0x11c   :  { %4251 = vst [vmem:[#allocation46_spill] sm:$0xff] %v3052_v23  ;;  %v727_v47 = vadd.f32 %v726_v0, %v686_v40  ;;  %v767_v3 = vpop.f32.mrf.mxu3  ;;  %1315 = vmatpush.msrb.mxu3 %v3058_v30  ;;  %v3074_v40 = vld [vmem:[#allocation6 + $0x10] sm:$0xff]  ;;  %1296 = vmatpush.msrb.mxu2 %v3063_v28 }
 0x11d   :  { %4252 = vst [vmem:[#allocation47_spill] sm:$0xff] %v3056_v55  ;;  %v3077_v0 = vld [vmem:[#allocation6 + $0x110] sm:$0xff]  ;;  %1379 = vmatpush.msrb.mxu0 %v3012_v52  ;;  %1399 = vmatpush.msrb.mxu1 %v3014_v39 }
 0x11e   :  { %4253 = vst [vmem:[#allocation48_spill] sm:$0xff] %v3058_v30  ;;  %v3070_v23 = vadd.f32 %v767_v3, %v727_v47  ;;  %1033 = vmatmul.f32.gmra.mxu1 %v2684_v61  ;;  %1316 = vmatpush.msrb.mxu3 %v3065_v18  ;;  %v3088_v61 = vld [vmem:[#allocation6] sm:$0xff]  ;;  %v689_v3 = vadd.f32 %v2890_v45, %v648_v44  ;;  %v3094_v47 = vld [vmem:[#allocation6 + $0xf8] sm:$0xff]  ;;  %v3105_v45 = vld [vmem:[#allocation6 + $0xe8] sm:$0xff] }
 0x11f   :  { %4254 = vst [vmem:[#allocation49_spill] sm:$0xff] %v3063_v28  ;;  %1297 = vmatpush.msrb.mxu2 %v3074_v40  ;;  %v3107_v44 = vld [vmem:[#allocation6 + $0x1e8] sm:$0xff]  ;;  %1380 = vmatpush.msrb.mxu0 %v3020_v60 }
 0x120   :  { %4255 = vst [vmem:[#allocation50_spill] sm:$0xff] %v3065_v18  ;;  %v3080_v1 = vpop.f32.mrf.mxu0  ;;  %1056 = vmatmul.f32.gmra.mxu2 %v2190_v35  ;;  %1317 = vmatpush.msrb.mxu3 %v3077_v0 }
 0x121   :  { %4256 = vst [vmem:[#allocation51_spill] sm:$0xff] %v3070_v23  ;;  %1097 = vmatmul.f32.gmra.mxu3 %v2694_v6  ;;  %1298 = vmatpush.msrb.mxu2 %v3088_v61  ;;  %v3176_v23 = vld [vmem:[#allocation6 + $0x78] sm:$0xff] }
 0x122   :  { %4257 = vst [vmem:[#allocation52_spill] sm:$0xff] %v3074_v40  ;;  %1318 = vmatpush.msrb.mxu3 %v3090_v36  ;;  %1400 = vmatpush.msrb.mxu1 %v3022_v27 }
 0x123   :  { %4258 = vst [vmem:[#allocation53_spill] sm:$0xff] %v3077_v0  ;;  %v3099_v35 = vpop.f32.mrf.mxu1  ;;  %1135 = vmatmul.f32.vlgmr.msra.gmra.mxu0 %v2678_v56  ;;  %v729_v6 = vpop.f32.mrf.mxu2  ;;  %1323 = vmatpush.msra.mxu2 %v3094_v47  ;;  %v3115_v56 = vld [vmem:[#allocation6 + $0xd8] sm:$0xff] }
 0x124   :  { %4259 = vst [vmem:[#allocation54_spill] sm:$0xff] %v3080_v1  ;;  %v730_v48 = vadd.f32 %v729_v6, %v689_v3  ;;  %v770_v31 = vpop.f32.mrf.mxu3  ;;  %1343 = vmatpush.msra.mxu3 %v3096_v54  ;;  %v3118_v3 = vld [vmem:[#allocation6 + $0x1d8] sm:$0xff]  ;;  %1381 = vmatpush.msrb.mxu0 %v3031_v13  ;;  %v3173_v1 = vld [vmem:[#allocation6 + $0x188] sm:$0xff] }
 0x125   :  { %4260 = vst [vmem:[#allocation55_spill] sm:$0xff] %v3088_v61  ;;  %1324 = vmatpush.msra.mxu2 %v3105_v45  ;;  %1401 = vmatpush.msrb.mxu1 %v3034_v37 }
 0x126   :  { %4261 = vst [vmem:[#allocation56_spill] sm:$0xff] %v3090_v36  ;;  %v3111_v21 = vadd.f32 %v770_v31, %v730_v48  ;;  %1176 = vmatmul.f32.vlgmr.msra.gmra.mxu1 %v2705_v11  ;;  %1344 = vmatpush.msra.mxu3 %v3107_v44  ;;  %v3126_v31 = vld [vmem:[#allocation6 + $0xc8] sm:$0xff]  ;;  %v3134_v48 = vld [vmem:[#allocation6 + $0xb8] sm:$0xff] }
 0x127   :  { %4262 = vst [vmem:[#allocation57_spill] sm:$0xff] %v3099_v35  ;;  %1325 = vmatpush.msra.mxu2 %v3115_v56  ;;  %v3131_v11 = vld [vmem:[#allocation6 + $0x1c8] sm:$0xff]  ;;  %1382 = vmatpush.msrb.mxu0 %v3045_v49 }
 0x128   :  { %4263 = vst [vmem:[#allocation58_spill] sm:$0xff] %v3111_v21  ;;  %v3121_v6 = vpop.f32.mrf.mxu0  ;;  %1059 = vmatmul.f32.gmra.mxu2 %v2191_v20  ;;  %1345 = vmatpush.msra.mxu3 %v3118_v3  ;;  %v2192_v21 = vld [vmem:[%s4110_s0 + $0x100] sm:$0xff] }
 0x129   :  { %4264 = vst [vmem:[#allocation59_spill] sm:$0xff] %v3121_v6  ;;  %1100 = vmatmul.f32.gmra.mxu3 %v2712_v15  ;;  %1326 = vmatpush.msra.mxu2 %v3126_v31  ;;  %v3152_v6 = vld [vmem:[#allocation6 + $0x1a8] sm:$0xff] }
 0x12a   :  { %1346 = vmatpush.msra.mxu3 %v3131_v11  ;;  %4267 = vst [vmem:[#allocation62_spill] sm:$0xff] %v3152_v6  ;;  %1402 = vmatpush.msrb.mxu1 %v3047_v22 }
 0x12b   :  { %v3137_v2 = vpop.f32.mrf.mxu1  ;;  %1138 = vmatmul.f32.gmra.mxu0 %v2699_v7  ;;  %v3140_v20 = vpop.f32.mrf.mxu2  ;;  %1327 = vmatpush.msra.mxu2 %v3134_v48  ;;  %v3157_v7 = vld [vmem:[#allocation6 + $0x98] sm:$0xff]  ;;  %4271 = vst [vmem:[#allocation66_spill] sm:$0xff] %v3173_v1 }
 0x12c   :  { %4265 = vst [vmem:[#allocation60_spill] sm:$0xff] %v3140_v20  ;;  %v3145_v15 = vpop.f32.mrf.mxu3  ;;  %1347 = vmatpush.msra.mxu3 %v3143_v57  ;;  %1383 = vmatpush.msrb.mxu0 %v3056_v55 }
 0x12d   :  { %4266 = vst [vmem:[#allocation61_spill] sm:$0xff] %v3145_v15  ;;  %1328 = vmatpush.msra.mxu2 %v3148_v24  ;;  %v3160_v15 = vld [vmem:[#allocation6 + $0x198] sm:$0xff]  ;;  %1403 = vmatpush.msrb.mxu1 %v3058_v30 }
 0x12e   :  { %1179 = vmatmul.f32.gmra.mxu1 %v2722_v29  ;;  %4268 = vst [vmem:[#allocation63_spill] sm:$0xff] %v3157_v7  ;;  %1348 = vmatpush.msra.mxu3 %v3152_v6  ;;  %v3169_v29 = vld [vmem:[#allocation6 + $0x88] sm:$0xff] }
 0x12f   :  { %4269 = vst [vmem:[#allocation64_spill] sm:$0xff] %v3160_v15  ;;  %1329 = vmatpush.msra.mxu2 %v3157_v7  ;;  %1384 = vmatpush.msrb.mxu0 %v3063_v28 }
 0x130   :  { %v3163_v20 = vpop.f32.mrf.mxu0  ;;  %1062 = vmatmul.f32.gmra.mxu2 %v2192_v21  ;;  %1349 = vmatpush.msra.mxu3 %v3160_v15  ;;  %4272 = vst [vmem:[#allocation67_spill] sm:$0xff] %v3176_v23  ;;  %v2193_v21 = vld [vmem:[%s4110_s0 + $0xc8] sm:$0xff] }
 0x131   :  { %4270 = vst [vmem:[#allocation65_spill] sm:$0xff] %v3163_v20  ;;  %1103 = vmatmul.f32.gmra.mxu3 %v2728_v41  ;;  %1330 = vmatpush.msra.mxu2 %v3169_v29  ;;  %v3187_v41 = vld [vmem:[#allocation6 + $0x178] sm:$0xff]  ;;  %v3192_v15 = vld [vmem:[#allocation6 + $0x68] sm:$0xff] }
 0x132   :  { %4275 = vst [vmem:[#allocation70_spill] sm:$0xff] %v3187_v41  ;;  %1350 = vmatpush.msra.mxu3 %v3173_v1  ;;  %1385 = vmatpush.msrb.mxu0 %v3074_v40 }
 0x133   :  { %v3179_v20 = vpop.f32.mrf.mxu1  ;;  %1141 = vmatmul.f32.gmra.mxu0 %v2193_v21  ;;  %v3184_v35 = vpop.f32.mrf.mxu2  ;;  %4277 = vst [vmem:[#allocation72_spill] sm:$0xff] %v3192_v15  ;;  %1331 = vmatpush.msra.mxu2 %v3176_v23  ;;  %v3201_v21 = vld [vmem:[#allocation6 + $0x58] sm:$0xff]  ;;  %v2194_v23 = vld [vmem:[%s4110_s0 + $0x148] sm:$0xff] }
 0x134   :  { %4273 = vst [vmem:[#allocation68_spill] sm:$0xff] %v3179_v20  ;;  %v3189_v7 = vpop.f32.mrf.mxu3  ;;  %v3196_v20 = vld [vmem:[#allocation6 + $0x168] sm:$0xff]  ;;  %1351 = vmatpush.msra.mxu3 %v3187_v41  ;;  %v3220_v41 = vld [vmem:[#allocation6 + $0x38] sm:$0xff]  ;;  %1386 = vmatpush.msrb.mxu0 %v3088_v61 }
 0x135   :  { %4274 = vst [vmem:[#allocation69_spill] sm:$0xff] %v3184_v35  ;;  %1332 = vmatpush.msra.mxu2 %v3192_v15  ;;  %v3217_v15 = vld [vmem:[#allocation6 + $0x148] sm:$0xff]  ;;  %1404 = vmatpush.msrb.mxu1 %v3065_v18 }
 0x136   :  { %4276 = vst [vmem:[#allocation71_spill] sm:$0xff] %v3189_v7  ;;  %1182 = vmatmul.f32.gmra.mxu1 %v2738_v53  ;;  %v3204_v7 = vld [vmem:[#allocation6 + $0x158] sm:$0xff]  ;;  %1352 = vmatpush.msra.mxu3 %v3196_v20  ;;  %v3213_v53 = vld [vmem:[#allocation6 + $0x48] sm:$0xff] }
 0x137   :  { %4278 = vst [vmem:[#allocation73_spill] sm:$0xff] %v3196_v20  ;;  %1333 = vmatpush.msra.mxu2 %v3201_v21  ;;  %1405 = vmatpush.msrb.mxu1 %v3077_v0 }
 0x138   :  { %4279 = vst [vmem:[#allocation74_spill] sm:$0xff] %v3201_v21  ;;  %v3207_v35 = vpop.f32.mrf.mxu0  ;;  %1065 = vmatmul.f32.gmra.mxu2 %v2194_v23  ;;  %1353 = vmatpush.msra.mxu3 %v3204_v7  ;;  %v2195_v23 = vld [vmem:[%s4110_s0 + $0x110] sm:$0xff] }
 0x139   :  { %4280 = vst [vmem:[#allocation75_spill] sm:$0xff] %v3204_v7  ;;  %1106 = vmatmul.f32.gmra.mxu3 %v2744_v9  ;;  %1334 = vmatpush.msra.mxu2 %v3213_v53  ;;  %v3231_v9 = vld [vmem:[#allocation6 + $0x138] sm:$0xff]  ;;  %v3236_v7 = vld [vmem:[#allocation6 + $0x28] sm:$0xff] }
 0x13a   :  { %4281 = vst [vmem:[#allocation76_spill] sm:$0xff] %v3207_v35  ;;  %1354 = vmatpush.msra.mxu3 %v3217_v15  ;;  %1459 = vmatpush.msra.mxu0 %v2917_v34 }
 0x13b   :  { %4282 = vst [vmem:[#allocation77_spill] sm:$0xff] %v3217_v15  ;;  %v3223_v35 = vpop.f32.mrf.mxu1  ;;  %1144 = vmatmul.f32.gmra.mxu0 %v2195_v23  ;;  %v3228_v20 = vpop.f32.mrf.mxu2  ;;  %1335 = vmatpush.msra.mxu2 %v3220_v41  ;;  %v3245_v23 = vld [vmem:[#allocation6 + $0x18] sm:$0xff] }
 0x13c   :  { %4283 = vst [vmem:[#allocation78_spill] sm:$0xff] %v3220_v41  ;;  %v3233_v21 = vpop.f32.mrf.mxu3  ;;  %1355 = vmatpush.msra.mxu3 %v3231_v9  ;;  %v2196_v41 = vld [vmem:[%s4110_s0 + $0x190] sm:$0xff]  ;;  %1406 = vmatpush.msrb.mxu1 %v3090_v36 }
 0x13d   :  { %4284 = vst [vmem:[#allocation79_spill] sm:$0xff] %v3223_v35  ;;  %v3240_v35 = vld [vmem:[#allocation6 + $0x128] sm:$0xff]  ;;  %1336 = vmatpush.msra.mxu2 %v3236_v7  ;;  %1460 = vmatpush.msra.mxu0 %v2930_v42 }
 0x13e   :  { %4285 = vst [vmem:[#allocation80_spill] sm:$0xff] %v3228_v20  ;;  %1185 = vmatmul.f32.gmra.mxu1 %v2756_v26  ;;  %1356 = vmatpush.msra.mxu3 %v3240_v35  ;;  %v3257_v26 = vld [vmem:[#allocation6 + $0x8] sm:$0xff] }
 0x13f   :  { %4286 = vst [vmem:[#allocation81_spill] sm:$0xff] %v3231_v9  ;;  %1337 = vmatpush.msra.mxu2 %v3245_v23  ;;  %1479 = vmatpush.msra.mxu1 %v2919_v12 }
 0x140   :  { %4287 = vst [vmem:[#allocation82_spill] sm:$0xff] %v3233_v21  ;;  %v3248_v21 = vld [vmem:[#allocation6 + $0x118] sm:$0xff]  ;;  %v3251_v20 = vpop.f32.mrf.mxu0  ;;  %1068 = vmatmul.f32.gmra.mxu2 %v2196_v41  ;;  %1461 = vmatpush.msra.mxu0 %v2941_v51  ;;  %v4302_v51 = vld [vmem:[#allocation16_spill] sm:$0xff] }
 0x141   :  { %4288 = vst [vmem:[#allocation83_spill] sm:$0xff] %v3236_v7  ;;  %1109 = vmatmul.f32.gmra.mxu3 %v2767_v50  ;;  %v3261_v7 = vld [vmem:[#allocation6 + $0x108] sm:$0xff]  ;;  %v2197_v41 = vld [vmem:[%s4110_s0 + $0x158] sm:$0xff]  ;;  %1338 = vmatpush.msra.mxu2 %v3257_v26 }
 0x142   :  { %4289 = vst [vmem:[#allocation84_spill] sm:$0xff] %v3240_v35  ;;  %1357 = vmatpush.msra.mxu3 %v3248_v21  ;;  %1480 = vmatpush.msra.mxu1 %v2933_v46 }
 0x143   :  { %4290 = vst [vmem:[#allocation85_spill] sm:$0xff] %v3245_v23  ;;  %1147 = vmatmul.f32.gmra.mxu0 %v2197_v41  ;;  %v3270_v35 = vpop.f32.mrf.mxu2  ;;  %v2198_v41 = vld [vmem:[%s4110_s0 + $0x1d8] sm:$0xff] }
 0x144   :  { %4291 = vst [vmem:[#allocation86_spill] sm:$0xff] %v3248_v21  ;;  %v3273_v50 = vpop.f32.mrf.mxu3  ;;  %1358 = vmatpush.msra.mxu3 %v3261_v7  ;;  %1462 = vmatpush.msra.mxu0 %v2955_v43 }
 0x145   :  { %4292 = vst [vmem:[#allocation87_spill] sm:$0xff] %v3251_v20  ;;  %v3265_v20 = vpop.f32.mrf.mxu1  ;;  %1481 = vmatpush.msra.mxu1 %v2944_v10  ;;  %v2400_v10 = vmov 0.0  }
 0x146   :  { %4293 = vst [vmem:[#allocation88_spill] sm:$0xff] %v3265_v20  ;;  %1188 = vmatmul.f32.gmra.mxu1 %v2781_v8  ;;  %1463 = vmatpush.msra.mxu0 %v2967_v5 }
 0x147   :  { %4294 = vst [vmem:[#allocation89_spill] sm:$0xff] %v3270_v35  ;;  %1482 = vmatpush.msra.mxu1 %v2957_v58  ;;  %v4304_v58 = vld [vmem:[#allocation15_spill] sm:$0xff] }
 0x148   :  { %4295 = vst [vmem:[#allocation90_spill] sm:$0xff] %v3273_v50  ;;  %v3281_v20 = vpop.f32.mrf.mxu0  ;;  %1071 = vmatmul.f32.gmra.mxu2 %v2198_v41  ;;  %1464 = vmatpush.msra.mxu0 %v2979_v16  ;;  %v4309_v50 = vld [vmem:[#allocation67_spill] sm:$0xff] }
 0x149   :  { %4296 = vst [vmem:[#allocation91_spill] sm:$0xff] %v3281_v20  ;;  %1112 = vmatmul.f32.gmra.mxu3 %v2793_v32  ;;  %1483 = vmatpush.msra.mxu1 %v2969_v14 }
 0x14a   :  { %1465 = vmatpush.msra.mxu0 %v2988_v62 }
 0x14b   :  { %1150 = vmatmul.f32.gmra.mxu0 %v2775_v59  ;;  %v3293_v34 = vpop.f32.mrf.mxu2  ;;  %v2199_v59 = vld [vmem:[%s4110_s0 + $0x220] sm:$0xff]  ;;  %1484 = vmatpush.msra.mxu1 %v2981_v38 }
 0x14c   :  { %4297 = vst [vmem:[#allocation92_spill] sm:$0xff] %v3293_v34  ;;  %v3295_v42 = vpop.f32.mrf.mxu3  ;;  %1466 = vmatpush.msra.mxu0 %v3002_v25  ;;  %v4307_v34 = vld [vmem:[#allocation64_spill] sm:$0xff] }
 0x14d   :  { %v3290_v8 = vpop.f32.mrf.mxu1  ;;  %4298 = vst [vmem:[#allocation93_spill] sm:$0xff] %v3295_v42  ;;  %1485 = vmatpush.msra.mxu1 %v2991_v17 }
 0x14e   :  { %1191 = vmatmul.f32.gmra.mxu1 %v2809_v63  ;;  %1467 = vmatpush.msra.mxu0 %v3012_v52 }
 0x14f   :  { %1486 = vmatpush.msra.mxu1 %v3004_v4 }
 0x150   :  { %v3302_v32 = vpop.f32.mrf.mxu0  ;;  %1074 = vmatmul.f32.gmra.mxu2 %v2199_v59  ;;  %1468 = vmatpush.msra.mxu0 %v3020_v60 }
 0x151   :  { %4299 = vst [vmem:[#allocation94_spill] sm:$0xff] %v3302_v32  ;;  %1115 = vmatmul.f32.gmra.mxu3 %v2819_v19  ;;  %1487 = vmatpush.msra.mxu1 %v3014_v39  ;;  %v4318_v39 = vld [vmem:[#allocation84_spill] sm:$0xff] }
 0x152   :  { %1469 = vmatpush.msra.mxu0 %v3031_v13 }
 0x153   :  { %1153 = vmatmul.f32.gmra.mxu0 %v2798_v33  ;;  %v3314_v12 = vpop.f32.mrf.mxu2  ;;  %1488 = vmatpush.msra.mxu1 %v3022_v27 }
 0x154   :  { %4300 = vst [vmem:[#allocation95_spill] sm:$0xff] %v3314_v12  ;;  %v3317_v46 = vpop.f32.mrf.mxu3  ;;  %1470 = vmatpush.msra.mxu0 %v3045_v49  ;;  %v4319_v49 = vld [vmem:[#allocation88_spill] sm:$0xff] }
 0x155   :  { %v3311_v63 = vpop.f32.mrf.mxu1  ;;  %4301 = vst [vmem:[#allocation96_spill] sm:$0xff] %v3317_v46  ;;  %v4305_v46 = vld [vmem:[#allocation17_spill] sm:$0xff]  ;;  %1489 = vmatpush.msra.mxu1 %v3034_v37  ;;  %v4313_v37 = vld [vmem:[#allocation74_spill] sm:$0xff] }
 0x156   :  { %1194 = vmatmul.f32.gmra.mxu1 %v4302_v51  ;;  %v2200_v51 = vld [vmem:[#allocation8] sm:$0x3]  ;;  %1471 = vmatpush.msra.mxu0 %v3056_v55 }
 0x157   :  { %1490 = vmatpush.msra.mxu1 %v3047_v22  ;;  %v4311_v22 = vld [vmem:[#allocation72_spill] sm:$0xff] }
 0x158   :  { %v3324_v19 = vpop.f32.mrf.mxu0  ;;  %1299 = vmatmul.f32.vlgmr.msrb.gmra.mxu2 %v2400_v10  ;;  %1472 = vmatpush.msra.mxu0 %v3063_v28  ;;  %v4314_v28 = vld [vmem:[#allocation75_spill] sm:$0xff] }
 0x159   :  { %4303 = vst [vmem:[#allocation16_spill] sm:$0xff] %v3324_v19  ;;  %1319 = vmatmul.f32.vlgmr.msrb.gmra.mxu3 %v2400_v10  ;;  %1411 = vmatpush.msrb.mxu2 %v3094_v47  ;;  %v3342_v19 = vperm.slane %v2200_v51, 1 }
 0x15a   :  { %1431 = vmatpush.msrb.mxu3 %v3096_v54  ;;  %1473 = vmatpush.msra.mxu0 %v3074_v40 }
 0x15b   :  { %1156 = vmatmul.f32.gmra.mxu0 %v4304_v58  ;;  %v3333_v41 = vpop.f32.mrf.mxu2  ;;  %1412 = vmatpush.msrb.mxu2 %v3105_v45  ;;  %v853_v58 = vadd.f32 %v3137_v2, %v3342_v19  ;;  %v862_v4 = vadd.f32 %v4319_v49, %v3342_v19  ;;  %v865_v17 = vadd.f32 %v3290_v8, %v3342_v19 }
 0x15c   :  { %v3336_v59 = vpop.f32.mrf.mxu3  ;;  %1432 = vmatpush.msrb.mxu3 %v3107_v44  ;;  %1474 = vmatpush.msra.mxu0 %v3088_v61  ;;  %v868_v38 = vadd.f32 %v3311_v63, %v3342_v19 }
 0x15d   :  { %v3330_v33 = vpop.f32.mrf.mxu1  ;;  %1413 = vmatpush.msrb.mxu2 %v3115_v56  ;;  %1491 = vmatpush.msra.mxu1 %v3058_v30 }
 0x15e   :  { %1197 = vmatmul.f32.gmra.mxu1 %v4305_v46  ;;  %1433 = vmatpush.msrb.mxu3 %v3118_v3 }
 0x15f   :  { %1414 = vmatpush.msrb.mxu2 %v3126_v31  ;;  %1492 = vmatpush.msra.mxu1 %v3065_v18  ;;  %v4315_v18 = vld [vmem:[#allocation79_spill] sm:$0xff] }
 0x160   :  { %v3350_v12 = vpop.f32.mrf.mxu0  ;;  %1339 = vmatmul.f32.vlgmr.msra.gmra.mxu2 %v2400_v10  ;;  %1434 = vmatpush.msrb.mxu3 %v3131_v11  ;;  %v859_v27 = vadd.f32 %v4315_v18, %v3342_v19 }
 0x161   :  { %1359 = vmatmul.f32.vlgmr.msra.gmra.mxu3 %v2400_v10  ;;  %1415 = vmatpush.msrb.mxu2 %v3134_v48  ;;  %v4306_v10 = vld [vmem:[#allocation63_spill] sm:$0xff] }
 0x162   :  { %1435 = vmatpush.msrb.mxu3 %v3143_v57  ;;  %1493 = vmatpush.msra.mxu1 %v3077_v0 }
 0x163   :  { %v893_v51 = vpop.f32.mrf.mxu2  ;;  %1416 = vmatpush.msrb.mxu2 %v3148_v24 }
 0x164   :  { %v894_v2 = vadd.f32 %v893_v51, %v853_v58  ;;  %v934_v32 = vpop.f32.mrf.mxu3  ;;  %1436 = vmatpush.msrb.mxu3 %v3152_v6  ;;  %v4308_v58 = vld [vmem:[#allocation68_spill] sm:$0xff]  ;;  %1494 = vmatpush.msra.mxu1 %v3090_v36 }
 0x165   :  { %v3356_v46 = vpop.f32.mrf.mxu1  ;;  %1417 = vmatpush.msrb.mxu2 %v4306_v10  ;;  %v856_v51 = vadd.f32 %v4308_v58, %v3342_v19  ;;  %v4312_v58 = vld [vmem:[#allocation73_spill] sm:$0xff] }
 0x166   :  { %v3364_v42 = vadd.f32 %v934_v32, %v894_v2  ;;  %1437 = vmatpush.msrb.mxu3 %v4307_v34  ;;  %v4310_v32 = vld [vmem:[#allocation70_spill] sm:$0xff] }
 0x167   :  { %1418 = vmatpush.msrb.mxu2 %v3169_v29 }
 0x168   :  { %v3372_v20 = vpop.f32.mrf.mxu0  ;;  %1438 = vmatpush.msrb.mxu3 %v3173_v1 }
 0x169   :  { %1419 = vmatpush.msrb.mxu2 %v4309_v50 }
 0x16a   :  { %1439 = vmatpush.msrb.mxu3 %v4310_v32 }
 0x16b   :  { %v896_v35 = vpop.f32.mrf.mxu2  ;;  %1420 = vmatpush.msrb.mxu2 %v4311_v22 }
 0x16c   :  { %v897_v61 = vadd.f32 %v896_v35, %v856_v51  ;;  %v937_v40 = vpop.f32.mrf.mxu3  ;;  %1440 = vmatpush.msrb.mxu3 %v4312_v58  ;;  %v4316_v35 = vld [vmem:[#allocation78_spill] sm:$0xff] }
 0x16d   :  { %v3379_v2 = vpop.f32.mrf.mxu1  ;;  %1421 = vmatpush.msrb.mxu2 %v4313_v37 }
 0x16e   :  { %v3385_v30 = vadd.f32 %v937_v40, %v897_v61  ;;  %1441 = vmatpush.msrb.mxu3 %v4314_v28  ;;  %v4317_v61 = vld [vmem:[#allocation83_spill] sm:$0xff] }
 0x16f   :  { %1422 = vmatpush.msrb.mxu2 %v3213_v53 }
 0x170   :  { %v3392_v55 = vpop.f32.mrf.mxu0  ;;  %1442 = vmatpush.msrb.mxu3 %v3217_v15 }
 0x171   :  { %1423 = vmatpush.msrb.mxu2 %v4316_v35 }
 0x172   :  { %1443 = vmatpush.msrb.mxu3 %v3231_v9 }
 0x173   :  { %v899_v40 = vpop.f32.mrf.mxu2  ;;  %1424 = vmatpush.msrb.mxu2 %v4317_v61 }
 0x174   :  { %v900_v0 = vadd.f32 %v899_v40, %v859_v27  ;;  %v940_v36 = vpop.f32.mrf.mxu3  ;;  %1444 = vmatpush.msrb.mxu3 %v4318_v39 }
 0x175   :  { %v3397_v51 = vpop.f32.mrf.mxu1  ;;  %1425 = vmatpush.msrb.mxu2 %v3245_v23 }
 0x176   :  { %v3402_v18 = vadd.f32 %v940_v36, %v900_v0  ;;  %1445 = vmatpush.msrb.mxu3 %v3248_v21 }
 0x177   :  { %1426 = vmatpush.msrb.mxu2 %v3257_v26 }
 0x178   :  { %v3408_v13 = vpop.f32.mrf.mxu0  ;;  %1446 = vmatpush.msrb.mxu3 %v3261_v7 }
 0x179   :  { %1499 = vmatpush.msra.mxu2 %v3094_v47 }
 0x17a   :  { %1519 = vmatpush.msra.mxu3 %v3096_v54 }
 0x17b   :  { %1500 = vmatpush.msra.mxu2 %v3105_v45  ;;  %v902_v0 = vpop.f32.mrf.mxu2 }
 0x17c   :  { %1520 = vmatpush.msra.mxu3 %v3107_v44  ;;  %v903_v36 = vadd.f32 %v902_v0, %v862_v4  ;;  %v943_v40 = vpop.f32.mrf.mxu3 }
 0x17d   :  { %v3414_v27 = vpop.f32.mrf.mxu1  ;;  %1501 = vmatpush.msra.mxu2 %v3115_v56 }
 0x17e   :  { %1521 = vmatpush.msra.mxu3 %v3118_v3  ;;  %v3419_v49 = vadd.f32 %v943_v40, %v903_v36 }
 0x17f   :  { %1502 = vmatpush.msra.mxu2 %v3126_v31 }
 0x180   :  { %1522 = vmatpush.msra.mxu3 %v3131_v11  ;;  %v3425_v60 = vpop.f32.mrf.mxu0 }
 0x181   :  { %1503 = vmatpush.msra.mxu2 %v3134_v48 }
 0x182   :  { %1523 = vmatpush.msra.mxu3 %v3143_v57 }
 0x183   :  { %1504 = vmatpush.msra.mxu2 %v3148_v24  ;;  %v905_v0 = vpop.f32.mrf.mxu2 }
 0x184   :  { %1524 = vmatpush.msra.mxu3 %v3152_v6  ;;  %v906_v36 = vadd.f32 %v905_v0, %v865_v17  ;;  %v946_v40 = vpop.f32.mrf.mxu3  ;;  %v4320_v17 = vld [vmem:[#allocation57_spill] sm:$0xff] }
 0x185   :  { %v3430_v4 = vpop.f32.mrf.mxu1  ;;  %1505 = vmatpush.msra.mxu2 %v4306_v10  ;;  %v850_v0 = vadd.f32 %v4320_v17, %v3342_v19  ;;  %v871_v17 = vadd.f32 %v3330_v33, %v3342_v19 }
 0x186   :  { %1525 = vmatpush.msra.mxu3 %v4307_v34  ;;  %v3435_v8 = vadd.f32 %v946_v40, %v906_v36 }
 0x187   :  { %1506 = vmatpush.msra.mxu2 %v3169_v29  ;;  %v891_v63 = vadd.f32 %v3333_v41, %v850_v0 }
 0x188   :  { %1526 = vmatpush.msra.mxu3 %v3173_v1  ;;  %v3441_v52 = vpop.f32.mrf.mxu0 }
 0x189   :  { %1507 = vmatpush.msra.mxu2 %v4309_v50 }
 0x18a   :  { %1527 = vmatpush.msra.mxu3 %v4310_v32 }
 0x18b   :  { %1508 = vmatpush.msra.mxu2 %v4311_v22  ;;  %v908_v40 = vpop.f32.mrf.mxu2 }
 0x18c   :  { %1528 = vmatpush.msra.mxu3 %v4312_v58  ;;  %v909_v1 = vadd.f32 %v908_v40, %v868_v38  ;;  %v949_v34 = vpop.f32.mrf.mxu3  ;;  %v932_v38 = vadd.f32 %v3336_v59, %v891_v63 }
 0x18d   :  { %v3448_v36 = vpop.f32.mrf.mxu1  ;;  %1509 = vmatpush.msra.mxu2 %v4313_v37 }
 0x18e   :  { %1529 = vmatpush.msra.mxu3 %v4314_v28  ;;  %v3454_v6 = vadd.f32 %v949_v34, %v909_v1  ;;  %v973_v19 = vadd.f32 %v3350_v12, %v932_v38 }
 0x18f   :  { %1510 = vmatpush.msra.mxu2 %v3213_v53 }
 0x190   :  { %1530 = vmatpush.msra.mxu3 %v3217_v15  ;;  %v3460_v32 = vpop.f32.mrf.mxu0  ;;  %v1014_v63 = vadd.f32 %v3356_v46, %v973_v19 }
 0x191   :  { %1511 = vmatpush.msra.mxu2 %v4316_v35 }
 0x192   :  { %1531 = vmatpush.msra.mxu3 %v3231_v9 }
 0x193   :  { %1512 = vmatpush.msra.mxu2 %v4317_v61  ;;  %v911_v1 = vpop.f32.mrf.mxu2 }
 0x194   :  { %1532 = vmatpush.msra.mxu3 %v4318_v39  ;;  %v912_v34 = vadd.f32 %v911_v1, %v871_v17  ;;  %v952_v0 = vpop.f32.mrf.mxu3 }
 0x195   :  { %v3466_v41 = vpop.f32.mrf.mxu1  ;;  %1513 = vmatpush.msra.mxu2 %v3245_v23 }
 0x196   :  { %1533 = vmatpush.msra.mxu3 %v3248_v21  ;;  %v953_v33 = vadd.f32 %v952_v0, %v912_v34  ;;  %v976_v21 = vadd.f32 %v3372_v20, %v3364_v42 }
 0x197   :  { %1514 = vmatpush.msra.mxu2 %v3257_v26 }
 0x198   :  { %1534 = vmatpush.msra.mxu3 %v3261_v7  ;;  %v993_v59 = vpop.f32.mrf.mxu0  ;;  %v1017_v38 = vadd.f32 %v3379_v2, %v976_v21  ;;  %v982_v21 = vadd.f32 %v3408_v13, %v3402_v18 }
 0x199   :  { %v994_v40 = vadd.f32 %v993_v59, %v953_v33 }
 0x19b   :  { %v1054_v15 = vpop.f32.mrf.mxu2 }
 0x19c   :  { %v1055_v17 = vadd.f32 %v1054_v15, %v1014_v63  ;;  %v1095_v1 = vpop.f32.mrf.mxu3 }
 0x19d   :  { %v1034_v9 = vpop.f32.mrf.mxu1 }
 0x19e   :  { %v3475_v39 = vadd.f32 %v1034_v9, %v994_v40  ;;  %v3479_v23 = vadd.f32 %v1095_v1, %v1055_v17  ;;  %v979_v9 = vadd.f32 %v3392_v55, %v3385_v30 }
 0x1a0   :  { %v3481_v12 = vpop.f32.mrf.mxu0  ;;  %v1020_v20 = vadd.f32 %v3397_v51, %v979_v9  ;;  %v985_v51 = vadd.f32 %v3425_v60, %v3419_v49 }
 0x1a3   :  { %v1057_v0 = vpop.f32.mrf.mxu2 }
 0x1a4   :  { %v1058_v33 = vadd.f32 %v1057_v0, %v1017_v38  ;;  %v1098_v46 = vpop.f32.mrf.mxu3  ;;  %v1023_v38 = vadd.f32 %v3414_v27, %v982_v21  ;;  %v988_v21 = vadd.f32 %v3441_v52, %v3435_v8 }
 0x1a5   :  { %v3484_v34 = vpop.f32.mrf.mxu1 }
 0x1a6   :  { %v3488_v19 = vadd.f32 %v1098_v46, %v1058_v33 }
 0x1a8   :  { %v3490_v15 = vpop.f32.mrf.mxu0 }
 0x1ab   :  { %v1060_v59 = vpop.f32.mrf.mxu2 }
 0x1ac   :  { %v1061_v40 = vadd.f32 %v1060_v59, %v1020_v20  ;;  %v1101_v63 = vpop.f32.mrf.mxu3 }
 0x1ad   :  { %v3493_v42 = vpop.f32.mrf.mxu1 }
 0x1ae   :  { %4321 = vst [vmem:[#allocation15_spill] sm:$0xff] %v3493_v42  ;;  %v1102_v2 = vadd.f32 %v1101_v63, %v1061_v40  ;;  %v1026_v42 = vadd.f32 %v3430_v4, %v985_v51 }
 0x1b0   :  { %v1142_v17 = vpop.f32.mrf.mxu0 }
 0x1b1   :  { %v1143_v1 = vadd.f32 %v1142_v17, %v1102_v2 }
 0x1b3   :  { %v1063_v55 = vpop.f32.mrf.mxu2 }
 0x1b4   :  { %v1064_v33 = vadd.f32 %v1063_v55, %v1023_v38  ;;  %v1104_v46 = vpop.f32.mrf.mxu3  ;;  %v1029_v38 = vadd.f32 %v3448_v36, %v988_v21 }
 0x1b5   :  { %v1183_v30 = vpop.f32.mrf.mxu1 }
 0x1b6   :  { %v3498_v0 = vadd.f32 %v1183_v30, %v1143_v1  ;;  %v1105_v9 = vadd.f32 %v1104_v46, %v1064_v33  ;;  %v991_v33 = vadd.f32 %v3460_v32, %v3454_v6 }
 0x1b8   :  { %v1145_v20 = vpop.f32.mrf.mxu0 }
 0x1b9   :  { %v1146_v59 = vadd.f32 %v1145_v20, %v1105_v9  ;;  %v1032_v9 = vadd.f32 %v3466_v41, %v991_v33  ;;  %v1137_v33 = vadd.f32 %v3481_v12, %v3479_v23  ;;  %v3537_v12 = vld [vmem:[#allocation6 + $0xd0] sm:$0xff] }
 0x1bb   :  { %v1066_v18 = vpop.f32.mrf.mxu2 }
 0x1bc   :  { %v1067_v63 = vadd.f32 %v1066_v18, %v1026_v42  ;;  %v1107_v27 = vpop.f32.mrf.mxu3 }
 0x1bd   :  { %v1186_v13 = vpop.f32.mrf.mxu1 }
 0x1be   :  { %v3503_v40 = vadd.f32 %v1186_v13, %v1146_v59  ;;  %v1108_v2 = vadd.f32 %v1107_v27, %v1067_v63 }
 0x1c0   :  { %v1148_v17 = vpop.f32.mrf.mxu0 }
 0x1c1   :  { %v1149_v1 = vadd.f32 %v1148_v17, %v1108_v2 }
 0x1c3   :  { %v1069_v49 = vpop.f32.mrf.mxu2 }
 0x1c4   :  { %v1070_v55 = vadd.f32 %v1069_v49, %v1029_v38  ;;  %v1110_v4 = vpop.f32.mrf.mxu3  ;;  %v4326_v38 = vld [vmem:[#allocation51_spill] sm:$0xff] }
 0x1c5   :  { %v1189_v60 = vpop.f32.mrf.mxu1 }
 0x1c6   :  { %v3508_v30 = vadd.f32 %v1189_v60, %v1149_v1  ;;  %v1111_v46 = vadd.f32 %v1110_v4, %v1070_v55  ;;  %v4327_v60 = vld [vmem:[#allocation54_spill] sm:$0xff] }
 0x1c7   :  { %v809_v49 = vadd.f32 %v4327_v60, %v4326_v38  ;;  %v4343_v38 = vld [vmem:[#allocation39_spill] sm:$0xff]  ;;  %v4344_v60 = vld [vmem:[#allocation49_spill] sm:$0xff] }
 0x1c8   :  { %4322 = vst [vmem:[#allocation17_spill] sm:$0xff] %v3508_v30  ;;  %v1151_v42 = vpop.f32.mrf.mxu0  ;;  %v4390_v30 = vld [vmem:[#allocation22_spill] sm:$0xff] }
 0x1c9   :  { %v1152_v51 = vadd.f32 %v1151_v42, %v1111_v46 }
 0x1cb   :  { %v1072_v8 = vpop.f32.mrf.mxu2 }
 0x1cc   :  { %v1073_v59 = vadd.f32 %v1072_v8, %v1032_v9  ;;  %v1113_v36 = vpop.f32.mrf.mxu3  ;;  %v1178_v9 = vadd.f32 %v3484_v34, %v1137_v33  ;;  %v3533_v8 = vld [vmem:[#allocation6 + $0xe0] sm:$0xff]  ;;  %v3547_v34 = vld [vmem:[#allocation6 + $0x1f0] sm:$0xff] }
 0x1cd   :  { %v1192_v52 = vpop.f32.mrf.mxu1  ;;  %v4348_v33 = vld [vmem:[#allocation45_spill] sm:$0xff] }
 0x1ce   :  { %v3513_v20 = vadd.f32 %v1192_v52, %v1152_v51  ;;  %v1114_v13 = vadd.f32 %v1113_v36, %v1073_v59  ;;  %v3528_v51 = vld [vmem:[#allocation6 + $0xf0] sm:$0xff]  ;;  %v3553_v36 = vld [vmem:[#allocation6 + $0x1e0] sm:$0xff] }
 0x1d0   :  { %4323 = vst [vmem:[#allocation63_spill] sm:$0xff] %v3513_v20  ;;  %v1154_v18 = vpop.f32.mrf.mxu0  ;;  %v3868_v20 = vld [vmem:[#allocation6 + $0x128] sm:$0xff] }
 0x1d1   :  { %v1155_v63 = vadd.f32 %v1154_v18, %v1114_v13  ;;  %v4332_v13 = vld [vmem:[#allocation62_spill] sm:$0xff] }
 0x1d2   :  { %v4333_v18 = vld [vmem:[#allocation38_spill] sm:$0xff] }
 0x1d3   :  { %v1075_v21 = vpop.f32.mrf.mxu2 }
 0x1d4   :  { %v1076_v6 = vadd.f32 %v1075_v21, %v3475_v39  ;;  %v1116_v32 = vpop.f32.mrf.mxu3  ;;  %v4338_v21 = vld [vmem:[#allocation66_spill] sm:$0xff] }
 0x1d5   :  { %v1195_v27 = vpop.f32.mrf.mxu1 }
 0x1d6   :  { %v3515_v2 = vadd.f32 %v1195_v27, %v1155_v63  ;;  %v3518_v17 = vadd.f32 %v1116_v32, %v1076_v6  ;;  %v4334_v63 = vld [vmem:[#allocation32_spill] sm:$0xff]  ;;  %v4336_v27 = vld [vmem:[#allocation41_spill] sm:$0xff] }
 0x1d7   :  { %v4339_v6 = vld [vmem:[#allocation44_spill] sm:$0xff]  ;;  %v4340_v32 = vld [vmem:[#allocation37_spill] sm:$0xff] }
 0x1d8   :  { %4324 = vst [vmem:[#allocation68_spill] sm:$0xff] %v3515_v2  ;;  %v3858_v2 = vld [vmem:[#allocation6 + $0x148] sm:$0xff] }
 0x1d9   :  { %4325 = vst [vmem:[#allocation67_spill] sm:$0xff] %v3518_v17 }
 0x1da   :  { %4385 = vst [vmem:[#allocation44_spill] sm:$0xff] %v3858_v2 }
 0x1db   :  { %v1300_v1 = vpop.f32.mrf.mxu2 }
 0x1dc   :  { %v1320_v41 = vpop.f32.mrf.mxu3 }
 0x1dd   :  { %v1321_v55 = vadd.f32 %v1320_v41, %v1300_v1  ;;  %v4341_v1 = vld [vmem:[#allocation70_spill] sm:$0xff]  ;;  %v4342_v41 = vld [vmem:[#allocation47_spill] sm:$0xff] }
 0x1de   :  { %4387 = vst [vmem:[#allocation70_spill] sm:$0xff] %v3868_v20 }
 0x1df   :  { %v1363_v4 = vadd.f32 %v1321_v55, %v809_v49  ;;  %v4345_v49 = vld [vmem:[#allocation42_spill] sm:$0xff]  ;;  %v4346_v55 = vld [vmem:[#allocation52_spill] sm:$0xff] }
 0x1e1   :  { %v3524_v46 = vmax.f32 %v1363_v4, 0.0  ;;  %v4347_v4 = vld [vmem:[#allocation85_spill] sm:$0xff] }
 0x1e3   :  { %4328 = vst [vmem:[#allocation72_spill] sm:$0xff] %v3524_v46  ;;  %1387 = vmatmul.f32.vlgmr.msrb.gmra.mxu0 %v3524_v46  ;;  %1427 = vmatmul.f32.vlgmr.msrb.gmra.mxu2 %v3524_v46  ;;  %v1340_v39 = vpop.f32.mrf.mxu2  ;;  %v3852_v46 = vld [vmem:[#allocation6 + $0x158] sm:$0xff] }
 0x1e4   :  { %v1360_v42 = vpop.f32.mrf.mxu3  ;;  %1547 = vmatpush.msrb.mxu0 %v3528_v51  ;;  %1587 = vmatpush.msrb.mxu2 %v3094_v47  ;;  %4384 = vst [vmem:[#allocation66_spill] sm:$0xff] %v3852_v46 }
 0x1e5   :  { %v1361_v52 = vadd.f32 %v1360_v42, %v1340_v39  ;;  %v4349_v39 = vld [vmem:[#allocation77_spill] sm:$0xff]  ;;  %v4350_v42 = vld [vmem:[#allocation55_spill] sm:$0xff] }
 0x1e6   :  { %1548 = vmatpush.msrb.mxu0 %v3533_v8  ;;  %1588 = vmatpush.msrb.mxu2 %v3105_v45 }
 0x1e7   :  { %v1364_v23 = vadd.f32 %v1361_v52, %v1178_v9  ;;  %v4351_v9 = vld [vmem:[#allocation48_spill] sm:$0xff]  ;;  %v4352_v52 = vld [vmem:[#allocation81_spill] sm:$0xff] }
 0x1e8   :  { %1549 = vmatpush.msrb.mxu0 %v3537_v12  ;;  %1589 = vmatpush.msrb.mxu2 %v3115_v56 }
 0x1e9   :  { %v3541_v59 = vmax.f32 %v1364_v23, 0.0  ;;  %v4353_v23 = vld [vmem:[#allocation50_spill] sm:$0xff] }
 0x1ea   :  { %1550 = vmatpush.msrb.mxu0 %v2955_v43  ;;  %1590 = vmatpush.msrb.mxu2 %v3126_v31  ;;  %v3559_v43 = vld [vmem:[#allocation6 + $0x1d0] sm:$0xff] }
 0x1eb   :  { %4329 = vst [vmem:[#allocation73_spill] sm:$0xff] %v3541_v59  ;;  %1407 = vmatmul.f32.vlgmr.msrb.gmra.mxu1 %v3541_v59  ;;  %1447 = vmatmul.f32.vlgmr.msrb.gmra.mxu3 %v3541_v59  ;;  %v3846_v59 = vld [vmem:[#allocation6 + $0x168] sm:$0xff] }
 0x1ec   :  { %1567 = vmatpush.msrb.mxu1 %v3547_v34  ;;  %1607 = vmatpush.msrb.mxu3 %v3096_v54 }
 0x1ed   :  { %1551 = vmatpush.msrb.mxu0 %v2967_v5  ;;  %1591 = vmatpush.msrb.mxu2 %v3134_v48  ;;  %v3565_v5 = vld [vmem:[#allocation6 + $0x1c0] sm:$0xff] }
 0x1ee   :  { %1568 = vmatpush.msrb.mxu1 %v3553_v36  ;;  %1608 = vmatpush.msrb.mxu3 %v3107_v44 }
 0x1ef   :  { %1552 = vmatpush.msrb.mxu0 %v2979_v16  ;;  %1592 = vmatpush.msrb.mxu2 %v3148_v24  ;;  %v4330_v16 = vld [vmem:[#allocation36_spill] sm:$0xff] }
 0x1f0   :  { %1569 = vmatpush.msrb.mxu1 %v3559_v43  ;;  %1609 = vmatpush.msrb.mxu3 %v3118_v3 }
 0x1f1   :  { %1553 = vmatpush.msrb.mxu0 %v2988_v62  ;;  %1593 = vmatpush.msrb.mxu2 %v4306_v10  ;;  %v4331_v62 = vld [vmem:[#allocation30_spill] sm:$0xff] }
 0x1f2   :  { %1570 = vmatpush.msrb.mxu1 %v3565_v5  ;;  %1610 = vmatpush.msrb.mxu3 %v3131_v11 }
 0x1f3   :  { %1554 = vmatpush.msrb.mxu0 %v3002_v25  ;;  %1594 = vmatpush.msrb.mxu2 %v3169_v29  ;;  %v4335_v25 = vld [vmem:[#allocation64_spill] sm:$0xff] }
 0x1f4   :  { %1571 = vmatpush.msrb.mxu1 %v2969_v14  ;;  %1611 = vmatpush.msrb.mxu3 %v3143_v57  ;;  %v4337_v14 = vld [vmem:[#allocation34_spill] sm:$0xff] }
 0x1f5   :  { %1555 = vmatpush.msrb.mxu0 %v4330_v16  ;;  %1595 = vmatpush.msrb.mxu2 %v4309_v50  ;;  %v4354_v16 = vld [vmem:[#allocation84_spill] sm:$0xff]  ;;  %4383 = vst [vmem:[#allocation34_spill] sm:$0xff] %v3846_v59 }
 0x1f6   :  { %1572 = vmatpush.msrb.mxu1 %v4331_v62  ;;  %1612 = vmatpush.msrb.mxu3 %v4332_v13  ;;  %v4355_v62 = vld [vmem:[#allocation53_spill] sm:$0xff] }
 0x1f7   :  { %1556 = vmatpush.msrb.mxu0 %v4333_v18  ;;  %1596 = vmatpush.msrb.mxu2 %v4311_v22  ;;  %v4356_v18 = vld [vmem:[#allocation86_spill] sm:$0xff] }
 0x1f8   :  { %1573 = vmatpush.msrb.mxu1 %v4334_v63  ;;  %1613 = vmatpush.msrb.mxu3 %v4335_v25  ;;  %v4357_v63 = vld [vmem:[#allocation56_spill] sm:$0xff] }
 0x1f9   :  { %1557 = vmatpush.msrb.mxu0 %v4336_v27  ;;  %1597 = vmatpush.msrb.mxu2 %v4313_v37  ;;  %v3611_v27 = vpop.f32.mrf.mxu0 }
 0x1fa   :  { %1574 = vmatpush.msrb.mxu1 %v4337_v14  ;;  %1614 = vmatpush.msrb.mxu3 %v4338_v21  ;;  %4358 = vst [vmem:[#allocation74_spill] sm:$0xff] %v3611_v27  ;;  %v3613_v14 = vpop.f32.mrf.mxu1 }
 0x1fb   :  { %1558 = vmatpush.msrb.mxu0 %v4339_v6  ;;  %1598 = vmatpush.msrb.mxu2 %v3213_v53  ;;  %4359 = vst [vmem:[#allocation75_spill] sm:$0xff] %v3613_v14 }
 0x1fc   :  { %1575 = vmatpush.msrb.mxu1 %v4340_v32  ;;  %1615 = vmatpush.msrb.mxu3 %v4341_v1 }
 0x1fd   :  { %1559 = vmatpush.msrb.mxu0 %v4342_v41  ;;  %1599 = vmatpush.msrb.mxu2 %v4316_v35  ;;  %v4360_v41 = vld [vmem:[#allocation58_spill] sm:$0xff] }
 0x1fe   :  { %1576 = vmatpush.msrb.mxu1 %v4343_v38  ;;  %1616 = vmatpush.msrb.mxu3 %v4312_v58  ;;  %v4361_v38 = vld [vmem:[#allocation59_spill] sm:$0xff] }
 0x1ff   :  { %1560 = vmatpush.msrb.mxu0 %v4344_v60  ;;  %1600 = vmatpush.msrb.mxu2 %v4317_v61  ;;  %v812_v60 = vadd.f32 %v4361_v38, %v4360_v41  ;;  %v4377_v38 = vld [vmem:[#allocation60_spill] sm:$0xff] }
 0x200   :  { %1577 = vmatpush.msrb.mxu1 %v4345_v49  ;;  %1617 = vmatpush.msrb.mxu3 %v4314_v28 }
 0x201   :  { %1561 = vmatpush.msrb.mxu0 %v4346_v55  ;;  %1601 = vmatpush.msrb.mxu2 %v4347_v4  ;;  %v1140_v55 = vadd.f32 %v3490_v15, %v3488_v19  ;;  %v3634_v15 = vld [vmem:[#allocation6 + $0xc0] sm:$0xff] }
 0x202   :  { %1578 = vmatpush.msrb.mxu1 %v4348_v33  ;;  %1618 = vmatpush.msrb.mxu3 %v4349_v39 }
 0x203   :  { %1562 = vmatpush.msrb.mxu0 %v4350_v42  ;;  %1602 = vmatpush.msrb.mxu2 %v3257_v26 }
 0x204   :  { %1579 = vmatpush.msrb.mxu1 %v4351_v9  ;;  %1619 = vmatpush.msrb.mxu3 %v4352_v52 }
 0x206   :  { %1580 = vmatpush.msrb.mxu1 %v4353_v23  ;;  %1620 = vmatpush.msrb.mxu3 %v4354_v16 }
 0x208   :  { %1581 = vmatpush.msrb.mxu1 %v4355_v62  ;;  %1621 = vmatpush.msrb.mxu3 %v4356_v18  ;;  %v4363_v62 = vld [vmem:[#allocation15_spill] sm:$0xff] }
 0x20a   :  { %1582 = vmatpush.msrb.mxu1 %v4357_v63  ;;  %1622 = vmatpush.msrb.mxu3 %v3261_v7  ;;  %v1181_v63 = vadd.f32 %v4363_v62, %v1140_v55 }
 0x260   :  { %v1388_v6 = vpop.f32.mrf.mxu0 }
 0x266   :  { %v1428_v9 = vpop.f32.mrf.mxu2 }
 0x268   :  { %v1408_v32 = vpop.f32.mrf.mxu1 }
 0x269   :  { %v1409_v49 = vadd.f32 %v1408_v32, %v1388_v6  ;;  %v4376_v32 = vld [vmem:[#allocation20_spill] sm:$0xff] }
 0x26b   :  { %v1451_v33 = vadd.f32 %v1409_v49, %v812_v60 }
 0x26d   :  { %v3619_v42 = vmax.f32 %v1451_v33, 0.0 }
 0x26e   :  { %v1448_v23 = vpop.f32.mrf.mxu3 }
 0x26f   :  { %4362 = vst [vmem:[#allocation79_spill] sm:$0xff] %v3619_v42  ;;  %v1449_v17 = vadd.f32 %v1448_v23, %v1428_v9  ;;  %1475 = vmatmul.f32.vlgmr.msra.gmra.mxu0 %v3619_v42  ;;  %1515 = vmatmul.f32.vlgmr.msra.gmra.mxu2 %v3619_v42  ;;  %v4379_v9 = vld [vmem:[#allocation65_spill] sm:$0xff] }
 0x270   :  { %1635 = vmatpush.msra.mxu0 %v3528_v51  ;;  %1675 = vmatpush.msra.mxu2 %v3094_v47  ;;  %v3640_v47 = vld [vmem:[#allocation6 + $0xb0] sm:$0xff]  ;;  %v3843_v42 = vld [vmem:[#allocation6 + $0x38] sm:$0xff] }
 0x271   :  { %v1452_v6 = vadd.f32 %v1449_v17, %v1181_v63  ;;  %v3709_v17 = vld [vmem:[#allocation6 + $0x150] sm:$0xff]  ;;  %4382 = vst [vmem:[#allocation41_spill] sm:$0xff] %v3843_v42 }
 0x272   :  { %1636 = vmatpush.msra.mxu0 %v3533_v8  ;;  %1676 = vmatpush.msra.mxu2 %v3105_v45  ;;  %v3646_v45 = vld [vmem:[#allocation6 + $0xa0] sm:$0xff]  ;;  %4366 = vst [vmem:[#allocation88_spill] sm:$0xff] %v3709_v17 }
 0x273   :  { %v3628_v19 = vmax.f32 %v1452_v6, 0.0 }
 0x274   :  { %1637 = vmatpush.msra.mxu0 %v3537_v12  ;;  %1677 = vmatpush.msra.mxu2 %v3115_v56  ;;  %v3661_v56 = vld [vmem:[#allocation6 + $0x1b0] sm:$0xff] }
 0x275   :  { %4364 = vst [vmem:[#allocation78_spill] sm:$0xff] %v3628_v19  ;;  %1495 = vmatmul.f32.vlgmr.msra.gmra.mxu1 %v3628_v19  ;;  %1535 = vmatmul.f32.vlgmr.msra.gmra.mxu3 %v3628_v19  ;;  %v3838_v19 = vld [vmem:[#allocation6 + $0x178] sm:$0xff] }
 0x276   :  { %1638 = vmatpush.msra.mxu0 %v3634_v15  ;;  %1655 = vmatpush.msra.mxu1 %v3547_v34 }
 0x277   :  { %1678 = vmatpush.msra.mxu2 %v3126_v31  ;;  %1695 = vmatpush.msra.mxu3 %v3096_v54  ;;  %v3652_v54 = vld [vmem:[#allocation6 + $0x90] sm:$0xff]  ;;  %v3674_v31 = vld [vmem:[#allocation6 + $0x60] sm:$0xff] }
 0x278   :  { %1639 = vmatpush.msra.mxu0 %v3640_v47  ;;  %1656 = vmatpush.msra.mxu1 %v3553_v36 }
 0x279   :  { %1679 = vmatpush.msra.mxu2 %v3134_v48  ;;  %1696 = vmatpush.msra.mxu3 %v3107_v44  ;;  %v3658_v44 = vld [vmem:[#allocation6 + $0x80] sm:$0xff] }
 0x27a   :  { %1640 = vmatpush.msra.mxu0 %v3646_v45  ;;  %1657 = vmatpush.msra.mxu1 %v3559_v43  ;;  %v3685_v48 = vld [vmem:[#allocation6 + $0x180] sm:$0xff] }
 0x27b   :  { %1680 = vmatpush.msra.mxu2 %v3148_v24  ;;  %1697 = vmatpush.msra.mxu3 %v3118_v3  ;;  %v3666_v24 = vld [vmem:[#allocation6 + $0x70] sm:$0xff]  ;;  %v3669_v3 = vld [vmem:[#allocation6 + $0x1a0] sm:$0xff] }
 0x27c   :  { %1641 = vmatpush.msra.mxu0 %v3652_v54  ;;  %1658 = vmatpush.msra.mxu1 %v3565_v5 }
 0x27d   :  { %1681 = vmatpush.msra.mxu2 %v4306_v10  ;;  %1698 = vmatpush.msra.mxu3 %v3131_v11  ;;  %v3677_v11 = vld [vmem:[#allocation6 + $0x190] sm:$0xff]  ;;  %v3701_v10 = vld [vmem:[#allocation6 + $0x160] sm:$0xff] }
 0x27e   :  { %1642 = vmatpush.msra.mxu0 %v3658_v44  ;;  %1659 = vmatpush.msra.mxu1 %v3661_v56 }
 0x27f   :  { %1682 = vmatpush.msra.mxu2 %v3169_v29  ;;  %1699 = vmatpush.msra.mxu3 %v3143_v57  ;;  %v3682_v57 = vld [vmem:[#allocation6 + $0x50] sm:$0xff]  ;;  %v3690_v29 = vld [vmem:[#allocation6 + $0x40] sm:$0xff] }
 0x280   :  { %1643 = vmatpush.msra.mxu0 %v3666_v24  ;;  %1660 = vmatpush.msra.mxu1 %v3669_v3 }
 0x281   :  { %1683 = vmatpush.msra.mxu2 %v4309_v50  ;;  %1700 = vmatpush.msra.mxu3 %v4332_v13  ;;  %v3693_v50 = vld [vmem:[#allocation6 + $0x170] sm:$0xff]  ;;  %v3717_v13 = vld [vmem:[#allocation6 + $0x140] sm:$0xff] }
 0x282   :  { %1644 = vmatpush.msra.mxu0 %v3674_v31  ;;  %1661 = vmatpush.msra.mxu1 %v3677_v11  ;;  %4368 = vst [vmem:[#allocation51_spill] sm:$0xff] %v3717_v13 }
 0x283   :  { %1684 = vmatpush.msra.mxu2 %v4311_v22  ;;  %1701 = vmatpush.msra.mxu3 %v4335_v25  ;;  %v3698_v22 = vld [vmem:[#allocation6 + $0x30] sm:$0xff] }
 0x284   :  { %1645 = vmatpush.msra.mxu0 %v3682_v57  ;;  %1662 = vmatpush.msra.mxu1 %v3685_v48  ;;  %v3734_v25 = vld [vmem:[#allocation6 + $0x110] sm:$0xff] }
 0x285   :  { %1685 = vmatpush.msra.mxu2 %v4313_v37  ;;  %1702 = vmatpush.msra.mxu3 %v4338_v21  ;;  %v3706_v37 = vld [vmem:[#allocation6 + $0x20] sm:$0xff]  ;;  %4372 = vst [vmem:[#allocation62_spill] sm:$0xff] %v3734_v25 }
 0x286   :  { %1646 = vmatpush.msra.mxu0 %v3690_v29  ;;  %1663 = vmatpush.msra.mxu1 %v3693_v50  ;;  %4365 = vst [vmem:[#allocation83_spill] sm:$0xff] %v3706_v37  ;;  %v3738_v21 = vld [vmem:[#allocation6 + $0x100] sm:$0xff] }
 0x287   :  { %1686 = vmatpush.msra.mxu2 %v3213_v53  ;;  %1703 = vmatpush.msra.mxu3 %v4341_v1  ;;  %v3714_v53 = vld [vmem:[#allocation6 + $0x10] sm:$0xff]  ;;  %4373 = vst [vmem:[#allocation38_spill] sm:$0xff] %v3738_v21  ;;  %v4374_v1 = vld [vmem:[#allocation18_spill] sm:$0xff] }
 0x288   :  { %1647 = vmatpush.msra.mxu0 %v3698_v22  ;;  %1664 = vmatpush.msra.mxu1 %v3701_v10  ;;  %4367 = vst [vmem:[#allocation57_spill] sm:$0xff] %v3714_v53 }
 0x289   :  { %1687 = vmatpush.msra.mxu2 %v4316_v35  ;;  %1704 = vmatpush.msra.mxu3 %v4312_v58  ;;  %v3722_v58 = vld [vmem:[#allocation6] sm:$0xff]  ;;  %v3725_v35 = vld [vmem:[#allocation6 + $0x130] sm:$0xff] }
 0x28a   :  { %1648 = vmatpush.msra.mxu0 %v3706_v37  ;;  %1665 = vmatpush.msra.mxu1 %v3709_v17  ;;  %4369 = vst [vmem:[#allocation54_spill] sm:$0xff] %v3722_v58 }
 0x28b   :  { %1688 = vmatpush.msra.mxu2 %v4317_v61  ;;  %1705 = vmatpush.msra.mxu3 %v4314_v28  ;;  %4370 = vst [vmem:[#allocation36_spill] sm:$0xff] %v3725_v35  ;;  %v3730_v28 = vld [vmem:[#allocation6 + $0x120] sm:$0xff] }
 0x28c   :  { %1649 = vmatpush.msra.mxu0 %v3714_v53  ;;  %1666 = vmatpush.msra.mxu1 %v3717_v13  ;;  %4371 = vst [vmem:[#allocation30_spill] sm:$0xff] %v3730_v28 }
 0x28d   :  { %1689 = vmatpush.msra.mxu2 %v4347_v4  ;;  %1706 = vmatpush.msra.mxu3 %v4349_v39  ;;  %v4375_v39 = vld [vmem:[#allocation19_spill] sm:$0xff] }
 0x28e   :  { %1650 = vmatpush.msra.mxu0 %v3722_v58  ;;  %1667 = vmatpush.msra.mxu1 %v3725_v35 }
 0x28f   :  { %1690 = vmatpush.msra.mxu2 %v3257_v26  ;;  %1707 = vmatpush.msra.mxu3 %v4352_v52  ;;  %v651_v52 = vadd.f32 %v4375_v39, %v4374_v1  ;;  %v3753_v1 = vld [vmem:[#allocation6 + $0xf8] sm:$0xff] }
 0x290   :  { %1668 = vmatpush.msra.mxu1 %v3730_v28 }
 0x291   :  { %1708 = vmatpush.msra.mxu3 %v4354_v16  ;;  %v692_v41 = vadd.f32 %v4376_v32, %v651_v52  ;;  %v4378_v16 = vld [vmem:[#allocation61_spill] sm:$0xff]  ;;  %v3758_v52 = vld [vmem:[#allocation6 + $0xe8] sm:$0xff] }
 0x292   :  { %1669 = vmatpush.msra.mxu1 %v3734_v25 }
 0x293   :  { %1709 = vmatpush.msra.mxu3 %v4356_v18  ;;  %v733_v60 = vadd.f32 %v4377_v38, %v692_v41  ;;  %v3779_v41 = vld [vmem:[#allocation6 + $0xb8] sm:$0xff]  ;;  %v3782_v38 = vld [vmem:[#allocation6 + $0x1e8] sm:$0xff] }
 0x294   :  { %1670 = vmatpush.msra.mxu1 %v3738_v21 }
 0x295   :  { %1710 = vmatpush.msra.mxu3 %v3261_v7  ;;  %v774_v49 = vadd.f32 %v4378_v16, %v733_v60  ;;  %v3787_v60 = vld [vmem:[#allocation6 + $0xa8] sm:$0xff]  ;;  %v3790_v16 = vld [vmem:[#allocation6 + $0x1d8] sm:$0xff] }
 0x297   :  { %v815_v23 = vadd.f32 %v4379_v9, %v774_v49  ;;  %v3795_v49 = vld [vmem:[#allocation6 + $0x98] sm:$0xff] }
 0x298   :  { %v3806_v9 = vld [vmem:[#allocation6 + $0x1b8] sm:$0xff] }
 0x2ec   :  { %v1476_v55 = vpop.f32.mrf.mxu0 }
 0x2f2   :  { %v1496_v33 = vpop.f32.mrf.mxu1  ;;  %v1516_v6 = vpop.f32.mrf.mxu2 }
 0x2f3   :  { %v1497_v18 = vadd.f32 %v1496_v33, %v1476_v55  ;;  %v3798_v55 = vld [vmem:[#allocation6 + $0x1c8] sm:$0xff] }
 0x2f4   :  { %v3803_v33 = vld [vmem:[#allocation6 + $0x88] sm:$0xff] }
 0x2f5   :  { %v1539_v62 = vadd.f32 %v1497_v18, %v815_v23  ;;  %v3811_v23 = vld [vmem:[#allocation6 + $0x78] sm:$0xff]  ;;  %v3814_v18 = vld [vmem:[#allocation6 + $0x1a8] sm:$0xff] }
 0x2f7   :  { %v3748_v63 = vmax.f32 %v1539_v62, 0.0  ;;  %v3819_v62 = vld [vmem:[#allocation6 + $0x68] sm:$0xff] }
 0x2f8   :  { %v1536_v14 = vpop.f32.mrf.mxu3 }
 0x2f9   :  { %4380 = vst [vmem:[#allocation32_spill] sm:$0xff] %v3748_v63  ;;  %v1537_v27 = vadd.f32 %v1536_v14, %v1516_v6  ;;  %1563 = vmatmul.f32.vlgmr.msrb.gmra.mxu0 %v3748_v63  ;;  %1603 = vmatmul.f32.vlgmr.msrb.gmra.mxu2 %v3748_v63  ;;  %v3764_v14 = vld [vmem:[#allocation6 + $0xd8] sm:$0xff]  ;;  %v3835_v63 = vld [vmem:[#allocation6 + $0x48] sm:$0xff] }
 0x2fa   :  { %1723 = vmatpush.msrb.mxu0 %v3528_v51  ;;  %1763 = vmatpush.msrb.mxu2 %v3753_v1  ;;  %v3822_v6 = vld [vmem:[#allocation6 + $0x198] sm:$0xff] }
 0x2fb   :  { %v1540_v39 = vadd.f32 %v1537_v27, %v3498_v0  ;;  %v3771_v0 = vld [vmem:[#allocation6 + $0xc8] sm:$0xff]  ;;  %v3774_v27 = vld [vmem:[#allocation6 + $0x1f8] sm:$0xff] }
 0x2fc   :  { %1724 = vmatpush.msrb.mxu0 %v3533_v8  ;;  %1764 = vmatpush.msrb.mxu2 %v3758_v52 }
 0x2fd   :  { %v3761_v32 = vmax.f32 %v1540_v39, 0.0  ;;  %v3827_v39 = vld [vmem:[#allocation6 + $0x58] sm:$0xff] }
 0x2fe   :  { %1725 = vmatpush.msrb.mxu0 %v3537_v12  ;;  %1765 = vmatpush.msrb.mxu2 %v3764_v14 }
 0x2ff   :  { %4381 = vst [vmem:[#allocation64_spill] sm:$0xff] %v3761_v32  ;;  %1583 = vmatmul.f32.vlgmr.msrb.gmra.mxu1 %v3761_v32  ;;  %1623 = vmatmul.f32.vlgmr.msrb.gmra.mxu3 %v3761_v32  ;;  %v3830_v32 = vld [vmem:[#allocation6 + $0x188] sm:$0xff] }
 0x300   :  { %1726 = vmatpush.msrb.mxu0 %v3634_v15  ;;  %1743 = vmatpush.msrb.mxu1 %v3547_v34 }
 0x301   :  { %1766 = vmatpush.msrb.mxu2 %v3771_v0  ;;  %1783 = vmatpush.msrb.mxu3 %v3774_v27 }
 0x302   :  { %1727 = vmatpush.msrb.mxu0 %v3640_v47  ;;  %1744 = vmatpush.msrb.mxu1 %v3553_v36 }
 0x303   :  { %1767 = vmatpush.msrb.mxu2 %v3779_v41  ;;  %1784 = vmatpush.msrb.mxu3 %v3782_v38 }
 0x304   :  { %1728 = vmatpush.msrb.mxu0 %v3646_v45  ;;  %1745 = vmatpush.msrb.mxu1 %v3559_v43 }
 0x305   :  { %1768 = vmatpush.msrb.mxu2 %v3787_v60  ;;  %1785 = vmatpush.msrb.mxu3 %v3790_v16 }
 0x306   :  { %1729 = vmatpush.msrb.mxu0 %v3652_v54  ;;  %1746 = vmatpush.msrb.mxu1 %v3565_v5 }
 0x307   :  { %1769 = vmatpush.msrb.mxu2 %v3795_v49  ;;  %1786 = vmatpush.msrb.mxu3 %v3798_v55 }
 0x308   :  { %1730 = vmatpush.msrb.mxu0 %v3658_v44  ;;  %1747 = vmatpush.msrb.mxu1 %v3661_v56 }
 0x309   :  { %1770 = vmatpush.msrb.mxu2 %v3803_v33  ;;  %1787 = vmatpush.msrb.mxu3 %v3806_v9 }
 0x30a   :  { %1731 = vmatpush.msrb.mxu0 %v3666_v24  ;;  %1748 = vmatpush.msrb.mxu1 %v3669_v3 }
 0x30b   :  { %1771 = vmatpush.msrb.mxu2 %v3811_v23  ;;  %1788 = vmatpush.msrb.mxu3 %v3814_v18 }
 0x30c   :  { %1732 = vmatpush.msrb.mxu0 %v3674_v31  ;;  %1749 = vmatpush.msrb.mxu1 %v3677_v11 }
 0x30d   :  { %1772 = vmatpush.msrb.mxu2 %v3819_v62  ;;  %1789 = vmatpush.msrb.mxu3 %v3822_v6 }
 0x30e   :  { %1733 = vmatpush.msrb.mxu0 %v3682_v57  ;;  %1750 = vmatpush.msrb.mxu1 %v3685_v48 }
 0x30f   :  { %1773 = vmatpush.msrb.mxu2 %v3827_v39  ;;  %1790 = vmatpush.msrb.mxu3 %v3830_v32 }
 0x310   :  { %1734 = vmatpush.msrb.mxu0 %v3690_v29  ;;  %1751 = vmatpush.msrb.mxu1 %v3693_v50 }
 0x311   :  { %1774 = vmatpush.msrb.mxu2 %v3835_v63  ;;  %1791 = vmatpush.msrb.mxu3 %v3838_v19 }
 0x312   :  { %1735 = vmatpush.msrb.mxu0 %v3698_v22  ;;  %1752 = vmatpush.msrb.mxu1 %v3701_v10 }
 0x313   :  { %1775 = vmatpush.msrb.mxu2 %v3843_v42  ;;  %1792 = vmatpush.msrb.mxu3 %v3846_v59 }
 0x314   :  { %1736 = vmatpush.msrb.mxu0 %v3706_v37  ;;  %1753 = vmatpush.msrb.mxu1 %v3709_v17 }
 0x315   :  { %1776 = vmatpush.msrb.mxu2 %v4317_v61  ;;  %1793 = vmatpush.msrb.mxu3 %v3852_v46  ;;  %v3864_v61 = vld [vmem:[#allocation6 + $0x138] sm:$0xff] }
 0x316   :  { %1737 = vmatpush.msrb.mxu0 %v3714_v53  ;;  %1754 = vmatpush.msrb.mxu1 %v3717_v13  ;;  %4386 = vst [vmem:[#allocation37_spill] sm:$0xff] %v3864_v61  ;;  %v4393_v13 = vld [vmem:[#allocation71_spill] sm:$0xff] }
 0x317   :  { %1777 = vmatpush.msrb.mxu2 %v4347_v4  ;;  %1794 = vmatpush.msrb.mxu3 %v3858_v2  ;;  %v3872_v4 = vld [vmem:[#allocation6 + $0x118] sm:$0xff] }
 0x318   :  { %1738 = vmatpush.msrb.mxu0 %v3722_v58  ;;  %1755 = vmatpush.msrb.mxu1 %v3725_v35  ;;  %4388 = vst [vmem:[#allocation47_spill] sm:$0xff] %v3872_v4 }
 0x319   :  { %1778 = vmatpush.msrb.mxu2 %v3257_v26  ;;  %1795 = vmatpush.msrb.mxu3 %v3864_v61  ;;  %v4389_v26 = vld [vmem:[#allocation21_spill] sm:$0xff]  ;;  %v4391_v61 = vld [vmem:[#allocation23_spill] sm:$0xff] }
 0x31a   :  { %1756 = vmatpush.msrb.mxu1 %v3730_v28  ;;  %v654_v35 = vadd.f32 %v4390_v30, %v4389_v26  ;;  %v4392_v28 = vld [vmem:[#allocation69_spill] sm:$0xff]  ;;  %v4412_v26 = vld [vmem:[#allocation70_spill] sm:$0xff] }
 0x31b   :  { %1796 = vmatpush.msrb.mxu3 %v3868_v20 }
 0x31c   :  { %1757 = vmatpush.msrb.mxu1 %v3734_v25  ;;  %v695_v58 = vadd.f32 %v4391_v61, %v654_v35  ;;  %v4394_v25 = vld [vmem:[#allocation76_spill] sm:$0xff]  ;;  %v4407_v35 = vld [vmem:[#allocation54_spill] sm:$0xff] }
 0x31d   :  { %1797 = vmatpush.msrb.mxu3 %v3872_v4  ;;  %v4411_v61 = vld [vmem:[#allocation30_spill] sm:$0xff] }
 0x31e   :  { %1758 = vmatpush.msrb.mxu1 %v3738_v21  ;;  %v736_v2 = vadd.f32 %v4392_v28, %v695_v58  ;;  %v4406_v58 = vld [vmem:[#allocation44_spill] sm:$0xff] }
 0x31f   :  { %1798 = vmatpush.msrb.mxu3 %v3261_v7  ;;  %v4408_v28 = vld [vmem:[#allocation36_spill] sm:$0xff] }
 0x320   :  { %v777_v53 = vadd.f32 %v4393_v13, %v736_v2  ;;  %v4398_v2 = vld [vmem:[#allocation34_spill] sm:$0xff] }
 0x321   :  { %v3946_v13 = vld [vmem:[#allocation6 + $0x18] sm:$0xff] }
 0x322   :  { %v818_v17 = vadd.f32 %v4394_v25, %v777_v53  ;;  %v4404_v53 = vld [vmem:[#allocation51_spill] sm:$0xff]  ;;  %4405 = vst [vmem:[#allocation52_spill] sm:$0xff] %v3946_v13 }
 0x323   :  { %v3952_v25 = vld [vmem:[#allocation6 + $0x8] sm:$0xff] }
 0x324   :  { %4409 = vst [vmem:[#allocation85_spill] sm:$0xff] %v3952_v25 }
 0x376   :  { %v1564_v20 = vpop.f32.mrf.mxu0 }
 0x37c   :  { %v1584_v46 = vpop.f32.mrf.mxu1  ;;  %v1604_v21 = vpop.f32.mrf.mxu2 }
 0x37d   :  { %v1585_v37 = vadd.f32 %v1584_v46, %v1564_v20  ;;  %v4399_v46 = vld [vmem:[#allocation83_spill] sm:$0xff] }
 0x37f   :  { %v1627_v59 = vadd.f32 %v1585_v37, %v818_v17  ;;  %v4402_v37 = vld [vmem:[#allocation66_spill] sm:$0xff]  ;;  %v4403_v17 = vld [vmem:[#allocation57_spill] sm:$0xff] }
 0x381   :  { %v3883_v4 = vmax.f32 %v1627_v59, 0.0  ;;  %v4400_v59 = vld [vmem:[#allocation88_spill] sm:$0xff] }
 0x382   :  { %v1624_v42 = vpop.f32.mrf.mxu3 }
 0x383   :  { %4395 = vst [vmem:[#allocation39_spill] sm:$0xff] %v3883_v4  ;;  %v1625_v7 = vadd.f32 %v1624_v42, %v1604_v21  ;;  %1651 = vmatmul.f32.vlgmr.msra.gmra.mxu0 %v3883_v4  ;;  %1691 = vmatmul.f32.vlgmr.msra.gmra.mxu2 %v3883_v4  ;;  %v3940_v42 = vld [vmem:[#allocation6 + $0x28] sm:$0xff]  ;;  %v4410_v21 = vld [vmem:[#allocation37_spill] sm:$0xff] }
 0x384   :  { %1811 = vmatpush.msra.mxu0 %v3528_v51  ;;  %1851 = vmatpush.msra.mxu2 %v3753_v1  ;;  %4401 = vst [vmem:[#allocation42_spill] sm:$0xff] %v3940_v42  ;;  %v3961_v4 = vld [vmem:[#allocation6 + $0x108] sm:$0xff] }
 0x385   :  { %v1628_v30 = vadd.f32 %v1625_v7, %v3503_v40  ;;  %v4397_v40 = vld [vmem:[#allocation41_spill] sm:$0xff]  ;;  %v4413_v7 = vld [vmem:[#allocation62_spill] sm:$0xff]  ;;  %4416 = vst [vmem:[#allocation45_spill] sm:$0xff] %v3961_v4 }
 0x386   :  { %1812 = vmatpush.msra.mxu0 %v3533_v8  ;;  %1852 = vmatpush.msra.mxu2 %v3758_v52 }
 0x387   :  { %v3892_v20 = vmax.f32 %v1628_v30, 0.0  ;;  %v4414_v30 = vld [vmem:[#allocation47_spill] sm:$0xff] }
 0x388   :  { %1813 = vmatpush.msra.mxu0 %v3537_v12  ;;  %1853 = vmatpush.msra.mxu2 %v3764_v14 }
 0x389   :  { %4396 = vst [vmem:[#allocation49_spill] sm:$0xff] %v3892_v20  ;;  %1671 = vmatmul.f32.vlgmr.msra.gmra.mxu1 %v3892_v20  ;;  %1711 = vmatmul.f32.vlgmr.msra.gmra.mxu3 %v3892_v20  ;;  %v4415_v20 = vld [vmem:[#allocation38_spill] sm:$0xff] }
 0x38a   :  { %1814 = vmatpush.msra.mxu0 %v3634_v15  ;;  %1831 = vmatpush.msra.mxu1 %v3547_v34 }
 0x38b   :  { %1854 = vmatpush.msra.mxu2 %v3771_v0  ;;  %1871 = vmatpush.msra.mxu3 %v3774_v27 }
 0x38c   :  { %1815 = vmatpush.msra.mxu0 %v3640_v47  ;;  %1832 = vmatpush.msra.mxu1 %v3553_v36 }
 0x38d   :  { %1855 = vmatpush.msra.mxu2 %v3779_v41  ;;  %1872 = vmatpush.msra.mxu3 %v3782_v38 }
 0x38e   :  { %1816 = vmatpush.msra.mxu0 %v3646_v45  ;;  %1833 = vmatpush.msra.mxu1 %v3559_v43 }
 0x38f   :  { %1856 = vmatpush.msra.mxu2 %v3787_v60  ;;  %1873 = vmatpush.msra.mxu3 %v3790_v16 }
 0x390   :  { %1817 = vmatpush.msra.mxu0 %v3652_v54  ;;  %1834 = vmatpush.msra.mxu1 %v3565_v5 }
 0x391   :  { %1857 = vmatpush.msra.mxu2 %v3795_v49  ;;  %1874 = vmatpush.msra.mxu3 %v3798_v55 }
 0x392   :  { %1818 = vmatpush.msra.mxu0 %v3658_v44  ;;  %1835 = vmatpush.msra.mxu1 %v3661_v56 }
 0x393   :  { %1858 = vmatpush.msra.mxu2 %v3803_v33  ;;  %1875 = vmatpush.msra.mxu3 %v3806_v9 }
 0x394   :  { %1819 = vmatpush.msra.mxu0 %v3666_v24  ;;  %1836 = vmatpush.msra.mxu1 %v3669_v3 }
 0x395   :  { %1859 = vmatpush.msra.mxu2 %v3811_v23  ;;  %1876 = vmatpush.msra.mxu3 %v3814_v18 }
 0x396   :  { %1820 = vmatpush.msra.mxu0 %v3674_v31  ;;  %1837 = vmatpush.msra.mxu1 %v3677_v11 }
 0x397   :  { %1860 = vmatpush.msra.mxu2 %v3819_v62  ;;  %1877 = vmatpush.msra.mxu3 %v3822_v6 }
 0x398   :  { %1821 = vmatpush.msra.mxu0 %v3682_v57  ;;  %1838 = vmatpush.msra.mxu1 %v3685_v48 }
 0x399   :  { %1861 = vmatpush.msra.mxu2 %v3827_v39  ;;  %1878 = vmatpush.msra.mxu3 %v3830_v32 }
 0x39a   :  { %1822 = vmatpush.msra.mxu0 %v3690_v29  ;;  %1839 = vmatpush.msra.mxu1 %v3693_v50 }
 0x39b   :  { %1862 = vmatpush.msra.mxu2 %v3835_v63  ;;  %1879 = vmatpush.msra.mxu3 %v3838_v19 }
 0x39c   :  { %1823 = vmatpush.msra.mxu0 %v3698_v22  ;;  %1840 = vmatpush.msra.mxu1 %v3701_v10 }
 0x39d   :  { %1863 = vmatpush.msra.mxu2 %v4397_v40  ;;  %1880 = vmatpush.msra.mxu3 %v4398_v2 }
 0x39e   :  { %1824 = vmatpush.msra.mxu0 %v4399_v46  ;;  %1841 = vmatpush.msra.mxu1 %v4400_v59 }
 0x39f   :  { %1864 = vmatpush.msra.mxu2 %v3940_v42  ;;  %1881 = vmatpush.msra.mxu3 %v4402_v37 }
 0x3a0   :  { %1825 = vmatpush.msra.mxu0 %v4403_v17  ;;  %1842 = vmatpush.msra.mxu1 %v4404_v53 }
 0x3a1   :  { %1865 = vmatpush.msra.mxu2 %v3946_v13  ;;  %1882 = vmatpush.msra.mxu3 %v4406_v58 }
 0x3a2   :  { %1826 = vmatpush.msra.mxu0 %v4407_v35  ;;  %1843 = vmatpush.msra.mxu1 %v4408_v28  ;;  %v4417_v28 = vld [vmem:[#allocation24_spill] sm:$0xff]  ;;  %v4418_v35 = vld [vmem:[#allocation25_spill] sm:$0xff] }
 0x3a3   :  { %1866 = vmatpush.msra.mxu2 %v3952_v25  ;;  %1883 = vmatpush.msra.mxu3 %v4410_v21  ;;  %v657_v58 = vadd.f32 %v4418_v35, %v4417_v28  ;;  %v4419_v25 = vld [vmem:[#allocation26_spill] sm:$0xff]  ;;  %v4420_v21 = vld [vmem:[#allocation80_spill] sm:$0xff] }
 0x3a4   :  { %1844 = vmatpush.msra.mxu1 %v4411_v61  ;;  %v4421_v61 = vld [vmem:[#allocation82_spill] sm:$0xff] }
 0x3a5   :  { %1884 = vmatpush.msra.mxu3 %v4412_v26  ;;  %v698_v13 = vadd.f32 %v4419_v25, %v657_v58  ;;  %v2029_v58 = vld [vmem:[#allocation9 + $0xe0] sm:$0xff]  ;;  %v2028_v28 = vld [vmem:[#allocation9 + $0xd8] sm:$0xff] }
 0x3a6   :  { %1845 = vmatpush.msra.mxu1 %v4413_v7  ;;  %v4422_v7 = vld [vmem:[#allocation87_spill] sm:$0xff]  ;;  %v2008_v25 = vld [vmem:[#allocation9 + $0x38] sm:$0xff] }
 0x3a7   :  { %1885 = vmatpush.msra.mxu3 %v4414_v30  ;;  %v739_v53 = vadd.f32 %v4420_v21, %v698_v13  ;;  %v2009_v35 = vld [vmem:[#allocation9 + $0x40] sm:$0xff]  ;;  %v2027_v21 = vld [vmem:[#allocation9 + $0xd0] sm:$0xff] }
 0x3a8   :  { %1846 = vmatpush.msra.mxu1 %v4415_v20 }
 0x3a9   :  { %1886 = vmatpush.msra.mxu3 %v3961_v4  ;;  %v780_v17 = vadd.f32 %v4421_v61, %v739_v53  ;;  %v4423_v53 = vld [vmem:[#allocation17_spill] sm:$0xff] }
 0x3aa   :  { %v2007_v61 = vld [vmem:[#allocation9 + $0x30] sm:$0xff] }
 0x3ab   :  { %v821_v42 = vadd.f32 %v4422_v7, %v780_v17  ;;  %v2010_v17 = vld [vmem:[#allocation9 + $0x48] sm:$0xff] }
 0x3ac   :  { %v2006_v7 = vld [vmem:[#allocation9 + $0x28] sm:$0xff] }
 0x400   :  { %v1652_v26 = vpop.f32.mrf.mxu0 }
 0x406   :  { %v1672_v37 = vpop.f32.mrf.mxu1  ;;  %v1692_v46 = vpop.f32.mrf.mxu2 }
 0x407   :  { %v1673_v30 = vadd.f32 %v1672_v37, %v1652_v26  ;;  %v2030_v37 = vld [vmem:[#allocation9 + $0xe8] sm:$0xff] }
 0x408   :  { %v2026_v26 = vld [vmem:[#allocation9 + $0xc8] sm:$0xff] }
 0x409   :  { %v1715_v59 = vadd.f32 %v1673_v30, %v821_v42  ;;  %v2025_v30 = vld [vmem:[#allocation9 + $0xc0] sm:$0xff] }
 0x40b   :  { %v3970_v20 = vmax.f32 %v1715_v59, 0.0  ;;  %v2011_v59 = vld [vmem:[#allocation9 + $0x50] sm:$0xff] }
 0x40c   :  { %v1712_v2 = vpop.f32.mrf.mxu3 }
 0x40d   :  { %v1713_v4 = vadd.f32 %v1712_v2, %v1692_v46  ;;  %1739 = vmatmul.f32.vlgmr.msrb.gmra.mxu0 %v3970_v20  ;;  %1779 = vmatmul.f32.vlgmr.msrb.gmra.mxu2 %v3970_v20  ;;  %v2012_v2 = vld [vmem:[#allocation9 + $0x58] sm:$0xff]  ;;  %v2031_v46 = vld [vmem:[#allocation9 + $0xf0] sm:$0xff] }
 0x40e   :  { %1899 = vmatpush.msrb.mxu0 %v3528_v51  ;;  %1939 = vmatpush.msrb.mxu2 %v3753_v1  ;;  %v4424_v51 = vld [vmem:[#allocation34_spill] sm:$0xff] }
 0x40f   :  { %v1716_v13 = vadd.f32 %v1713_v4, %v4423_v53  ;;  %v2013_v4 = vld [vmem:[#allocation9 + $0x60] sm:$0xff] }
 0x410   :  { %1900 = vmatpush.msrb.mxu0 %v3533_v8  ;;  %1940 = vmatpush.msrb.mxu2 %v3758_v52  ;;  %v4425_v8 = vld [vmem:[#allocation83_spill] sm:$0xff]  ;;  %v4447_v52 = vld [vmem:[#allocation90_spill] sm:$0xff] }
 0x411   :  { %v3979_v42 = vmax.f32 %v1716_v13, 0.0  ;;  %v2005_v53 = vld [vmem:[#allocation9 + $0x20] sm:$0xff]  ;;  %v2024_v13 = vld [vmem:[#allocation9 + $0xb8] sm:$0xff] }
 0x412   :  { %1901 = vmatpush.msrb.mxu0 %v3537_v12  ;;  %1941 = vmatpush.msrb.mxu2 %v3764_v14  ;;  %v4426_v12 = vld [vmem:[#allocation88_spill] sm:$0xff] }
 0x413   :  { %1759 = vmatmul.f32.vlgmr.msrb.gmra.mxu1 %v3979_v42  ;;  %1799 = vmatmul.f32.vlgmr.msrb.gmra.mxu3 %v3979_v42 }
 0x414   :  { %1902 = vmatpush.msrb.mxu0 %v3634_v15  ;;  %1919 = vmatpush.msrb.mxu1 %v3547_v34  ;;  %v4427_v34 = vld [vmem:[#allocation42_spill] sm:$0xff]  ;;  %v4432_v15 = vld [vmem:[#allocation44_spill] sm:$0xff] }
 0x415   :  { %1942 = vmatpush.msrb.mxu2 %v3771_v0  ;;  %1959 = vmatpush.msrb.mxu3 %v3774_v27  ;;  %v4448_v27 = vld [vmem:[#allocation91_spill] sm:$0xff] }
 0x416   :  { %1903 = vmatpush.msrb.mxu0 %v3640_v47  ;;  %1920 = vmatpush.msrb.mxu1 %v3553_v36  ;;  %v4428_v36 = vld [vmem:[#allocation66_spill] sm:$0xff] }
 0x417   :  { %1943 = vmatpush.msrb.mxu2 %v3779_v41  ;;  %1960 = vmatpush.msrb.mxu3 %v3782_v38  ;;  %v4433_v47 = vld [vmem:[#allocation54_spill] sm:$0xff] }
 0x418   :  { %1904 = vmatpush.msrb.mxu0 %v3646_v45  ;;  %1921 = vmatpush.msrb.mxu1 %v3559_v43  ;;  %v4429_v43 = vld [vmem:[#allocation57_spill] sm:$0xff]  ;;  %v4434_v45 = vld [vmem:[#allocation36_spill] sm:$0xff] }
 0x419   :  { %1944 = vmatpush.msrb.mxu2 %v3787_v60  ;;  %1961 = vmatpush.msrb.mxu3 %v3790_v16 }
 0x41a   :  { %1905 = vmatpush.msrb.mxu0 %v3652_v54  ;;  %1922 = vmatpush.msrb.mxu1 %v3565_v5  ;;  %v4430_v5 = vld [vmem:[#allocation51_spill] sm:$0xff]  ;;  %v4435_v54 = vld [vmem:[#allocation85_spill] sm:$0xff] }
 0x41b   :  { %1945 = vmatpush.msrb.mxu2 %v3795_v49  ;;  %1962 = vmatpush.msrb.mxu3 %v3798_v55  ;;  %v2016_v49 = vld [vmem:[#allocation9 + $0x78] sm:$0xff] }
 0x41c   :  { %1906 = vmatpush.msrb.mxu0 %v3658_v44  ;;  %1923 = vmatpush.msrb.mxu1 %v3661_v56  ;;  %v4436_v44 = vld [vmem:[#allocation37_spill] sm:$0xff]  ;;  %v4437_v56 = vld [vmem:[#allocation30_spill] sm:$0xff] }
 0x41d   :  { %1946 = vmatpush.msrb.mxu2 %v3803_v33  ;;  %1963 = vmatpush.msrb.mxu3 %v3806_v9 }
 0x41e   :  { %1907 = vmatpush.msrb.mxu0 %v3666_v24  ;;  %1924 = vmatpush.msrb.mxu1 %v3669_v3  ;;  %v4438_v24 = vld [vmem:[#allocation70_spill] sm:$0xff] }
 0x41f   :  { %1947 = vmatpush.msrb.mxu2 %v3811_v23  ;;  %1964 = vmatpush.msrb.mxu3 %v3814_v18  ;;  %v4439_v3 = vld [vmem:[#allocation62_spill] sm:$0xff]  ;;  %v2015_v23 = vld [vmem:[#allocation9 + $0x70] sm:$0xff]  ;;  %v4449_v18 = vld [vmem:[#allocation63_spill] sm:$0xff] }
 0x420   :  { %1908 = vmatpush.msrb.mxu0 %v3674_v31  ;;  %1925 = vmatpush.msrb.mxu1 %v3677_v11  ;;  %v4440_v31 = vld [vmem:[#allocation47_spill] sm:$0xff]  ;;  %v4441_v11 = vld [vmem:[#allocation38_spill] sm:$0xff] }
 0x421   :  { %1948 = vmatpush.msrb.mxu2 %v3819_v62  ;;  %1965 = vmatpush.msrb.mxu3 %v3822_v6  ;;  %v2014_v6 = vld [vmem:[#allocation9 + $0x68] sm:$0xff] }
 0x422   :  { %1909 = vmatpush.msrb.mxu0 %v3682_v57  ;;  %1926 = vmatpush.msrb.mxu1 %v3685_v48  ;;  %v4442_v57 = vld [vmem:[#allocation45_spill] sm:$0xff]  ;;  %v4443_v48 = vld [vmem:[#allocation27_spill] sm:$0xff] }
 0x423   :  { %1949 = vmatpush.msrb.mxu2 %v3827_v39  ;;  %1966 = vmatpush.msrb.mxu3 %v3830_v32 }
 0x424   :  { %1910 = vmatpush.msrb.mxu0 %v3690_v29  ;;  %1927 = vmatpush.msrb.mxu1 %v3693_v50  ;;  %v4444_v29 = vld [vmem:[#allocation28_spill] sm:$0xff] }
 0x425   :  { %1950 = vmatpush.msrb.mxu2 %v3835_v63  ;;  %1967 = vmatpush.msrb.mxu3 %v3838_v19  ;;  %v4431_v19 = vld [vmem:[#allocation52_spill] sm:$0xff]  ;;  %v660_v50 = vadd.f32 %v4444_v29, %v4443_v48  ;;  %v4446_v63 = vld [vmem:[#allocation89_spill] sm:$0xff] }
 0x426   :  { %1911 = vmatpush.msrb.mxu0 %v3698_v22  ;;  %1928 = vmatpush.msrb.mxu1 %v3701_v10  ;;  %v4445_v22 = vld [vmem:[#allocation29_spill] sm:$0xff] }
 0x427   :  { %1951 = vmatpush.msrb.mxu2 %v4397_v40  ;;  %1968 = vmatpush.msrb.mxu3 %v4424_v51  ;;  %v701_v10 = vadd.f32 %v4445_v22, %v660_v50  ;;  %v2032_v40 = vld [vmem:[#allocation9 + $0xf8] sm:$0xff] }
 0x428   :  { %1912 = vmatpush.msrb.mxu0 %v4425_v8  ;;  %1929 = vmatpush.msrb.mxu1 %v4426_v12  ;;  %v2004_v51 = vld [vmem:[#allocation9 + $0x18] sm:$0xff]  ;;  %v2023_v8 = vld [vmem:[#allocation9 + $0xb0] sm:$0xff] }
 0x429   :  { %1952 = vmatpush.msrb.mxu2 %v4427_v34  ;;  %1969 = vmatpush.msrb.mxu3 %v4428_v36  ;;  %v742_v1 = vadd.f32 %v4446_v63, %v701_v10  ;;  %v2003_v12 = vld [vmem:[#allocation9 + $0x10] sm:$0xff]  ;;  %v2022_v34 = vld [vmem:[#allocation9 + $0xa8] sm:$0xff]  ;;  %v4455_v22 = vld [vmem:[#allocation94_spill] sm:$0xff] }
 0x42a   :  { %1913 = vmatpush.msrb.mxu0 %v4429_v43  ;;  %1930 = vmatpush.msrb.mxu1 %v4430_v5  ;;  %v2002_v36 = vld [vmem:[#allocation9 + $0x8] sm:$0xff]  ;;  %v2021_v43 = vld [vmem:[#allocation9 + $0xa0] sm:$0xff] }
 0x42b   :  { %1953 = vmatpush.msrb.mxu2 %v4431_v19  ;;  %1970 = vmatpush.msrb.mxu3 %v4432_v15  ;;  %v783_v32 = vadd.f32 %v4447_v52, %v742_v1  ;;  %v2001_v5 = vld [vmem:[#allocation9] sm:$0xff]  ;;  %v2020_v19 = vld [vmem:[#allocation9 + $0x98] sm:$0xff]  ;;  %v2019_v15 = vld [vmem:[#allocation9 + $0x90] sm:$0xff] }
 0x42c   :  { %1914 = vmatpush.msrb.mxu0 %v4433_v47  ;;  %1931 = vmatpush.msrb.mxu1 %v4434_v45  ;;  %v2018_v47 = vld [vmem:[#allocation9 + $0x88] sm:$0xff]  ;;  %v2017_v45 = vld [vmem:[#allocation9 + $0x80] sm:$0xff] }
 0x42d   :  { %1954 = vmatpush.msrb.mxu2 %v4435_v54  ;;  %1971 = vmatpush.msrb.mxu3 %v4436_v44  ;;  %v824_v41 = vadd.f32 %v4448_v27, %v783_v32  ;;  %v4450_v54 = vld [vmem:[#allocation31_spill] sm:$0xff]  ;;  %v4451_v44 = vld [vmem:[#allocation33_spill] sm:$0xff]  ;;  %v4456_v27 = vld [vmem:[#allocation68_spill] sm:$0xff] }
 0x42e   :  { %1932 = vmatpush.msrb.mxu1 %v4437_v56  ;;  %v663_v56 = vadd.f32 %v4451_v44, %v4450_v54 }
 0x42f   :  { %1972 = vmatpush.msrb.mxu3 %v4438_v24  ;;  %v4452_v24 = vld [vmem:[#allocation35_spill] sm:$0xff] }
 0x430   :  { %1933 = vmatpush.msrb.mxu1 %v4439_v3  ;;  %v704_v3 = vadd.f32 %v4452_v24, %v663_v56 }
 0x431   :  { %1973 = vmatpush.msrb.mxu3 %v4440_v31  ;;  %v4453_v31 = vld [vmem:[#allocation92_spill] sm:$0xff] }
 0x432   :  { %1934 = vmatpush.msrb.mxu1 %v4441_v11  ;;  %v745_v11 = vadd.f32 %v4453_v31, %v704_v3 }
 0x433   :  { %1974 = vmatpush.msrb.mxu3 %v4442_v57  ;;  %v4454_v57 = vld [vmem:[#allocation93_spill] sm:$0xff] }
 0x434   :  { %v786_v48 = vadd.f32 %v4454_v57, %v745_v11 }
 0x436   :  { %v827_v10 = vadd.f32 %v4455_v22, %v786_v48 }
 0x48a   :  { %v1740_v14 = vpop.f32.mrf.mxu0 }
 0x490   :  { %v1760_v0 = vpop.f32.mrf.mxu1  ;;  %v1780_v55 = vpop.f32.mrf.mxu2 }
 0x491   :  { %v1761_v38 = vadd.f32 %v1760_v0, %v1740_v14 }
 0x493   :  { %v1803_v60 = vadd.f32 %v1761_v38, %v824_v41 }
 0x495   :  { %v4049_v16 = vmax.f32 %v1803_v60, 0.0  ;;  %v4457_v60 = vld [vmem:[#allocation72_spill] sm:$0xff] }
 0x496   :  { %v1800_v33 = vpop.f32.mrf.mxu3 }
 0x497   :  { %v1801_v9 = vadd.f32 %v1800_v33, %v1780_v55  ;;  %1827 = vmatmul.f32.vlgmr.msra.gmra.mxu0 %v4049_v16  ;;  %1867 = vmatmul.f32.vlgmr.msra.gmra.mxu2 %v4049_v16  ;;  %v4459_v55 = vld [vmem:[#allocation79_spill] sm:$0xff]  ;;  %v4460_v33 = vld [vmem:[#allocation78_spill] sm:$0xff] }
 0x498   :  { %2037 = vmatpush.msra.mxu0 %v2016_v49  ;;  %v4458_v49 = vld [vmem:[#allocation73_spill] sm:$0xff] }
 0x499   :  { %v1804_v62 = vadd.f32 %v1801_v9, %v4449_v18  ;;  %v4461_v9 = vld [vmem:[#allocation32_spill] sm:$0xff]  ;;  %v4463_v18 = vld [vmem:[#allocation39_spill] sm:$0xff] }
 0x49a   :  { %2038 = vmatpush.msra.mxu0 %v2015_v23  ;;  %v4462_v23 = vld [vmem:[#allocation64_spill] sm:$0xff] }
 0x49b   :  { %v4054_v39 = vmax.f32 %v1804_v62, 0.0  ;;  %v4464_v62 = vld [vmem:[#allocation49_spill] sm:$0xff] }
 0x49c   :  { %2039 = vmatpush.msra.mxu0 %v2014_v6  ;;  %v4465_v6 = vld [vmem:[#allocation40_spill] sm:$0xff] }
 0x49d   :  { %1847 = vmatmul.f32.vlgmr.msra.gmra.mxu1 %v4054_v39  ;;  %1887 = vmatmul.f32.vlgmr.msra.gmra.mxu3 %v4054_v39 }
 0x49e   :  { %2040 = vmatpush.msra.mxu0 %v2013_v4  ;;  %2078 = vmatpush.msra.mxu1 %v2032_v40  ;;  %v4466_v4 = vld [vmem:[#allocation43_spill] sm:$0xff] }
 0x49f   :  { %v666_v40 = vadd.f32 %v4466_v4, %v4465_v6 }
 0x4a0   :  { %2041 = vmatpush.msra.mxu0 %v2012_v2  ;;  %2079 = vmatpush.msra.mxu1 %v2031_v46  ;;  %v4467_v2 = vld [vmem:[#allocation46_spill] sm:$0xff] }
 0x4a1   :  { %v707_v46 = vadd.f32 %v4467_v2, %v666_v40 }
 0x4a2   :  { %2042 = vmatpush.msra.mxu0 %v2011_v59  ;;  %2080 = vmatpush.msra.mxu1 %v2030_v37  ;;  %v4468_v59 = vld [vmem:[#allocation95_spill] sm:$0xff] }
 0x4a3   :  { %v748_v37 = vadd.f32 %v4468_v59, %v707_v46 }
 0x4a4   :  { %2043 = vmatpush.msra.mxu0 %v2010_v17  ;;  %2081 = vmatpush.msra.mxu1 %v2029_v58  ;;  %v4469_v58 = vld [vmem:[#allocation96_spill] sm:$0xff] }
 0x4a6   :  { %2044 = vmatpush.msra.mxu0 %v2009_v35  ;;  %2082 = vmatpush.msra.mxu1 %v2028_v28  ;;  %v789_v35 = vadd.f32 %v4469_v58, %v748_v37 }
 0x4a8   :  { %2045 = vmatpush.msra.mxu0 %v2008_v25  ;;  %2083 = vmatpush.msra.mxu1 %v2027_v21 }
 0x4aa   :  { %2046 = vmatpush.msra.mxu0 %v2007_v61  ;;  %2084 = vmatpush.msra.mxu1 %v2026_v26  ;;  %v4472_v61 = vld [vmem:[#allocation74_spill] sm:$0xff] }
 0x4ac   :  { %2047 = vmatpush.msra.mxu0 %v2006_v7  ;;  %2085 = vmatpush.msra.mxu1 %v2025_v30  ;;  %v2176_v7 = vld [vmem:[#allocation11] ss:$0 sm:$0xff] }
 0x4ae   :  { %2048 = vmatpush.msra.mxu0 %v2005_v53  ;;  %2086 = vmatpush.msra.mxu1 %v2024_v13 }
 0x4b0   :  { %2049 = vmatpush.msra.mxu0 %v2004_v51  ;;  %2087 = vmatpush.msra.mxu1 %v2023_v8  ;;  %v4473_v51 = vld [vmem:[#allocation75_spill] sm:$0xff] }
 0x4b2   :  { %2050 = vmatpush.msra.mxu0 %v2003_v12  ;;  %2088 = vmatpush.msra.mxu1 %v2022_v34 }
 0x4b4   :  { %2051 = vmatpush.msra.mxu0 %v2002_v36  ;;  %2089 = vmatpush.msra.mxu1 %v2021_v43 }
 0x4b6   :  { %2052 = vmatpush.msra.mxu0 %v2001_v5  ;;  %2090 = vmatpush.msra.mxu1 %v2020_v19 }
 0x4b8   :  { %2091 = vmatpush.msra.mxu1 %v2019_v15 }
 0x4ba   :  { %2092 = vmatpush.msra.mxu1 %v2018_v47 }
 0x4bc   :  { %2093 = vmatpush.msra.mxu1 %v2017_v45 }
 0x514   :  { %v1828_v29 = vpop.f32.mrf.mxu0 }
 0x51a   :  { %v1848_v50 = vpop.f32.mrf.mxu1  ;;  %v1868_v32 = vpop.f32.mrf.mxu2 }
 0x51b   :  { %v1849_v63 = vadd.f32 %v1848_v50, %v1828_v29 }
 0x51d   :  { %v1891_v1 = vadd.f32 %v1849_v63, %v827_v10 }
 0x51f   :  { %v1893_v52 = vmax.f32 %v1891_v1, 0.0 }
 0x520   :  { %v1888_v14 = vpop.f32.mrf.mxu3 }
 0x521   :  { %v1889_v0 = vadd.f32 %v1888_v14, %v1868_v32  ;;  %1915 = vmatmul.f32.vlgmr.msrb.gmra.mxu0 %v1893_v52  ;;  %1955 = vmatmul.f32.vlgmr.msrb.gmra.mxu2 %v1893_v52 }
 0x523   :  { %v1892_v41 = vadd.f32 %v1889_v0, %v4456_v27 }
 0x525   :  { %v1894_v38 = vmax.f32 %v1892_v41, 0.0 }
 0x527   :  { %1935 = vmatmul.f32.vlgmr.msrb.gmra.mxu1 %v1894_v38  ;;  %1975 = vmatmul.f32.vlgmr.msrb.gmra.mxu3 %v1894_v38 }
 0x529   :  { %2053 = vmatmul.f32.vlgmr.msra.gmra.mxu0 %v4457_v60 }
 0x52f   :  { %2094 = vmatmul.f32.vlgmr.msra.gmra.mxu1 %v4458_v49 }
 0x531   :  { %2056 = vmatmul.f32.gmra.mxu0 %v4459_v55 }
 0x537   :  { %2097 = vmatmul.f32.gmra.mxu1 %v4460_v33 }
 0x539   :  { %2059 = vmatmul.f32.gmra.mxu0 %v4461_v9 }
 0x53f   :  { %2100 = vmatmul.f32.gmra.mxu1 %v4462_v23 }
 0x541   :  { %2062 = vmatmul.f32.gmra.mxu0 %v4463_v18 }
 0x547   :  { %2103 = vmatmul.f32.gmra.mxu1 %v4464_v62 }
 0x549   :  { %2065 = vmatmul.f32.gmra.mxu0 %v3970_v20  ;;  %v4470_v20 = vld [vmem:[#allocation16_spill] sm:$0xff] }
 0x54a   :  { %v830_v25 = vadd.f32 %v4470_v20, %v789_v35 }
 0x54f   :  { %2106 = vmatmul.f32.gmra.mxu1 %v3979_v42 }
 0x551   :  { %2068 = vmatmul.f32.gmra.mxu0 %v4049_v16  ;;  %v4471_v16 = vld [vmem:[#allocation67_spill] sm:$0xff] }
 0x557   :  { %2109 = vmatmul.f32.gmra.mxu1 %v4054_v39  ;;  %v1158_v39 = vadd.f32 %v4472_v61, %v4471_v16 }
 0x559   :  { %2071 = vmatmul.f32.gmra.mxu0 %v1893_v52  ;;  %v1199_v8 = vadd.f32 %v4473_v51, %v1158_v39 }
 0x55f   :  { %2112 = vmatmul.f32.gmra.mxu1 %v1894_v38 }
 0x59e   :  { %v1916_v17 = vpop.f32.mrf.mxu0 }
 0x5a4   :  { %v1936_v28 = vpop.f32.mrf.mxu1  ;;  %v1956_v53 = vpop.f32.mrf.mxu2 }
 0x5a5   :  { %v1937_v42 = vadd.f32 %v1936_v28, %v1916_v17 }
 0x5a6   :  { %v2054_v21 = vpop.f32.mrf.mxu0 }
 0x5a7   :  { %v1979_v26 = vadd.f32 %v1937_v42, %v830_v25  ;;  %v2055_v12 = vadd.f32 %v2176_v7, %v2054_v21 }
 0x5a9   :  { %v1981_v30 = vmax.f32 %v1979_v26, 0.0 }
 0x5aa   :  { %v1976_v13 = vpop.f32.mrf.mxu3 }
 0x5ab   :  { %v1977_v34 = vadd.f32 %v1976_v13, %v1956_v53  ;;  %2074 = vmatmul.f32.gmra.mxu0 %v1981_v30 }
 0x5ac   :  { %v2095_v36 = vpop.f32.mrf.mxu1 }
 0x5ad   :  { %v1980_v43 = vadd.f32 %v1977_v34, %v1199_v8  ;;  %v2096_v5 = vadd.f32 %v2095_v36, %v2055_v12 }
 0x5ae   :  { %v2057_v19 = vpop.f32.mrf.mxu0 }
 0x5af   :  { %v1982_v15 = vmax.f32 %v1980_v43, 0.0  ;;  %2119 = vst [vmem:[%s4116_s6] sm:$0xff] %v2096_v5  ;;  %v2058_v47 = vadd.f32 %v2176_v7, %v2057_v19 }
 0x5b1   :  { %2115 = vmatmul.f32.gmra.mxu1 %v1982_v15 }
 0x5b4   :  { %v2098_v45 = vpop.f32.mrf.mxu1 }
 0x5b5   :  { %v2099_v54 = vadd.f32 %v2098_v45, %v2058_v47 }
 0x5b6   :  { %v2060_v44 = vpop.f32.mrf.mxu0 }
 0x5b7   :  { %2120 = vst [vmem:[%s4116_s6 + $0x8] sm:$0xff] %v2099_v54  ;;  %v2061_v56 = vadd.f32 %v2176_v7, %v2060_v44 }
 0x5bc   :  { %v2101_v24 = vpop.f32.mrf.mxu1 }
 0x5bd   :  { %v2102_v3 = vadd.f32 %v2101_v24, %v2061_v56 }
 0x5be   :  { %v2063_v31 = vpop.f32.mrf.mxu0 }
 0x5bf   :  { %2121 = vst [vmem:[%s4116_s6 + $0x10] sm:$0xff] %v2102_v3  ;;  %v2064_v11 = vadd.f32 %v2176_v7, %v2063_v31 }
 0x5c4   :  { %v2104_v57 = vpop.f32.mrf.mxu1 }
 0x5c5   :  { %v2105_v48 = vadd.f32 %v2104_v57, %v2064_v11 }
 0x5c6   :  { %v2066_v29 = vpop.f32.mrf.mxu0 }
 0x5c7   :  { %2122 = vst [vmem:[%s4116_s6 + $0x18] sm:$0xff] %v2105_v48  ;;  %v2067_v50 = vadd.f32 %v2176_v7, %v2066_v29 }
 0x5cc   :  { %v2107_v22 = vpop.f32.mrf.mxu1 }
 0x5cd   :  { %v2108_v10 = vadd.f32 %v2107_v22, %v2067_v50 }
 0x5ce   :  { %v2069_v63 = vpop.f32.mrf.mxu0 }
 0x5cf   :  { %2123 = vst [vmem:[%s4116_s6 + $0x20] sm:$0xff] %v2108_v10  ;;  %v2070_v1 = vadd.f32 %v2176_v7, %v2069_v63 }
 0x5d4   :  { %v2110_v52 = vpop.f32.mrf.mxu1 }
 0x5d5   :  { %v2111_v32 = vadd.f32 %v2110_v52, %v2070_v1 }
 0x5d6   :  { %v2072_v14 = vpop.f32.mrf.mxu0 }
 0x5d7   :  { %2124 = vst [vmem:[%s4116_s6 + $0x28] sm:$0xff] %v2111_v32  ;;  %v2073_v0 = vadd.f32 %v2176_v7, %v2072_v14 }
 0x5dc   :  { %v2113_v27 = vpop.f32.mrf.mxu1 }
 0x5dd   :  { %v2114_v41 = vadd.f32 %v2113_v27, %v2073_v0 }
 0x5df   :  { %2125 = vst [vmem:[%s4116_s6 + $0x30] sm:$0xff] %v2114_v41 }
 0x628   :  { %v2075_v38 = vpop.f32.mrf.mxu0 }
 0x629   :  { %v2076_v60 = vadd.f32 %v2176_v7, %v2075_v38 }
 0x62e   :  { %v2116_v49 = vpop.f32.mrf.mxu1 }
 0x62f   :  { %v2117_v55 = vadd.f32 %v2116_v49, %v2076_v60 }
 0x631   :  { %2126 = vst [vmem:[%s4116_s6 + $0x38] sm:$0xff] %v2117_v55 }
 0x632   :  { %2131 = vsyncpa [#allocation5], 1 }
 0x633   :  { %2132 = vsyncpa [#allocation7], 1 }
 0x634   :  { %2133 = vsyncpa [#allocation10], 1 }

</bundles_post_ra>
